<compile_context>
chip_gen: v6e
topology: v6e:2x2x1
jax: 0.10.0
libtpu: 0.0.40
codegen_flags: <defaults>
</compile_context>

<pallas_src>
import jax
import jax.numpy as jnp
from jax import lax
from jax.experimental import pallas as pl
from jax.experimental.pallas import tpu as pltpu

SQRT5 = 5.0 ** 0.5
_VMEM = pl.BlockSpec(memory_space=pltpu.MemorySpace.VMEM)
_SMEM = pl.BlockSpec(memory_space=pltpu.MemorySpace.SMEM)
# Gridless kernels: actual VMEM footprint < 1 MiB (largest operand is the
# ~188 KiB modelY weight slab after lane padding). 4 MiB = generous headroom
# on v5e/v6e/v7x without over-reserving scoped VMEM.
_CPARAMS = pltpu.CompilerParams(vmem_limit_bytes=4 * 1024 * 1024)


def _round_up(x, m):
    return ((x + m - 1) // m) * m


# ----------------------------------------------------------------------------
# Shared in-kernel helper: Matern-2.5 pairwise kernel from a pre-scaled x
# (gpytorch MaternKernel(nu=2.5): d = ||xi - xj|| / lengthscale)
# ----------------------------------------------------------------------------
def _matern25_from_scaled(xs):
    _, d = xs.shape
    # Gram matrix xs @ xs.T without an explicit transpose (contract last dims).
    g = lax.dot_general(xs, xs, (((1,), (1,)), ((), ())),
                        preferred_element_type=jnp.float32)            # (n, n)
    xsq = xs * xs
    sq_col = jnp.sum(xsq, axis=1, keepdims=True)                        # (n, 1)
    # Row vector of squared norms via a tiny MXU push (no in-kernel transpose).
    ones8 = jnp.ones((8, d), jnp.float32)
    sq_row = lax.dot_general(ones8, xsq, (((1,), (1,)), ((), ())),
                             preferred_element_type=jnp.float32)[0:1, :]  # (1, n)
    d2 = jnp.maximum(sq_col + sq_row - 2.0 * g, 0.0)
    # Guard sqrt(0) so the diagonal keeps a finite gradient; value unchanged.
    d2_safe = jnp.where(d2 > 0.0, d2, 1.0)
    dist = jnp.where(d2 > 0.0, jnp.sqrt(d2_safe), 0.0)
    return (1.0 + SQRT5 * dist + (5.0 / 3.0) * d2) * jnp.exp(-SQRT5 * dist)


# ----------------------------------------------------------------------------
# meanQg weight slab: [W1 | b1 | W2 | b2 | W3 | b3] stacked row-wise,
# every block 8-row aligned, W3/b3 column-padded to dim_h lanes.
# ----------------------------------------------------------------------------
def _qg_slab_layout(din_qg, dim_h):
    din_pad = _round_up(din_qg, 8)
    r_w1 = 0
    r_b1 = r_w1 + din_pad
    r_w2 = r_b1 + 8
    r_b2 = r_w2 + dim_h
    r_w3 = r_b2 + 8
    r_b3 = r_w3 + dim_h
    rows = r_b3 + 8
    return din_pad, (r_w1, r_b1, r_w2, r_b2, r_w3, r_b3), rows


def _rpad(a, rows):
    return jnp.concatenate(
        [a, jnp.zeros((rows - a.shape[0], a.shape[1]), jnp.float32)], axis=0)


def _cpad(a, cols):
    return jnp.concatenate(
        [a, jnp.zeros((a.shape[0], cols - a.shape[1]), jnp.float32)], axis=1)


def pack_qg_slab(meanQg, din_qg, dim_h):
    q1, qb1, q2, qb2, q3, qb3 = [a.astype(jnp.float32) for a in meanQg]
    din_pad, _, _ = _qg_slab_layout(din_qg, dim_h)
    return jnp.concatenate([
        _rpad(q1, din_pad), _rpad(qb1, 8),
        q2, _rpad(qb2, 8),
        _cpad(q3, dim_h), _rpad(_cpad(qb3, dim_h), 8)], axis=0)


# ----------------------------------------------------------------------------
# modelY weight slab: trunk (zero-padded to a uniform 2*dim_h hidden) followed
# by the two heads merged into block-diagonal matrices (single MXU pass each).
# ----------------------------------------------------------------------------
def _y_slab_layout(dim_x, dim_h):
    dx_pad = _round_up(dim_x + 2, 8)      # columns: [X | W | Yobs | 0...]
    th = 2 * dim_h
    offs, off = {}, 0
    for name, size in (("s1", dx_pad), ("b1", 8), ("s2", th), ("b2", 8),
                       ("s3", th), ("b3", 8), ("h1", th), ("hb1", 8),
                       ("h2", th), ("hb2", 8), ("h3", th), ("hb3", 8)):
        offs[name] = off
        off += size
    return dx_pad, offs, off


def pack_y_slab(modelY, dim_x, dim_h):
    (s1, sb1, s2, sb2, s3, sb3,
     a1, ab1, a2, ab2, a3, ab3,
     c1, cb1, c2, cb2, c3, cb3) = [a.astype(jnp.float32) for a in modelY]
    dx_pad, _, _ = _y_slab_layout(dim_x, dim_h)
    th = 2 * dim_h
    z_hh = jnp.zeros((dim_h, dim_h), jnp.float32)
    z_h1 = jnp.zeros((dim_h, 1), jnp.float32)

    # trunk, padded so the hidden state carries zeros in lanes dim_h:2*dim_h
    S1 = _rpad(_cpad(s1, th), dx_pad)
    B1 = _rpad(_cpad(sb1, th), 8)
    S2 = _rpad(_cpad(s2, th), th)
    B2 = _rpad(_cpad(sb2, th), 8)
    S3 = _rpad(_cpad(s3, th), th)
    B3 = _rpad(_cpad(sb3, th), 8)
    # merged heads: [modelY0 | modelY1] -> block-diagonal
    H1 = _rpad(jnp.concatenate([a1, c1], axis=1), th)
    HB1 = _rpad(jnp.concatenate([ab1, cb1], axis=1), 8)
    H2 = jnp.concatenate([jnp.concatenate([a2, z_hh], axis=1),
                          jnp.concatenate([z_hh, c2], axis=1)], axis=0)
    HB2 = _rpad(jnp.concatenate([ab2, cb2], axis=1), 8)
    H3 = _cpad(jnp.concatenate([jnp.concatenate([a3, z_h1], axis=1),
                                jnp.concatenate([z_h1, c3], axis=1)], axis=0), th)
    HB3 = _rpad(_cpad(jnp.concatenate([ab3, cb3], axis=1), th), 8)
    return jnp.concatenate([S1, B1, S2, B2, S3, B3,
                            H1, HB1, H2, HB2, H3, HB3], axis=0)


# ----------------------------------------------------------------------------
# Fused kernel #1: meanQg MLP + Matern(stats_cat) + Matern(stats_X)
#                  + Matern(X) & fKobs mixing  ->  Kobs + packed small slab
# ----------------------------------------------------------------------------
def _make_cov_kernel(dim_x, dim_h, din_qg):
    din_pad, (r_w1, r_b1, r_w2, r_b2, r_w3, r_b3), _ = _qg_slab_layout(din_qg, dim_h)

    def kernel(scal_ref, stats_ref, xwy_ref, qgw_ref, kobs_ref, small_ref):
        # packed SMEM scalars
        inv_ls_qg = scal_ref[0]
        inv_ls_k = scal_ref[1]
        inv_ls_pg = scal_ref[2]
        p00, p01, p10, p11 = scal_ref[3], scal_ref[4], scal_ref[5], scal_ref[6]
        s00, s11 = scal_ref[7], scal_ref[8]

        # stats_cat = [stats_Yobs0 | stats_Yobs1 | stats_X | stats_W] built
        # in-kernel from the raw stats_feats load (zero-padded to din_pad lanes;
        # zero columns are inert for both the MLP and the Matern distances).
        sf = stats_ref[...].astype(jnp.float32)            # (s, 12 + dim_stats*dim_x)
        parts = [sf[:, 0:8], sf[:, 12:], sf[:, 8:12]]
        if din_pad > din_qg:
            parts.append(jnp.zeros((sf.shape[0], din_pad - din_qg), jnp.float32))
        stats_cat = jnp.concatenate(parts, axis=1)         # (s, din_pad)
        stats_x = sf[:, 12:]                               # (s, dim_stats*dim_x)

        # ---- model_meanQg MLP (single weight-slab operand, static slices) ----
        w = qgw_ref
        h = jnp.maximum(jnp.dot(stats_cat, w[r_w1:r_w1 + din_pad, :],
                                preferred_element_type=jnp.float32)
                        + w[r_b1:r_b1 + 1, :], 0.0)
        h = jnp.maximum(jnp.dot(h, w[r_w2:r_w2 + dim_h, :],
                                preferred_element_type=jnp.float32)
                        + w[r_b2:r_b2 + 1, :], 0.0)
        mean_full = (jnp.dot(h, w[r_w3:r_w3 + dim_h, :],
                             preferred_element_type=jnp.float32)
                     + w[r_b3:r_b3 + 1, :])
        mean_qg = mean_full[:, 0:2]                        # (s, 2)

        # ---- covQg / covPg ----
        cov_qg = _matern25_from_scaled(stats_cat * inv_ls_qg)   # (s, s)
        kg = _matern25_from_scaled(stats_x * inv_ls_pg)         # (s, s)

        # ---- Kobs = fKobs(W, Matern(X), Phi, Sig) ----
        xwy = xwy_ref[...].astype(jnp.float32)             # (N, dx_pad)
        x = xwy[:, 0:dim_x]
        wv = xwy[:, dim_x:dim_x + 1]                       # (N, 1)
        k = _matern25_from_scaled(x * inv_ls_k)            # (N, N)
        # W^T = (1, N) derived in-kernel via a tiny ones-matmul (no transpose).
        ones81 = jnp.ones((8, 1), jnp.float32)
        wt = lax.dot_general(ones81, wv, (((1,), (1,)), ((), ())),
                             preferred_element_type=jnp.float32)[0:1, :]
        # (1-w)(1-wt)p00 + w*wt*p11 + (1-w)wt*p01 + w(1-wt)p10  (factored):
        coef = (p00 + wv * (p10 - p00) + wt * (p01 - p00)
                + (wv * wt) * (p00 + p11 - p01 - p10))
        diag_vals = (1.0 - wv) * (1.0 - wv) * s00 + wv * wv * s11   # (N, 1)
        nn = k.shape[0]
        ri = lax.broadcasted_iota(jnp.int32, (nn, nn), 0)
        ci = lax.broadcasted_iota(jnp.int32, (nn, nn), 1)
        kobs = coef * k
        kobs_ref[...] = jnp.where(ri == ci, kobs + diag_vals, kobs)

        # lane-packed small output: [cov_Qg | Kg | mean_Qg]  (one DMA)
        small_ref[...] = jnp.concatenate([cov_qg, kg, mean_qg], axis=1)

    return kernel


def fused_covariances(cov_scal, stats_feats, xwy, qg_slab, dim_x, dim_h):
    s, din_qg = stats_feats.shape
    n = xwy.shape[0]
    kobs, small = pl.pallas_call(
        _make_cov_kernel(dim_x, dim_h, din_qg),
        out_shape=(jax.ShapeDtypeStruct((n, n), jnp.float32),
                   jax.ShapeDtypeStruct((s, 2 * s + 2), jnp.float32)),
        in_specs=[_SMEM, _VMEM, _VMEM, _VMEM],
        out_specs=(_VMEM, _VMEM),
        compiler_params=_CPARAMS,
    )(cov_scal, stats_feats.astype(jnp.float32), xwy, qg_slab)
    cov_qg = small[:, 0:s]
    kg = small[:, s:2 * s]
    mean_qg = small[:, 2 * s:2 * s + 2]
    return mean_qg, cov_qg, kg, kobs


# ----------------------------------------------------------------------------
# Fused kernel #2: modelY shared trunk + merged block-diagonal heads +
#                  Phi_half/g mixing + residual.  Output (N,2) = [Yobs-muObs | muMis].
# ----------------------------------------------------------------------------
def _make_y_kernel(dim_x, dim_h):
    dx_pad, o, _ = _y_slab_layout(dim_x, dim_h)
    th = 2 * dim_h

    def kernel(scal_ref, xwy_ref, wref, out_ref):
        ph00 = scal_ref[0]      # Phi_half is lower-triangular (Cholesky), so
        ph10 = scal_ref[1]      # only [0,0], [1,0], [1,1] are needed.
        ph11 = scal_ref[2]
        g0 = scal_ref[3]
        g1 = scal_ref[4]

        xwy = xwy_ref[...].astype(jnp.float32)             # (N, dx_pad)
        wv = xwy[:, dim_x:dim_x + 1]                       # W
        yobs = xwy[:, dim_x + 1:dim_x + 2]                 # Yobs
        # extra data columns (W, Yobs, padding) are inert: S1 rows dim_x: are 0

        w = wref
        h = jnp.maximum(jnp.dot(xwy, w[o["s1"]:o["s1"] + dx_pad, :],
                                preferred_element_type=jnp.float32)
                        + w[o["b1"]:o["b1"] + 1, :], 0.0)
        h = jnp.maximum(jnp.dot(h, w[o["s2"]:o["s2"] + th, :],
                                preferred_element_type=jnp.float32)
                        + w[o["b2"]:o["b2"] + 1, :], 0.0)
        h = jnp.maximum(jnp.dot(h, w[o["s3"]:o["s3"] + th, :],
                                preferred_element_type=jnp.float32)
                        + w[o["b3"]:o["b3"] + 1, :], 0.0)
        # merged heads: cols 0 = modelY0 output, col 1 = modelY1 output
        t = jnp.maximum(jnp.dot(h, w[o["h1"]:o["h1"] + th, :],
                                preferred_element_type=jnp.float32)
                        + w[o["hb1"]:o["hb1"] + 1, :], 0.0)
        t = jnp.maximum(jnp.dot(t, w[o["h2"]:o["h2"] + th, :],
                                preferred_element_type=jnp.float32)
                        + w[o["hb2"]:o["hb2"] + 1, :], 0.0)
        mu = (jnp.dot(t, w[o["h3"]:o["h3"] + th, :],
                      preferred_element_type=jnp.float32)
              + w[o["hb3"]:o["hb3"] + 1, :])               # (N, th); cols 0:2 valid

        m0 = mu[:, 0:1] + g0
        m1 = mu[:, 1:2] + g1
        ta = ph00 * m0
        tb = ph10 * m0 + ph11 * m1
        d = wv * (tb - ta)
        mu_obs = ta + d                                    # (1-W)*ta + W*tb
        mu_mis = tb - d                                    # W*ta + (1-W)*tb
        out_ref[...] = jnp.concatenate([yobs - mu_obs, mu_mis], axis=1)

    return kernel


def modely_residual(phi_half, g, xwy, y_slab, dim_x, dim_h):
    n = xwy.shape[0]
    scal = jnp.concatenate([
        jnp.stack([phi_half[0, 0], phi_half[1, 0], phi_half[1, 1],
                   g[0], g[1]]).astype(jnp.float32),
        jnp.zeros((3,), jnp.float32)])
    out = pl.pallas_call(
        _make_y_kernel(dim_x, dim_h),
        out_shape=jax.ShapeDtypeStruct((n, 2), jnp.float32),
        in_specs=[_SMEM, _VMEM, _VMEM],
        out_specs=_VMEM,
        compiler_params=_CPARAMS,
    )(scal, xwy, y_slab)
    return out[:, 0:1], out[:, 1:2]    # (r = Yobs - muObs,  muMis)


# ----------------------------------------------------------------------------
# Full forward pass (inter_dependency=True branch of FederatedCausalNet.forward)
# ----------------------------------------------------------------------------
def federated_causal_net_forward(params, data, idx_source, key):
    Yobs, X, W, stats = data["Yobs"], data["X"], data["W"], data["stats_feats"]
    n, dim_x = X.shape
    dim_h = params["y_slab"].shape[1] // 2

    d0 = dq = 100
    n0 = nq = 100
    V0 = jnp.array([[1.0, 0.5], [0.5, 1.0]], jnp.float32)
    S0 = jnp.array([[1.0, 0.5], [0.5, 1.0]], jnp.float32)
    ONE = jnp.array([[1.0, 0.0], [0.0, 0.0]], jnp.float32)
    TWO = jnp.array([[0.0, 0.0], [0.0, 1.0]], jnp.float32)
    THREE = jnp.array([[0.0, 0.0], [1.0, 0.0]], jnp.float32)

    rho = jax.nn.sigmoid(params["rho_logit"])
    eta = jax.nn.sigmoid(params["eta_logit"])
    nu = jnp.exp(params["nu_logit"])
    delta = jnp.exp(params["delta_logit"])

    V_half = nu[0] * ONE + jnp.sqrt(1.0 - rho ** 2) * nu[1] * TWO + rho * nu[1] * THREE
    V = V_half @ V_half.T
    # NOTE: matches the PyTorch source exactly, which uses rho (not eta) here.
    S_half = delta[0] * ONE + jnp.sqrt(1.0 - eta ** 2) * delta[1] * TWO + rho * delta[1] * THREE
    S = S_half @ S_half.T

    k1, k2, k3 = jax.random.split(key, 3)
    eps_Phi = jax.random.normal(k1, (dq, 2), jnp.float32)     # rand_wishartI(2, dq)
    Phi = V_half @ (eps_Phi.T @ eps_Phi) @ V_half.T
    eps_Sig = jax.random.normal(k2, (nq, 2), jnp.float32)     # rand_wishartI(2, nq)
    Sig = S_half @ (eps_Sig.T @ eps_Sig) @ S_half.T

    # Lane-packed [X | W | Yobs | 0...] data slab shared by both Pallas kernels.
    dx_pad, _, _ = _y_slab_layout(dim_x, dim_h)
    parts = [X, W, Yobs]
    if dx_pad > dim_x + 2:
        parts.append(jnp.zeros((n, dx_pad - dim_x - 2), jnp.float32))
    xwy = jnp.concatenate(parts, axis=1).astype(jnp.float32)

    # One flat SMEM scalar vector for the fused covariance kernel.
    cov_scal = jnp.concatenate([
        jnp.stack([1.0 / params["ls_Qg"], 1.0 / params["ls_K"], 1.0 / params["ls_Pg"],
                   Phi[0, 0], Phi[0, 1], Phi[1, 0], Phi[1, 1],
                   Sig[0, 0], Sig[1, 1]]).astype(jnp.float32),
        jnp.zeros((7,), jnp.float32)])

    # ---- single fused Pallas launch: meanQg MLP + 3 Materns + fKobs ----
    mean_Qg, cov_Qg, Kg, Kobs = fused_covariances(
        cov_scal, stats, xwy, params["qg_slab"], dim_x, dim_h)        # [Pallas]

    eps_g = jax.random.normal(k3, (stats.shape[0], 2), jnp.float32)
    L_Qg = jnp.linalg.cholesky(cov_Qg)
    sample_g = mean_Qg + L_Qg @ eps_g

    mug = params["muPg"]
    # Cholesky factors reused for solve + logdet (SPD kernel matrices).
    L_Kg = jnp.linalg.cholesky(Kg)
    lad_Kg = 2.0 * jnp.sum(jnp.log(jnp.diagonal(L_Kg)))
    lad_Qg = 2.0 * jnp.sum(jnp.log(jnp.diagonal(L_Qg)))
    tr_g = jnp.trace(jax.scipy.linalg.cho_solve((L_Kg, True), cov_Qg))
    dm0 = mean_Qg[:, 0:1] - mug[:, 0:1]
    dm1 = mean_Qg[:, 1:2] - mug[:, 1:2]
    klg0 = 0.5 * (tr_g + dm0.T @ jax.scipy.linalg.cho_solve((L_Kg, True), dm0)
                  + lad_Kg - lad_Qg)
    klg1 = 0.5 * (tr_g + dm1.T @ jax.scipy.linalg.cho_solve((L_Kg, True), dm1)
                  + lad_Kg - lad_Qg)

    sgn_Phi, lad_Phi = jnp.linalg.slogdet(jnp.linalg.inv(V0) @ V)
    klPhi = -0.5 * d0 * sgn_Phi * lad_Phi + 0.5 * dq * jnp.trace(jnp.linalg.inv(V0) @ V)
    sgn_S, lad_S = jnp.linalg.slogdet(jnp.linalg.inv(S0) @ S)
    klSig = -0.5 * n0 * sgn_S * lad_S + 0.5 * nq * jnp.trace(jnp.linalg.inv(S0) @ S)

    Phi_half = jnp.linalg.cholesky(Phi)
    g = sample_g[idx_source, :]                               # (2,) for scalar idx
    # ---- second Pallas launch: trunk + merged heads + mixing + residual ----
    r, _muMis = modely_residual(Phi_half, g, xwy, params["y_slab"],
                                dim_x, dim_h)                          # [Pallas]

    # Cholesky of Kobs reused for the quadratic form and the logdet.
    L_obs = jnp.linalg.cholesky(Kobs)
    lad_obs = 2.0 * jnp.sum(jnp.log(jnp.diagonal(L_obs)))
    alpha = jax.scipy.linalg.cho_solve((L_obs, True), r)
    loss_recon = 0.5 * lad_obs + 0.5 * (r.T @ alpha)
    loss = (loss_recon + klg0 + klg1 + klPhi + klSig) / Yobs.shape[0]
    return loss                                               # shape (1, 1)


# ----------------------------------------------------------------------------
# Deterministic parameter construction (weight slabs packed ONCE here; in a
# training loop re-pack once per optimizer step, not per forward call).
# ----------------------------------------------------------------------------
def _init_linear(key, din, dout, scale=0.1):
    kw, kb = jax.random.split(key)
    w = scale * jax.random.normal(kw, (din, dout), jnp.float32)
    b = scale * jax.random.normal(kb, (1, dout), jnp.float32)
    return w, b


def make_params(key, dim_x, dim_h, n_sources, dim_stats=4):
    keys = jax.random.split(key, 12)
    din_qg = (dim_x + 1 + 1 + 1) * dim_stats

    # modelYshare + modelY0 + modelY1
    s1, sb1 = _init_linear(keys[0], dim_x, dim_h)
    s2, sb2 = _init_linear(keys[1], dim_h, dim_h)
    s3, sb3 = _init_linear(keys[2], dim_h, dim_h)
    a1, ab1 = _init_linear(keys[3], dim_h, dim_h)
    a2, ab2 = _init_linear(keys[4], dim_h, dim_h)
    a3, ab3 = _init_linear(keys[5], dim_h, 1)
    c1, cb1 = _init_linear(keys[6], dim_h, dim_h)
    c2, cb2 = _init_linear(keys[7], dim_h, dim_h)
    c3, cb3 = _init_linear(keys[8], dim_h, 1)
    modelY = (s1, sb1, s2, sb2, s3, sb3,
              a1, ab1, a2, ab2, a3, ab3,
              c1, cb1, c2, cb2, c3, cb3)

    # model_meanQg
    q1, qb1 = _init_linear(keys[9], din_qg, dim_h)
    q2, qb2 = _init_linear(keys[10], dim_h, dim_h)
    q3, qb3 = _init_linear(keys[11], dim_h, 2)
    meanQg = (q1, qb1, q2, qb2, q3, qb3)

    ls = float(jnp.log(2.0))  # gpytorch default: lengthscale = softplus(0) = ln(2)
    return {
        "y_slab": pack_y_slab(modelY, dim_x, dim_h),
        "qg_slab": pack_qg_slab(meanQg, din_qg, dim_h),
        "muPg": jnp.zeros((n_sources, 2), jnp.float32),
        "nu_logit": jnp.zeros((2,), jnp.float32),
        "rho_logit": jnp.zeros((1,), jnp.float32),
        "delta_logit": jnp.zeros((2,), jnp.float32),
        "eta_logit": jnp.zeros((1,), jnp.float32),
        "ls_Qg": ls,   # mtkernelQg lengthscale
        "ls_K": ls,    # mtkernel lengthscale
        "ls_Pg": ls,   # mtkernelPg lengthscale
    }


if __name__ == "__main__":
    key = jax.random.PRNGKey(0)
    k_data, k_params, k_fwd = jax.random.split(key, 3)

    # Small shapes consistent with the module:
    N, dim_x, dim_h, n_sources, dim_stats = 16, 4, 32, 4, 4
    kx, ky, kw, ks = jax.random.split(k_data, 4)
    X = jax.random.normal(kx, (N, dim_x), jnp.float32)
    Yobs = jax.random.normal(ky, (N, 1), jnp.float32)
    W = jax.random.bernoulli(kw, 0.5, (N, 1)).astype(jnp.float32)
    stats_feats = jax.random.normal(ks, (n_sources, 12 + dim_stats * dim_x), jnp.float32)

    data = {"Yobs": Yobs, "X": X, "W": W, "stats_feats": stats_feats}
    params = make_params(k_params, dim_x, dim_h, n_sources, dim_stats)
    idx_source = 1  # scalar source index

    fwd = jax.jit(federated_causal_net_forward)
    loss = fwd(params, data, idx_source, k_fwd)
    loss = jax.block_until_ready(loss)
    assert loss.shape == (1, 1) and bool(jnp.isfinite(loss).all())
    print("KERNEL_OK")
</pallas_src>

<mosaic_0001>
module attributes {stable_mosaic.version = 11 : i64} {
  func.func @kernel(%arg0: memref<16xf32, #tpu.memory_space<smem>>, %arg1: memref<4x28xf32, #tpu.memory_space<vmem>>, %arg2: memref<16x8xf32, #tpu.memory_space<vmem>>, %arg3: memref<120x32xf32, #tpu.memory_space<vmem>>, %arg4: memref<16x16xf32, #tpu.memory_space<vmem>>, %arg5: memref<4x10xf32, #tpu.memory_space<vmem>>) attributes {dimension_semantics = [], scalar_prefetch = 0 : i64, scratch_operands = 0 : i64, tpu.core_type = #tpu.core_type<tc>} {
    %c0 = arith.constant 0 : index
    %0 = memref.load %arg0[%c0] : memref<16xf32, #tpu.memory_space<smem>>
    %c1 = arith.constant 1 : index
    %1 = memref.load %arg0[%c1] : memref<16xf32, #tpu.memory_space<smem>>
    %c2 = arith.constant 2 : index
    %2 = memref.load %arg0[%c2] : memref<16xf32, #tpu.memory_space<smem>>
    %c3 = arith.constant 3 : index
    %3 = memref.load %arg0[%c3] : memref<16xf32, #tpu.memory_space<smem>>
    %c4 = arith.constant 4 : index
    %4 = memref.load %arg0[%c4] : memref<16xf32, #tpu.memory_space<smem>>
    %c5 = arith.constant 5 : index
    %5 = memref.load %arg0[%c5] : memref<16xf32, #tpu.memory_space<smem>>
    %c6 = arith.constant 6 : index
    %6 = memref.load %arg0[%c6] : memref<16xf32, #tpu.memory_space<smem>>
    %c7 = arith.constant 7 : index
    %7 = memref.load %arg0[%c7] : memref<16xf32, #tpu.memory_space<smem>>
    %c8 = arith.constant 8 : index
    %8 = memref.load %arg0[%c8] : memref<16xf32, #tpu.memory_space<smem>>
    %c0_0 = arith.constant 0 : index
    %c0_1 = arith.constant 0 : index
    %9 = vector.load %arg1[%c0_0, %c0_1] : memref<4x28xf32, #tpu.memory_space<vmem>>, vector<4x28xf32>
    %10 = vector.extract_strided_slice %9 {offsets = [0, 0], sizes = [4, 8], strides = [1, 1]} : vector<4x28xf32> to vector<4x8xf32>
    %11 = vector.extract_strided_slice %9 {offsets = [0, 12], sizes = [4, 16], strides = [1, 1]} : vector<4x28xf32> to vector<4x16xf32>
    %12 = vector.extract_strided_slice %9 {offsets = [0, 8], sizes = [4, 4], strides = [1, 1]} : vector<4x28xf32> to vector<4x4xf32>
    %cst = arith.constant 0.000000e+00 : f32
    %13 = vector.broadcast %cst : f32 to vector<4x4xf32>
    %14 = tpu.concatenate %10, %11, %12, %13 in 1 : vector<4x8xf32>, vector<4x16xf32>, vector<4x4xf32>, vector<4x4xf32> -> vector<4x32xf32>
    %15 = vector.extract_strided_slice %9 {offsets = [0, 12], sizes = [4, 16], strides = [1, 1]} : vector<4x28xf32> to vector<4x16xf32>
    %c0_2 = arith.constant 0 : index
    %c0_3 = arith.constant 0 : index
    %16 = vector.load %arg3[%c0_2, %c0_3] : memref<120x32xf32, #tpu.memory_space<vmem>>, vector<32x32xf32>
    %cst_4 = arith.constant dense<0.000000e+00> : vector<4x32xf32>
    %17 = tpu.matmul %14, %16, %cst_4 {dimension_numbers = #tpu.dot_dimension_numbers<[1], [0], [0], [1], [0, 0, 1, 1], [], []>} : vector<4x32xf32>, vector<32x32xf32>, vector<4x32xf32> -> vector<4x32xf32>
    %c32 = arith.constant 32 : index
    %c0_5 = arith.constant 0 : index
    %18 = vector.load %arg3[%c32, %c0_5] : memref<120x32xf32, #tpu.memory_space<vmem>>, vector<1x32xf32>
    %19 = vector.broadcast %18 : vector<1x32xf32> to vector<4x32xf32>
    %20 = arith.addf %17, %19 : vector<4x32xf32>
    %cst_6 = arith.constant 0.000000e+00 : f32
    %21 = vector.broadcast %cst_6 : f32 to vector<4x32xf32>
    %22 = arith.maximumf %20, %21 : vector<4x32xf32>
    %c40 = arith.constant 40 : index
    %c0_7 = arith.constant 0 : index
    %23 = vector.load %arg3[%c40, %c0_7] : memref<120x32xf32, #tpu.memory_space<vmem>>, vector<32x32xf32>
    %cst_8 = arith.constant dense<0.000000e+00> : vector<4x32xf32>
    %24 = tpu.matmul %22, %23, %cst_8 {dimension_numbers = #tpu.dot_dimension_numbers<[1], [0], [0], [1], [0, 0, 1, 1], [], []>} : vector<4x32xf32>, vector<32x32xf32>, vector<4x32xf32> -> vector<4x32xf32>
    %c72 = arith.constant 72 : index
    %c0_9 = arith.constant 0 : index
    %25 = vector.load %arg3[%c72, %c0_9] : memref<120x32xf32, #tpu.memory_space<vmem>>, vector<1x32xf32>
    %26 = vector.broadcast %25 : vector<1x32xf32> to vector<4x32xf32>
    %27 = arith.addf %24, %26 : vector<4x32xf32>
    %cst_10 = arith.constant 0.000000e+00 : f32
    %28 = vector.broadcast %cst_10 : f32 to vector<4x32xf32>
    %29 = arith.maximumf %27, %28 : vector<4x32xf32>
    %c80 = arith.constant 80 : index
    %c0_11 = arith.constant 0 : index
    %30 = vector.load %arg3[%c80, %c0_11] : memref<120x32xf32, #tpu.memory_space<vmem>>, vector<32x32xf32>
    %cst_12 = arith.constant dense<0.000000e+00> : vector<4x32xf32>
    %31 = tpu.matmul %29, %30, %cst_12 {dimension_numbers = #tpu.dot_dimension_numbers<[1], [0], [0], [1], [0, 0, 1, 1], [], []>} : vector<4x32xf32>, vector<32x32xf32>, vector<4x32xf32> -> vector<4x32xf32>
    %c112 = arith.constant 112 : index
    %c0_13 = arith.constant 0 : index
    %32 = vector.load %arg3[%c112, %c0_13] : memref<120x32xf32, #tpu.memory_space<vmem>>, vector<1x32xf32>
    %33 = vector.broadcast %32 : vector<1x32xf32> to vector<4x32xf32>
    %34 = arith.addf %31, %33 : vector<4x32xf32>
    %35 = vector.extract_strided_slice %34 {offsets = [0, 0], sizes = [4, 2], strides = [1, 1]} : vector<4x32xf32> to vector<4x2xf32>
    %36 = vector.broadcast %0 : f32 to vector<4x32xf32>
    %37 = arith.mulf %14, %36 : vector<4x32xf32>
    %cst_14 = arith.constant dense<0.000000e+00> : vector<4x4xf32>
    %38 = tpu.matmul %37, %37, %cst_14 {dimension_numbers = #tpu.dot_dimension_numbers<[1], [1], [0], [0], [0, 0, 1, 0], [], []>} : vector<4x32xf32>, vector<4x32xf32>, vector<4x4xf32> -> vector<4x4xf32>
    %39 = arith.mulf %37, %37 : vector<4x32xf32>
    %cst_15 = arith.constant dense<0.000000e+00> : vector<4xf32>
    %40 = vector.multi_reduction <add>, %39, %cst_15 [1] : vector<4x32xf32> to vector<4xf32>
    %41 = vector.shape_cast %40 : vector<4xf32> to vector<4x1xf32>
    %cst_16 = arith.constant 1.000000e+00 : f32
    %42 = vector.broadcast %cst_16 : f32 to vector<8x32xf32>
    %cst_17 = arith.constant dense<0.000000e+00> : vector<8x4xf32>
    %43 = tpu.matmul %42, %39, %cst_17 {dimension_numbers = #tpu.dot_dimension_numbers<[1], [1], [0], [0], [0, 0, 1, 0], [], []>} : vector<8x32xf32>, vector<4x32xf32>, vector<8x4xf32> -> vector<8x4xf32>
    %44 = vector.extract_strided_slice %43 {offsets = [0, 0], sizes = [1, 4], strides = [1, 1]} : vector<8x4xf32> to vector<1x4xf32>
    %45 = vector.broadcast %41 : vector<4x1xf32> to vector<4x4xf32>
    %46 = vector.broadcast %44 : vector<1x4xf32> to vector<4x4xf32>
    %47 = arith.addf %45, %46 : vector<4x4xf32>
    %cst_18 = arith.constant 2.000000e+00 : f32
    %48 = vector.broadcast %cst_18 : f32 to vector<4x4xf32>
    %49 = arith.mulf %48, %38 : vector<4x4xf32>
    %50 = arith.subf %47, %49 : vector<4x4xf32>
    %cst_19 = arith.constant 0.000000e+00 : f32
    %51 = vector.broadcast %cst_19 : f32 to vector<4x4xf32>
    %52 = arith.maximumf %50, %51 : vector<4x4xf32>
    %cst_20 = arith.constant 0.000000e+00 : f32
    %53 = vector.broadcast %cst_20 : f32 to vector<4x4xf32>
    %54 = arith.cmpf ogt, %52, %53 : vector<4x4xf32>
    %cst_21 = arith.constant 1.000000e+00 : f32
    %55 = vector.broadcast %cst_21 : f32 to vector<4x4xf32>
    %56 = arith.select %54, %52, %55 : vector<4x4xi1>, vector<4x4xf32>
    %cst_22 = arith.constant 0.000000e+00 : f32
    %57 = vector.broadcast %cst_22 : f32 to vector<4x4xf32>
    %58 = arith.cmpf ogt, %52, %57 : vector<4x4xf32>
    %59 = math.sqrt %56 : vector<4x4xf32>
    %cst_23 = arith.constant 0.000000e+00 : f32
    %60 = vector.broadcast %cst_23 : f32 to vector<4x4xf32>
    %61 = arith.select %58, %59, %60 : vector<4x4xi1>, vector<4x4xf32>
    %cst_24 = arith.constant 2.23606801 : f32
    %62 = vector.broadcast %cst_24 : f32 to vector<4x4xf32>
    %63 = arith.mulf %62, %61 : vector<4x4xf32>
    %cst_25 = arith.constant 1.000000e+00 : f32
    %64 = vector.broadcast %cst_25 : f32 to vector<4x4xf32>
    %65 = arith.addf %64, %63 : vector<4x4xf32>
    %cst_26 = arith.constant 1.66666663 : f32
    %66 = vector.broadcast %cst_26 : f32 to vector<4x4xf32>
    %67 = arith.mulf %66, %52 : vector<4x4xf32>
    %68 = arith.addf %65, %67 : vector<4x4xf32>
    %cst_27 = arith.constant -2.23606801 : f32
    %69 = vector.broadcast %cst_27 : f32 to vector<4x4xf32>
    %70 = arith.mulf %69, %61 : vector<4x4xf32>
    %71 = math.exp %70 : vector<4x4xf32>
    %72 = arith.mulf %68, %71 : vector<4x4xf32>
    %73 = vector.broadcast %2 : f32 to vector<4x16xf32>
    %74 = arith.mulf %15, %73 : vector<4x16xf32>
    %cst_28 = arith.constant dense<0.000000e+00> : vector<4x4xf32>
    %75 = tpu.matmul %74, %74, %cst_28 {dimension_numbers = #tpu.dot_dimension_numbers<[1], [1], [0], [0], [0, 0, 1, 0], [], []>} : vector<4x16xf32>, vector<4x16xf32>, vector<4x4xf32> -> vector<4x4xf32>
    %76 = arith.mulf %74, %74 : vector<4x16xf32>
    %cst_29 = arith.constant dense<0.000000e+00> : vector<4xf32>
    %77 = vector.multi_reduction <add>, %76, %cst_29 [1] : vector<4x16xf32> to vector<4xf32>
    %78 = vector.shape_cast %77 : vector<4xf32> to vector<4x1xf32>
    %cst_30 = arith.constant 1.000000e+00 : f32
    %79 = vector.broadcast %cst_30 : f32 to vector<8x16xf32>
    %cst_31 = arith.constant dense<0.000000e+00> : vector<8x4xf32>
    %80 = tpu.matmul %79, %76, %cst_31 {dimension_numbers = #tpu.dot_dimension_numbers<[1], [1], [0], [0], [0, 0, 1, 0], [], []>} : vector<8x16xf32>, vector<4x16xf32>, vector<8x4xf32> -> vector<8x4xf32>
    %81 = vector.extract_strided_slice %80 {offsets = [0, 0], sizes = [1, 4], strides = [1, 1]} : vector<8x4xf32> to vector<1x4xf32>
    %82 = vector.broadcast %78 : vector<4x1xf32> to vector<4x4xf32>
    %83 = vector.broadcast %81 : vector<1x4xf32> to vector<4x4xf32>
    %84 = arith.addf %82, %83 : vector<4x4xf32>
    %cst_32 = arith.constant 2.000000e+00 : f32
    %85 = vector.broadcast %cst_32 : f32 to vector<4x4xf32>
    %86 = arith.mulf %85, %75 : vector<4x4xf32>
    %87 = arith.subf %84, %86 : vector<4x4xf32>
    %cst_33 = arith.constant 0.000000e+00 : f32
    %88 = vector.broadcast %cst_33 : f32 to vector<4x4xf32>
    %89 = arith.maximumf %87, %88 : vector<4x4xf32>
    %cst_34 = arith.constant 0.000000e+00 : f32
    %90 = vector.broadcast %cst_34 : f32 to vector<4x4xf32>
    %91 = arith.cmpf ogt, %89, %90 : vector<4x4xf32>
    %cst_35 = arith.constant 1.000000e+00 : f32
    %92 = vector.broadcast %cst_35 : f32 to vector<4x4xf32>
    %93 = arith.select %91, %89, %92 : vector<4x4xi1>, vector<4x4xf32>
    %cst_36 = arith.constant 0.000000e+00 : f32
    %94 = vector.broadcast %cst_36 : f32 to vector<4x4xf32>
    %95 = arith.cmpf ogt, %89, %94 : vector<4x4xf32>
    %96 = math.sqrt %93 : vector<4x4xf32>
    %cst_37 = arith.constant 0.000000e+00 : f32
    %97 = vector.broadcast %cst_37 : f32 to vector<4x4xf32>
    %98 = arith.select %95, %96, %97 : vector<4x4xi1>, vector<4x4xf32>
    %cst_38 = arith.constant 2.23606801 : f32
    %99 = vector.broadcast %cst_38 : f32 to vector<4x4xf32>
    %100 = arith.mulf %99, %98 : vector<4x4xf32>
    %cst_39 = arith.constant 1.000000e+00 : f32
    %101 = vector.broadcast %cst_39 : f32 to vector<4x4xf32>
    %102 = arith.addf %101, %100 : vector<4x4xf32>
    %cst_40 = arith.constant 1.66666663 : f32
    %103 = vector.broadcast %cst_40 : f32 to vector<4x4xf32>
    %104 = arith.mulf %103, %89 : vector<4x4xf32>
    %105 = arith.addf %102, %104 : vector<4x4xf32>
    %cst_41 = arith.constant -2.23606801 : f32
    %106 = vector.broadcast %cst_41 : f32 to vector<4x4xf32>
    %107 = arith.mulf %106, %98 : vector<4x4xf32>
    %108 = math.exp %107 : vector<4x4xf32>
    %109 = arith.mulf %105, %108 : vector<4x4xf32>
    %c0_42 = arith.constant 0 : index
    %c0_43 = arith.constant 0 : index
    %110 = vector.load %arg2[%c0_42, %c0_43] : memref<16x8xf32, #tpu.memory_space<vmem>>, vector<16x8xf32>
    %111 = vector.extract_strided_slice %110 {offsets = [0, 0], sizes = [16, 4], strides = [1, 1]} : vector<16x8xf32> to vector<16x4xf32>
    %112 = vector.extract_strided_slice %110 {offsets = [0, 4], sizes = [16, 1], strides = [1, 1]} : vector<16x8xf32> to vector<16x1xf32>
    %113 = vector.broadcast %1 : f32 to vector<16x4xf32>
    %114 = arith.mulf %111, %113 : vector<16x4xf32>
    %cst_44 = arith.constant dense<0.000000e+00> : vector<16x16xf32>
    %115 = tpu.matmul %114, %114, %cst_44 {dimension_numbers = #tpu.dot_dimension_numbers<[1], [1], [0], [0], [0, 0, 1, 0], [], []>} : vector<16x4xf32>, vector<16x4xf32>, vector<16x16xf32> -> vector<16x16xf32>
    %116 = arith.mulf %114, %114 : vector<16x4xf32>
    %cst_45 = arith.constant dense<0.000000e+00> : vector<16xf32>
    %117 = vector.multi_reduction <add>, %116, %cst_45 [1] : vector<16x4xf32> to vector<16xf32>
    %118 = vector.shape_cast %117 : vector<16xf32> to vector<16x1xf32>
    %cst_46 = arith.constant 1.000000e+00 : f32
    %119 = vector.broadcast %cst_46 : f32 to vector<8x4xf32>
    %cst_47 = arith.constant dense<0.000000e+00> : vector<8x16xf32>
    %120 = tpu.matmul %119, %116, %cst_47 {dimension_numbers = #tpu.dot_dimension_numbers<[1], [1], [0], [0], [0, 0, 1, 0], [], []>} : vector<8x4xf32>, vector<16x4xf32>, vector<8x16xf32> -> vector<8x16xf32>
    %121 = vector.extract_strided_slice %120 {offsets = [0, 0], sizes = [1, 16], strides = [1, 1]} : vector<8x16xf32> to vector<1x16xf32>
    %122 = vector.broadcast %118 : vector<16x1xf32> to vector<16x16xf32>
    %123 = vector.broadcast %121 : vector<1x16xf32> to vector<16x16xf32>
    %124 = arith.addf %122, %123 : vector<16x16xf32>
    %cst_48 = arith.constant 2.000000e+00 : f32
    %125 = vector.broadcast %cst_48 : f32 to vector<16x16xf32>
    %126 = arith.mulf %125, %115 : vector<16x16xf32>
    %127 = arith.subf %124, %126 : vector<16x16xf32>
    %cst_49 = arith.constant 0.000000e+00 : f32
    %128 = vector.broadcast %cst_49 : f32 to vector<16x16xf32>
    %129 = arith.maximumf %127, %128 : vector<16x16xf32>
    %cst_50 = arith.constant 0.000000e+00 : f32
    %130 = vector.broadcast %cst_50 : f32 to vector<16x16xf32>
    %131 = arith.cmpf ogt, %129, %130 : vector<16x16xf32>
    %cst_51 = arith.constant 1.000000e+00 : f32
    %132 = vector.broadcast %cst_51 : f32 to vector<16x16xf32>
    %133 = arith.select %131, %129, %132 : vector<16x16xi1>, vector<16x16xf32>
    %cst_52 = arith.constant 0.000000e+00 : f32
    %134 = vector.broadcast %cst_52 : f32 to vector<16x16xf32>
    %135 = arith.cmpf ogt, %129, %134 : vector<16x16xf32>
    %136 = math.sqrt %133 : vector<16x16xf32>
    %cst_53 = arith.constant 0.000000e+00 : f32
    %137 = vector.broadcast %cst_53 : f32 to vector<16x16xf32>
    %138 = arith.select %135, %136, %137 : vector<16x16xi1>, vector<16x16xf32>
    %cst_54 = arith.constant 2.23606801 : f32
    %139 = vector.broadcast %cst_54 : f32 to vector<16x16xf32>
    %140 = arith.mulf %139, %138 : vector<16x16xf32>
    %cst_55 = arith.constant 1.000000e+00 : f32
    %141 = vector.broadcast %cst_55 : f32 to vector<16x16xf32>
    %142 = arith.addf %141, %140 : vector<16x16xf32>
    %cst_56 = arith.constant 1.66666663 : f32
    %143 = vector.broadcast %cst_56 : f32 to vector<16x16xf32>
    %144 = arith.mulf %143, %129 : vector<16x16xf32>
    %145 = arith.addf %142, %144 : vector<16x16xf32>
    %cst_57 = arith.constant -2.23606801 : f32
    %146 = vector.broadcast %cst_57 : f32 to vector<16x16xf32>
    %147 = arith.mulf %146, %138 : vector<16x16xf32>
    %148 = math.exp %147 : vector<16x16xf32>
    %149 = arith.mulf %145, %148 : vector<16x16xf32>
    %cst_58 = arith.constant 1.000000e+00 : f32
    %150 = vector.broadcast %cst_58 : f32 to vector<8x1xf32>
    %cst_59 = arith.constant dense<0.000000e+00> : vector<8x16xf32>
    %151 = tpu.matmul %150, %112, %cst_59 {dimension_numbers = #tpu.dot_dimension_numbers<[1], [1], [0], [0], [0, 0, 1, 0], [], []>} : vector<8x1xf32>, vector<16x1xf32>, vector<8x16xf32> -> vector<8x16xf32>
    %152 = vector.extract_strided_slice %151 {offsets = [0, 0], sizes = [1, 16], strides = [1, 1]} : vector<8x16xf32> to vector<1x16xf32>
    %153 = arith.subf %5, %3 : f32
    %154 = vector.broadcast %153 : f32 to vector<16x1xf32>
    %155 = arith.mulf %112, %154 : vector<16x1xf32>
    %156 = vector.broadcast %3 : f32 to vector<16x1xf32>
    %157 = arith.addf %156, %155 : vector<16x1xf32>
    %158 = arith.subf %4, %3 : f32
    %159 = vector.broadcast %158 : f32 to vector<1x16xf32>
    %160 = arith.mulf %152, %159 : vector<1x16xf32>
    %161 = vector.broadcast %157 : vector<16x1xf32> to vector<16x16xf32>
    %162 = vector.broadcast %160 : vector<1x16xf32> to vector<16x16xf32>
    %163 = arith.addf %161, %162 : vector<16x16xf32>
    %164 = vector.broadcast %112 : vector<16x1xf32> to vector<16x16xf32>
    %165 = vector.broadcast %152 : vector<1x16xf32> to vector<16x16xf32>
    %166 = arith.mulf %164, %165 : vector<16x16xf32>
    %167 = arith.addf %3, %6 : f32
    %168 = arith.subf %167, %4 : f32
    %169 = arith.subf %168, %5 : f32
    %170 = vector.broadcast %169 : f32 to vector<16x16xf32>
    %171 = arith.mulf %166, %170 : vector<16x16xf32>
    %172 = arith.addf %163, %171 : vector<16x16xf32>
    %cst_60 = arith.constant 1.000000e+00 : f32
    %173 = vector.broadcast %cst_60 : f32 to vector<16x1xf32>
    %174 = arith.subf %173, %112 : vector<16x1xf32>
    %cst_61 = arith.constant 1.000000e+00 : f32
    %175 = vector.broadcast %cst_61 : f32 to vector<16x1xf32>
    %176 = arith.subf %175, %112 : vector<16x1xf32>
    %177 = arith.mulf %174, %176 : vector<16x1xf32>
    %178 = vector.broadcast %7 : f32 to vector<16x1xf32>
    %179 = arith.mulf %177, %178 : vector<16x1xf32>
    %180 = arith.mulf %112, %112 : vector<16x1xf32>
    %181 = vector.broadcast %8 : f32 to vector<16x1xf32>
    %182 = arith.mulf %180, %181 : vector<16x1xf32>
    %183 = arith.addf %179, %182 : vector<16x1xf32>
    %184 = tpu.iota {dimensions = array<i32: 0>} : vector<16x16xi32>
    %185 = tpu.iota {dimensions = array<i32: 1>} : vector<16x16xi32>
    %186 = arith.mulf %172, %149 : vector<16x16xf32>
    %187 = arith.cmpi eq, %184, %185 : vector<16x16xi32>
    %188 = vector.broadcast %183 : vector<16x1xf32> to vector<16x16xf32>
    %189 = arith.addf %186, %188 : vector<16x16xf32>
    %190 = arith.select %187, %189, %186 : vector<16x16xi1>, vector<16x16xf32>
    %c0_62 = arith.constant 0 : index
    %c0_63 = arith.constant 0 : index
    %191 = vector.load %arg4[%c0_62, %c0_63] : memref<16x16xf32, #tpu.memory_space<vmem>>, vector<16x16xf32>
    tpu.vector_store %arg4[%c0_62, %c0_63], %190 {strides = array<i32>} : memref<16x16xf32, #tpu.memory_space<vmem>>, vector<16x16xf32>,
    %192 = tpu.concatenate %72, %109, %35 in 1 : vector<4x4xf32>, vector<4x4xf32>, vector<4x2xf32> -> vector<4x10xf32>
    %c0_64 = arith.constant 0 : index
    %c0_65 = arith.constant 0 : index
    %193 = vector.load %arg5[%c0_64, %c0_65] : memref<4x10xf32, #tpu.memory_space<vmem>>, vector<4x10xf32>
    tpu.vector_store %arg5[%c0_64, %c0_65], %192 {strides = array<i32>} : memref<4x10xf32, #tpu.memory_space<vmem>>, vector<4x10xf32>,
    return
  }
}

module attributes {stable_mosaic.version = 11 : i64} {
  func.func @kernel(%arg0: memref<8xf32, #tpu.memory_space<smem>>, %arg1: memref<16x8xf32, #tpu.memory_space<vmem>>, %arg2: memref<376x64xf32, #tpu.memory_space<vmem>>, %arg3: memref<16x2xf32, #tpu.memory_space<vmem>>) attributes {dimension_semantics = [], scalar_prefetch = 0 : i64, scratch_operands = 0 : i64, tpu.core_type = #tpu.core_type<tc>} {
    %c0 = arith.constant 0 : index
    %0 = memref.load %arg0[%c0] : memref<8xf32, #tpu.memory_space<smem>>
    %c1 = arith.constant 1 : index
    %1 = memref.load %arg0[%c1] : memref<8xf32, #tpu.memory_space<smem>>
    %c2 = arith.constant 2 : index
    %2 = memref.load %arg0[%c2] : memref<8xf32, #tpu.memory_space<smem>>
    %c3 = arith.constant 3 : index
    %3 = memref.load %arg0[%c3] : memref<8xf32, #tpu.memory_space<smem>>
    %c4 = arith.constant 4 : index
    %4 = memref.load %arg0[%c4] : memref<8xf32, #tpu.memory_space<smem>>
    %c0_0 = arith.constant 0 : index
    %c0_1 = arith.constant 0 : index
    %5 = vector.load %arg1[%c0_0, %c0_1] : memref<16x8xf32, #tpu.memory_space<vmem>>, vector<16x8xf32>
    %6 = vector.extract_strided_slice %5 {offsets = [0, 4], sizes = [16, 1], strides = [1, 1]} : vector<16x8xf32> to vector<16x1xf32>
    %7 = vector.extract_strided_slice %5 {offsets = [0, 5], sizes = [16, 1], strides = [1, 1]} : vector<16x8xf32> to vector<16x1xf32>
    %c0_2 = arith.constant 0 : index
    %c0_3 = arith.constant 0 : index
    %8 = vector.load %arg2[%c0_2, %c0_3] : memref<376x64xf32, #tpu.memory_space<vmem>>, vector<8x64xf32>
    %cst = arith.constant dense<0.000000e+00> : vector<16x64xf32>
    %9 = tpu.matmul %5, %8, %cst {dimension_numbers = #tpu.dot_dimension_numbers<[1], [0], [0], [1], [0, 0, 1, 1], [], []>} : vector<16x8xf32>, vector<8x64xf32>, vector<16x64xf32> -> vector<16x64xf32>
    %c8 = arith.constant 8 : index
    %c0_4 = arith.constant 0 : index
    %10 = vector.load %arg2[%c8, %c0_4] : memref<376x64xf32, #tpu.memory_space<vmem>>, vector<1x64xf32>
    %11 = vector.broadcast %10 : vector<1x64xf32> to vector<16x64xf32>
    %12 = arith.addf %9, %11 : vector<16x64xf32>
    %cst_5 = arith.constant 0.000000e+00 : f32
    %13 = vector.broadcast %cst_5 : f32 to vector<16x64xf32>
    %14 = arith.maximumf %12, %13 : vector<16x64xf32>
    %c16 = arith.constant 16 : index
    %c0_6 = arith.constant 0 : index
    %15 = vector.load %arg2[%c16, %c0_6] : memref<376x64xf32, #tpu.memory_space<vmem>>, vector<64x64xf32>
    %cst_7 = arith.constant dense<0.000000e+00> : vector<16x64xf32>
    %16 = tpu.matmul %14, %15, %cst_7 {dimension_numbers = #tpu.dot_dimension_numbers<[1], [0], [0], [1], [0, 0, 1, 1], [], []>} : vector<16x64xf32>, vector<64x64xf32>, vector<16x64xf32> -> vector<16x64xf32>
    %c80 = arith.constant 80 : index
    %c0_8 = arith.constant 0 : index
    %17 = vector.load %arg2[%c80, %c0_8] : memref<376x64xf32, #tpu.memory_space<vmem>>, vector<1x64xf32>
    %18 = vector.broadcast %17 : vector<1x64xf32> to vector<16x64xf32>
    %19 = arith.addf %16, %18 : vector<16x64xf32>
    %cst_9 = arith.constant 0.000000e+00 : f32
    %20 = vector.broadcast %cst_9 : f32 to vector<16x64xf32>
    %21 = arith.maximumf %19, %20 : vector<16x64xf32>
    %c88 = arith.constant 88 : index
    %c0_10 = arith.constant 0 : index
    %22 = vector.load %arg2[%c88, %c0_10] : memref<376x64xf32, #tpu.memory_space<vmem>>, vector<64x64xf32>
    %cst_11 = arith.constant dense<0.000000e+00> : vector<16x64xf32>
    %23 = tpu.matmul %21, %22, %cst_11 {dimension_numbers = #tpu.dot_dimension_numbers<[1], [0], [0], [1], [0, 0, 1, 1], [], []>} : vector<16x64xf32>, vector<64x64xf32>, vector<16x64xf32> -> vector<16x64xf32>
    %c152 = arith.constant 152 : index
    %c0_12 = arith.constant 0 : index
    %24 = vector.load %arg2[%c152, %c0_12] : memref<376x64xf32, #tpu.memory_space<vmem>>, vector<1x64xf32>
    %25 = vector.broadcast %24 : vector<1x64xf32> to vector<16x64xf32>
    %26 = arith.addf %23, %25 : vector<16x64xf32>
    %cst_13 = arith.constant 0.000000e+00 : f32
    %27 = vector.broadcast %cst_13 : f32 to vector<16x64xf32>
    %28 = arith.maximumf %26, %27 : vector<16x64xf32>
    %c160 = arith.constant 160 : index
    %c0_14 = arith.constant 0 : index
    %29 = vector.load %arg2[%c160, %c0_14] : memref<376x64xf32, #tpu.memory_space<vmem>>, vector<64x64xf32>
    %cst_15 = arith.constant dense<0.000000e+00> : vector<16x64xf32>
    %30 = tpu.matmul %28, %29, %cst_15 {dimension_numbers = #tpu.dot_dimension_numbers<[1], [0], [0], [1], [0, 0, 1, 1], [], []>} : vector<16x64xf32>, vector<64x64xf32>, vector<16x64xf32> -> vector<16x64xf32>
    %c224 = arith.constant 224 : index
    %c0_16 = arith.constant 0 : index
    %31 = vector.load %arg2[%c224, %c0_16] : memref<376x64xf32, #tpu.memory_space<vmem>>, vector<1x64xf32>
    %32 = vector.broadcast %31 : vector<1x64xf32> to vector<16x64xf32>
    %33 = arith.addf %30, %32 : vector<16x64xf32>
    %cst_17 = arith.constant 0.000000e+00 : f32
    %34 = vector.broadcast %cst_17 : f32 to vector<16x64xf32>
    %35 = arith.maximumf %33, %34 : vector<16x64xf32>
    %c232 = arith.constant 232 : index
    %c0_18 = arith.constant 0 : index
    %36 = vector.load %arg2[%c232, %c0_18] : memref<376x64xf32, #tpu.memory_space<vmem>>, vector<64x64xf32>
    %cst_19 = arith.constant dense<0.000000e+00> : vector<16x64xf32>
    %37 = tpu.matmul %35, %36, %cst_19 {dimension_numbers = #tpu.dot_dimension_numbers<[1], [0], [0], [1], [0, 0, 1, 1], [], []>} : vector<16x64xf32>, vector<64x64xf32>, vector<16x64xf32> -> vector<16x64xf32>
    %c296 = arith.constant 296 : index
    %c0_20 = arith.constant 0 : index
    %38 = vector.load %arg2[%c296, %c0_20] : memref<376x64xf32, #tpu.memory_space<vmem>>, vector<1x64xf32>
    %39 = vector.broadcast %38 : vector<1x64xf32> to vector<16x64xf32>
    %40 = arith.addf %37, %39 : vector<16x64xf32>
    %cst_21 = arith.constant 0.000000e+00 : f32
    %41 = vector.broadcast %cst_21 : f32 to vector<16x64xf32>
    %42 = arith.maximumf %40, %41 : vector<16x64xf32>
    %c304 = arith.constant 304 : index
    %c0_22 = arith.constant 0 : index
    %43 = vector.load %arg2[%c304, %c0_22] : memref<376x64xf32, #tpu.memory_space<vmem>>, vector<64x64xf32>
    %cst_23 = arith.constant dense<0.000000e+00> : vector<16x64xf32>
    %44 = tpu.matmul %42, %43, %cst_23 {dimension_numbers = #tpu.dot_dimension_numbers<[1], [0], [0], [1], [0, 0, 1, 1], [], []>} : vector<16x64xf32>, vector<64x64xf32>, vector<16x64xf32> -> vector<16x64xf32>
    %c368 = arith.constant 368 : index
    %c0_24 = arith.constant 0 : index
    %45 = vector.load %arg2[%c368, %c0_24] : memref<376x64xf32, #tpu.memory_space<vmem>>, vector<1x64xf32>
    %46 = vector.broadcast %45 : vector<1x64xf32> to vector<16x64xf32>
    %47 = arith.addf %44, %46 : vector<16x64xf32>
    %48 = vector.extract_strided_slice %47 {offsets = [0, 0], sizes = [16, 1], strides = [1, 1]} : vector<16x64xf32> to vector<16x1xf32>
    %49 = vector.broadcast %3 : f32 to vector<16x1xf32>
    %50 = arith.addf %48, %49 : vector<16x1xf32>
    %51 = vector.extract_strided_slice %47 {offsets = [0, 1], sizes = [16, 1], strides = [1, 1]} : vector<16x64xf32> to vector<16x1xf32>
    %52 = vector.broadcast %4 : f32 to vector<16x1xf32>
    %53 = arith.addf %51, %52 : vector<16x1xf32>
    %54 = vector.broadcast %0 : f32 to vector<16x1xf32>
    %55 = arith.mulf %54, %50 : vector<16x1xf32>
    %56 = vector.broadcast %1 : f32 to vector<16x1xf32>
    %57 = arith.mulf %56, %50 : vector<16x1xf32>
    %58 = vector.broadcast %2 : f32 to vector<16x1xf32>
    %59 = arith.mulf %58, %53 : vector<16x1xf32>
    %60 = arith.addf %57, %59 : vector<16x1xf32>
    %61 = arith.subf %60, %55 : vector<16x1xf32>
    %62 = arith.mulf %6, %61 : vector<16x1xf32>
    %63 = arith.addf %55, %62 : vector<16x1xf32>
    %64 = arith.subf %60, %62 : vector<16x1xf32>
    %65 = arith.subf %7, %63 : vector<16x1xf32>
    %66 = tpu.concatenate %65, %64 in 1 : vector<16x1xf32>, vector<16x1xf32> -> vector<16x2xf32>
    %c0_25 = arith.constant 0 : index
    %c0_26 = arith.constant 0 : index
    %67 = vector.load %arg3[%c0_25, %c0_26] : memref<16x2xf32, #tpu.memory_space<vmem>>, vector<16x2xf32>
    tpu.vector_store %arg3[%c0_25, %c0_26], %66 {strides = array<i32>} : memref<16x2xf32, #tpu.memory_space<vmem>>, vector<16x2xf32>,
    return
  }
}

</mosaic_0001>

<bundles_post_ra>
// kernel: custom-call.13
= control target key start
LH: loop header
LB: loop body
LE: loop exit
PB: predicated region body
PF: predicated region fallthrough
CT: control target
= control target key end

     0   :  { %5 = vsyncpa [#allocation2], 0  ;;  %s550_s0 = inlined_call_operand.hbm [shape: f32[2,2], index: 0, kind: input, shape index: {}]   ;;  %s551_s1 = inlined_call_operand.vmem [shape: f32[2,2], index: 1, kind: output, shape index: {0}]   ;;  %s552_s2 = inlined_call_operand.hbm [shape: s32[2], index: 2, kind: output, shape index: {1}]   ;;  %s553_s3 = inlined_call_operand.vmem [shape: s32[2], index: 3, kind: output, shape index: {2}]  }
   0x1   :  { %6 = vsyncpa [#allocation3], 0  ;;  %s479_s12 = smov [#allocation1]  }
   0x2   :  { %s10_s13 = sshll.u32 %s479_s12, 4  ;;  %s11_s13 = int_to_ptr.vmem [resolvable:$true] %s10_s13 }
   0x3   :  { %s435_s14 = scalar_lea.vmem %s11_s13, 32  ;;  %p440_p1 = scmp.lt.s32.totalorder %s11_s13, %s11_s13 }
   0x4   :  { %p436_p0 = scmp.ne.s32.totalorder %s11_s13, %s435_s14  ;;  %p441_p2 = scmp.lt.s32.totalorder %s435_s14, %s435_s14 }
   0x6   :  { %p442_p3 = por %p441_p2, %p440_p1 }
   0x8   :  { %p443_p4 = pnand %p442_p3, %p436_p0 }
   0xa   :  { %446 = shalt.err (!%p443_p4)
}
   0xb   :  { %13 = dma.hbm_to_vmem [thread:$0]  %s550_s0, 32, %s11_s13, [#allocation2]  }
   0xc   :  { %471 = dma.done.wait [#allocation2], 32  }
   0xd   :  { %472 = vsyncadd [#allocation2], 4294967264  ;;  %v23_v0 = vlaneseq  ;;  %v480_v1 = vmov 0   ;;  %v18_v3 = vld [vmem:[#allocation1] sm:$0x3]  ;;  %s509_s17 = smov 0  }
   0xe   :  { %22 = vst [vmem:[#allocation6] sm:$0x1] %v480_v1  ;;  %19 = vst [vmem:[#allocation0] sm:$0x3] %v18_v3 }
   0xf   :  { %v506_v2 = vshrl.u32 %v23_v0, 7 }
  0x11   :  { %27 = vst [vmem:[#allocation10] sm:$0xff] %v506_v2 }
  0x15   :  { %v20_v4 = vld [vmem:[#allocation0] sm:$0xff] }
  0x16   :  { %21 = vst [vmem:[#allocation4] sm:$0xff] %v20_v4 }
  0x17 LB: > { %vm43_vm0 = vcmp.lt.s32.totalorder %v506_v2, 2  ;;  %v516_v7 = vstv %s477_s17  ;;  %s84_s0 = ssub.s32 128, %s477_s17  ;;  %v90_v37 = vand.u32 127, %v23_v0  ;;  %v93_v39 = vld [vmem:[#allocation6] ss:$0 sm:$0xff]  ;;  %s96_s18 = scalar_lea.vmem [#allocation4], %s477_s17  ;;  %s477_s17 = sphi %s509_s17, %s33_s17  }
  0x18   : > { %vm42_vm1 = vcmp.ge.s32.totalorder %v506_v2, %v516_v7  ;;  %s102_s20 = scalar_lea.vmem [#allocation10], %s477_s17  ;;  %vm122_vm15 = vcmp.gt.s32.totalorder %v506_v2, %v516_v7  ;;  %s33_s17 = sadd.s32 1, %s477_s17  }
  0x19   : > { %vm44_vm3 = vmand %vm42_vm1, %vm43_vm0  ;;  %vm114_vm12 = vcmp.gt.s32.totalorder %v90_v37, %v516_v7  ;;  %vm91_vm13 = vcmp.eq.s32.totalorder %v90_v37, %v516_v7  ;;  %v104_v41 = vld [vmem:[%s102_s20] ss:$0 sm:$0xff]  ;;  %p30_p5 = scmp.ge.s32.totalorder %s33_s17, 2  }
  0x1a   : > { %vm126_vm1 = vmand %vm122_vm15, %vm91_vm13  ;;  %s481_s23 = smov (%p30_p5), [#allocation7]  }
  0x1b   :  { %s274_s24 = sshll.u32 (%p30_p5), %s481_s23, 4  ;;  %s275_s24 = int_to_ptr.vmem [resolvable:$true] %s274_s24 }
  0x1c   :  { %s447_s27 = scalar_lea.vmem (%p30_p5), %s275_s24, 16  ;;  %s451_s28 = scalar_lea.vmem (%p30_p5), %s275_s24, 32 }
  0x1d   : > { %v38_v5 = vld [vmem:[#allocation4] sm:$0xff]  ;;  %v98_v40 = vld [vmem:[%s96_s18] ss:$0 sm:$0xff]  ;;  %p448_p6 = scmp.ne.s32.totalorder (%p30_p5), %s275_s24, %s447_s27  ;;  %p452_p7 = scmp.lt.s32.totalorder (%p30_p5), %s275_s24, %s275_s24 }
  0x1e   : > { %v39_v6 = vand.u32 2147483647, %v38_v5  ;;  %p453_p8 = scmp.lt.s32.totalorder (%p30_p5), %s451_s28, %s447_s27 }
  0x20   : > { %vm405_vm2 = vcmp.gt.f32.partialorder %v39_v6, -inf  ;;  %p454_p9 = por (%p30_p5), %p453_p8, %p452_p7 }
  0x21   : > { %vm46_vm4 = vmand %vm44_vm3, %vm405_vm2 }
  0x22   : > { %v47_v8 = vsel %vm46_vm4, %v506_v2, %v516_v7  ;;  %v48_v9 = vsel %vm46_vm4, %v39_v6, -inf  ;;  %p455_p10 = pnand (%p30_p5), %p454_p9, %p448_p6 }
  0x23   : > { %v49_v10 = vrot.slane %v48_v9, 1  ;;  %v50_v11 = vrot.slane %v47_v8, 1 }
  0x25   : > { %vm51_vm5 = vcmp.ge.f32.partialorder %v49_v10, %v48_v9  ;;  %v54_v12 = vrot.slane %v49_v10, 1  ;;  %v55_v13 = vrot.slane %v50_v11, 1 }
  0x26   : > { %v52_v14 = vsel %vm51_vm5, %v49_v10, %v48_v9  ;;  %v53_v15 = vsel %vm51_vm5, %v50_v11, %v47_v8 }
  0x27   : > { %vm56_vm6 = vcmp.ge.f32.partialorder %v54_v12, %v52_v14  ;;  %v59_v16 = vrot.slane %v54_v12, 1  ;;  %v60_v17 = vrot.slane %v55_v13, 1 }
  0x28   : > { %v57_v18 = vsel %vm56_vm6, %v54_v12, %v52_v14  ;;  %v58_v19 = vsel %vm56_vm6, %v55_v13, %v53_v15 }
  0x29   : > { %vm61_vm7 = vcmp.ge.f32.partialorder %v59_v16, %v57_v18  ;;  %v64_v20 = vrot.slane %v59_v16, 1  ;;  %v65_v21 = vrot.slane %v60_v17, 1 }
  0x2a   : > { %v62_v22 = vsel %vm61_vm7, %v59_v16, %v57_v18  ;;  %v63_v23 = vsel %vm61_vm7, %v60_v17, %v58_v19 }
  0x2b   : > { %vm66_vm8 = vcmp.ge.f32.partialorder %v64_v20, %v62_v22  ;;  %v69_v24 = vrot.slane %v64_v20, 1  ;;  %v70_v25 = vrot.slane %v65_v21, 1 }
  0x2c   : > { %v67_v26 = vsel %vm66_vm8, %v64_v20, %v62_v22  ;;  %v68_v27 = vsel %vm66_vm8, %v65_v21, %v63_v23 }
  0x2d   : > { %vm71_vm9 = vcmp.ge.f32.partialorder %v69_v24, %v67_v26  ;;  %v74_v28 = vrot.slane %v69_v24, 1  ;;  %v75_v29 = vrot.slane %v70_v25, 1 }
  0x2e   : > { %v72_v30 = vsel %vm71_vm9, %v69_v24, %v67_v26  ;;  %v73_v31 = vsel %vm71_vm9, %v70_v25, %v68_v27 }
  0x2f   : > { %vm76_vm10 = vcmp.ge.f32.partialorder %v74_v28, %v72_v30  ;;  %v79_v32 = vrot.slane %v74_v28, 1  ;;  %v80_v33 = vrot.slane %v75_v29, 1 }
  0x30   : > { %v77_v34 = vsel %vm76_vm10, %v74_v28, %v72_v30  ;;  %v78_v35 = vsel %vm76_vm10, %v75_v29, %v73_v31 }
  0x31   : > { %vm81_vm11 = vcmp.ge.f32.partialorder %v79_v32, %v77_v34 }
  0x32   : > { %v83_v36 = vsel %vm81_vm11, %v80_v33, %v78_v35 }
  0x33   : > { %85 = vrot.lane.b32.xlu0 %v83_v36, %s84_s0 }
  0xa5   : > { %v86_v38 = vpop.permute.xlu0 %85 }
  0xa6   : > { %412 = vpush %v86_v38 }
  0xd7   : > { %s413_s19 = spop %412 }
  0xd8   : > { %v92_v42 = vstv %s413_s19  ;;  %s97_s21 = scalar_lea.vmem [#allocation4], %s413_s19  ;;  %s103_s22 = scalar_lea.vmem [#allocation10], %s413_s19 }
  0xd9   : > { %v99_v43 = vld [vmem:[%s97_s21] ss:$0 sm:$0xff]  ;;  %v94_v45 = vsel %vm91_vm13, %v92_v42, %v93_v39 }
  0xda   : > { %v105_v44 = vld [vmem:[%s103_s22] ss:$0 sm:$0xff]  ;;  %100 = vst [vmem:[%s97_s21] sm:$0x1] %v98_v40  ;;  %vm108_vm14 = vcmp.ne.f32.partialorder %v99_v43, 0.0  ;;  %95 = vst [vmem:[#allocation6] sm:$0x1] %v94_v45 }
  0xdb   : > { %106 = vst [vmem:[%s103_s22] sm:$0x1] %v104_v41  ;;  %101 = vst [vmem:[%s96_s18] sm:$0x1] %v99_v43  ;;  %v115_v52 = vsel %vm114_vm12, %v99_v43, 0.0 }
  0xdc   : > { %107 = vst [vmem:[%s102_s20] sm:$0x1] %v105_v44  ;;  %vm109_vm0 = vmand %vm91_vm13, %vm108_vm14 }
  0xdd   : > { %v110_v46 = vsel %vm109_vm0, %v99_v43, 1.0 }
  0xde   : > { %v123_v47 = vsel %vm122_vm15, %v110_v46, 1.0 }
  0xdf   : > { %425 = vrcp.f32 %v123_v47 }
  0xe1   :  { %v194_v58 = vld [vmem:[#allocation6] sm:$0x1] (%p30_p5) }
  0xe2   : > { %v119_v49 = vld [vmem:[#allocation4] sm:$0xff]  ;;  %197 = vst [vmem:[#allocation7] sm:$0x1] (%p30_p5), %v194_v58 }
  0xe3   :  { %v133_v56 = vld [vmem:[#allocation10] sm:$0xff] (%p30_p5) }
  0xec   : > { %v426_v48 = vpop.eup %425 }
  0xed   : > { %v125_v50 = vmul.f32 %v426_v48, %v119_v49 }
  0xef   : > { %v127_v51 = vsel %vm126_vm1, %v125_v50, 0.0 }
  0xf0   : > { %128 = vadd.xlane.f32.xlu0 %v127_v51 }
 0x11d   :  { %149 = vxpose.xlu0.b32.start.end [1/1] (short) (narrow) (%p30_p5), %v133_v56, 8 }
 0x179   : > { %v129_v53 = vpop.xlane.xlu0 %128 }
 0x17a   : > { %v130_v54 = vmul.f32 %v129_v53, %v115_v52  ;;  %32 = sbr.rel (!%p30_p5) target bundleno = 23 (0x17), region = 112 }
 0x17c   : > { %v131_v55 = vsub.f32 %v125_v50, %v130_v54 }
 0x17e   : > { %132 = vst [vmem:[#allocation4] sm:$0xff] %v131_v55 }
 0x185   :  { %v186_v57 = vld [vmem:[#allocation4] sm:$0x3] }
 0x186   :  { %189 = vst [vmem:[#allocation5] sm:$0x3] %v186_v57 }
 0x18d   :  { %v267_v59 = vld [vmem:[#allocation5] sm:$0x3] }
 0x18e   :  { %268 = vst [vmem:[%s551_s1] sm:$0x3] %v267_v59 }
 0x18f   :  { %458 = shalt.err (!%p455_p10)
}
 0x190   :  { %277 = dma.vmem_to_hbm [thread:$0]  %s275_s24, 16, %s552_s2, [#allocation3]  }
 0x199   :  { %v165_v60 = vpop.trf.xlu0 }
 0x19a   :  { %181 = vst [vmem:[#allocation8] sm:$0x1] %v165_v60 }
 0x1a1   :  { %v202_v61 = vld [vmem:[#allocation8] sm:$0x1] }
 0x1a2   :  { %205 = vst [vmem:[#allocation9] sm:$0x1] %v202_v61 }
 0x1a9   :  { %v341_v62 = vld [vmem:[#allocation9] sm:$0x1] }
 0x1aa   :  { %342 = vst [vmem:[%s553_s3] sm:$0x1] %v341_v62 }
 0x1ab   :  { %473 = dma.done.wait [#allocation3], 16  }
 0x1ac   :  { %474 = vsyncadd [#allocation3], 4294967280 }
 0x1ad   :  { %348 = vsyncpa [#allocation2], 1 }
 0x1ae   :  { %349 = vsyncpa [#allocation3], 1 }

// kernel: custom-call.17
= control target key start
LH: loop header
LB: loop body
LE: loop exit
PB: predicated region body
PF: predicated region fallthrough
CT: control target
= control target key end

     0   :  { %v40_v1 = vlaneseq  ;;  %v135_v9 = vmov -1.0   ;;  %s158_s0 = inlined_call_operand.vmem [shape: f32[1,2,2], index: 0, kind: input, shape index: {}]   ;;  %s159_s1 = inlined_call_operand.vmem [shape: f32[1,2,2], index: 1, kind: output, shape index: {}]  }
   0x1   :  { %v18_v0 = vld [vmem:[%s158_s0] sm:$0x3] }
   0x2   :  { %19 = vst [vmem:[#allocation1] sm:$0x3] %v18_v0  ;;  %v41_v2 = vand.u32 127, %v40_v1  ;;  %v44_v3 = vshrl.u32 %v40_v1, 7 }
   0x4   :  { %vm42_vm0 = vcmp.lt.s32.totalorder %v41_v2, 2  ;;  %vm51_vm1 = vcmp.ge.s32.totalorder %v44_v3, %v41_v2  ;;  %vm46_vm3 = vcmp.eq.s32.totalorder %v44_v3, %v41_v2  ;;  %vm62_vm4 = vcmp.eq.s32.totalorder %v41_v2, %v44_v3 }
   0x5   :  { %vm149_vm2 = vmand %vm51_vm1, %vm42_vm0  ;;  %vm65_vm5 = vcmp.eq.s32.totalorder %v41_v2, 0  ;;  %vm73_vm6 = vcmp.eq.s32.totalorder %v41_v2, 1 }
   0x6   :  { %v66_v10 = vsel %vm65_vm5, 1.0, %v135_v9 }
   0x7   :  { %v67_v11 = vsel %vm62_vm4, %v66_v10, 0.0 }
   0x9   :  { %v38_v5 = vld [vmem:[#allocation1] sm:$0x3] }
   0xa   :  { %39 = vst [vmem:[#allocation0] sm:$0x3] %v38_v5 }
  0x11   :  { %v47_v6 = vld [vmem:[#allocation0] sm:$0xff] }
  0x12   :  { %v48_v7 = vsel %vm46_vm3, %v47_v6, 0.0  ;;  %v53_v8 = vsel %vm149_vm2, %v47_v6, 0.0 }
  0x13   :  { %49 = vadd.xlane.f32.xlu0 %v48_v7 }
  0x9c   :  { %v50_v12 = vpop.xlane.xlu0 %49 }
  0x9d   :  { %133 = vrcp.f32 %v50_v12  ;;  %vm80_vm7 = vweird.f32 %v50_v12 }
  0xaa   :  { %v134_v13 = vpop.eup %133 }
  0xab   :  { %v55_v14 = vmul.f32 %v134_v13, %v53_v8 }
  0xad   :  { %56 = vst [vmem:[#allocation4] sm:$0xff] %v55_v14 }
  0xb4   :  { %v69_v15 = vld [vmem:[#allocation4 + $0x1] ss:$0 sm:$0xff] }
  0xb5   :  { %v70_v16 = vxor.u32 2147483648, %v69_v15 }
  0xb7   :  { %v74_v17 = vmul.f32 %v70_v16, %v67_v11 }
  0xb9   :  { %75 = vadd.xlane.f32.xlu0 %v74_v17 }
 0x142   :  { %v76_v18 = vpop.xlane.xlu0 %75 }
 0x143   :  { %v77_v19 = vsel %vm73_vm6, %v76_v18, %v67_v11 }
 0x144   :  { %v79_v20 = vmul.f32 %v134_v13, %v77_v19 }
 0x146   :  { %v81_v21 = vsel %vm80_vm7, %v77_v19, %v79_v20 }
 0x147   :  { %82 = vst [vmem:[#allocation2] sm:$0xff] %v81_v21 }
 0x14e   :  { %v87_v22 = vld [vmem:[#allocation2] sm:$0x3] }
 0x14f   :  { %90 = vst [vmem:[#allocation3] sm:$0x3] %v87_v22 }
 0x156   :  { %v107_v23 = vld [vmem:[#allocation3] sm:$0x3] }
 0x157   :  { %108 = vst [vmem:[%s159_s1] sm:$0x3] %v107_v23 }

// kernel: custom-call.14
= control target key start
LH: loop header
LB: loop body
LE: loop exit
PB: predicated region body
PF: predicated region fallthrough
CT: control target
= control target key end

     0   :  { %v40_v1 = vlaneseq  ;;  %v134_v9 = vmov -1.0   ;;  %s157_s0 = inlined_call_operand.vmem [shape: f32[1,2,2], index: 0, kind: input, shape index: {}]   ;;  %s158_s1 = inlined_call_operand.vmem [shape: f32[1,2,2], index: 1, kind: output, shape index: {}]  }
   0x1   :  { %v18_v0 = vld [vmem:[%s157_s0] sm:$0x3] }
   0x2   :  { %19 = vst [vmem:[#allocation1] sm:$0x3] %v18_v0  ;;  %v41_v2 = vand.u32 127, %v40_v1  ;;  %v44_v3 = vshrl.u32 %v40_v1, 7 }
   0x4   :  { %vm42_vm0 = vcmp.lt.s32.totalorder %v41_v2, 2  ;;  %vm51_vm1 = vcmp.le.s32.totalorder %v44_v3, %v41_v2  ;;  %vm46_vm3 = vcmp.eq.s32.totalorder %v44_v3, %v41_v2  ;;  %vm62_vm4 = vcmp.eq.s32.totalorder %v41_v2, %v44_v3 }
   0x5   :  { %vm148_vm2 = vmand %vm51_vm1, %vm42_vm0  ;;  %vm65_vm5 = vcmp.eq.s32.totalorder %v41_v2, 1  ;;  %vm72_vm6 = vcmp.eq.s32.totalorder %v41_v2, 0 }
   0x6   :  { %v66_v10 = vsel %vm65_vm5, 1.0, %v134_v9 }
   0x7   :  { %v67_v11 = vsel %vm62_vm4, %v66_v10, 0.0 }
   0x9   :  { %v38_v5 = vld [vmem:[#allocation1] sm:$0x3] }
   0xa   :  { %39 = vst [vmem:[#allocation0] sm:$0x3] %v38_v5 }
  0x11   :  { %v47_v6 = vld [vmem:[#allocation0] sm:$0xff] }
  0x12   :  { %v48_v7 = vsel %vm46_vm3, %v47_v6, 0.0  ;;  %v53_v8 = vsel %vm148_vm2, %v47_v6, 0.0 }
  0x13   :  { %49 = vadd.xlane.f32.xlu0 %v48_v7 }
  0x9c   :  { %v50_v12 = vpop.xlane.xlu0 %49 }
  0x9d   :  { %132 = vrcp.f32 %v50_v12  ;;  %vm79_vm7 = vweird.f32 %v50_v12 }
  0xaa   :  { %v133_v13 = vpop.eup %132 }
  0xab   :  { %v55_v14 = vmul.f32 %v133_v13, %v53_v8 }
  0xad   :  { %56 = vst [vmem:[#allocation4] sm:$0xff] %v55_v14 }
  0xb4   :  { %v68_v15 = vld [vmem:[#allocation4] ss:$0 sm:$0xff] }
  0xb5   :  { %v69_v16 = vxor.u32 2147483648, %v68_v15 }
  0xb7   :  { %v73_v17 = vmul.f32 %v69_v16, %v67_v11 }
  0xb9   :  { %74 = vadd.xlane.f32.xlu0 %v73_v17 }
 0x142   :  { %v75_v18 = vpop.xlane.xlu0 %74 }
 0x143   :  { %v76_v19 = vsel %vm72_vm6, %v75_v18, %v67_v11 }
 0x144   :  { %v78_v20 = vmul.f32 %v133_v13, %v76_v19 }
 0x146   :  { %v80_v21 = vsel %vm79_vm7, %v76_v19, %v78_v20 }
 0x147   :  { %81 = vst [vmem:[#allocation2] sm:$0xff] %v80_v21 }
 0x14e   :  { %v86_v22 = vld [vmem:[#allocation2] sm:$0x3] }
 0x14f   :  { %89 = vst [vmem:[#allocation3] sm:$0x3] %v86_v22 }
 0x156   :  { %v106_v23 = vld [vmem:[#allocation3] sm:$0x3] }
 0x157   :  { %107 = vst [vmem:[%s158_s1] sm:$0x3] %v106_v23 }

// kernel: custom-call.30
= control target key start
LH: loop header
LB: loop body
LE: loop exit
PB: predicated region body
PF: predicated region fallthrough
CT: control target
= control target key end

     0   :  { %v135_v0 = vmov 0.0   ;;  %vm41_vm0 = vcmask 7168   ;;  %vm59_vm1 = vcmask 15368   ;;  %vm76_vm2 = vcmask 1047553   ;;  %s152_s0 = inlined_call_operand.vmem [shape: f32[2,2], index: 0, kind: input, shape index: {}]   ;;  %s153_s1 = inlined_call_operand.vmem [shape: f32[2,2], index: 1, kind: output, shape index: {}]  }
   0x1   :  { %40 = vst [vmem:[#allocation2] sm:$0xff] %v135_v0  ;;  %v18_v1 = vld [vmem:[%s152_s0] sm:$0x3]  ;;  %vm77_vm3 = vmand %vm59_vm1, %vm76_vm2 }
   0x2   :  { %19 = vst [vmem:[#allocation1] sm:$0x3] %v18_v1 }
   0x8   :  { %v42_v2 = vld [vmem:[#allocation2] ss:$0 sm:$0xff] }
   0x9   :  { %v44_v3 = vmul.f32 %v42_v2, %v42_v2  ;;  %v51_v4 = vmul.f32 0.0, %v42_v2  ;;  %v38_v5 = vld [vmem:[#allocation1] sm:$0x3] }
   0xa   :  { %39 = vst [vmem:[#allocation0] sm:$0x3] %v38_v5 }
   0xb   :  { %45 = vadd.xlane.f32.xlu0 %v44_v3 }
   0xf   :  { %52 = vadd.xlane.f32.xlu0 %v51_v4 }
  0x11   :  { %v43_v6 = vld [vmem:[#allocation0] ss:$0 sm:$0xff]  ;;  %v63_v18 = vld [vmem:[#allocation0 + $0x1] ss:$0 sm:$0xff] }
  0x12   :  { %v49_v10 = vld [vmem:[#allocation0] sm:$0xff] }
  0x94   :  { %v46_v7 = vpop.xlane.xlu0 %45 }
  0x95   :  { %v47_v8 = vsub.f32 %v43_v6, %v46_v7 }
  0x97   :  { %131 = vrsqrt.f32 %v47_v8 }
  0x98   :  { %v53_v9 = vpop.xlane.xlu0 %52 }
  0x99   :  { %v54_v11 = vsub.f32 %v49_v10, %v53_v9 }
  0xa4   :  { %v132_v12 = vpop.eup %131 }
  0xa5   :  { %v55_v13 = vmul.f32 %v132_v12, %v54_v11 }
  0xa7   :  { %v56_v14 = vsel %vm41_vm0, %v55_v13, 0.0 }
  0xa8   :  { %58 = vst [vmem:[#allocation2] sm:$0xff] %v56_v14 }
  0xaf   :  { %v61_v15 = vld [vmem:[#allocation2 + $0x1] ss:$0 sm:$0xff] }
  0xb0   :  { %v64_v16 = vmul.f32 %v61_v15, %v61_v15  ;;  %v71_v17 = vmul.f32 %v61_v15, %v56_v14 }
  0xb2   :  { %65 = vadd.xlane.f32.xlu1 %v64_v16 }
  0xb6   :  { %72 = vadd.xlane.f32.xlu1 %v71_v17 }
 0x13b   :  { %v66_v19 = vpop.xlane.xlu1 %65 }
 0x13c   :  { %v67_v20 = vsub.f32 %v63_v18, %v66_v19 }
 0x13e   :  { %133 = vrsqrt.f32 %v67_v20 }
 0x13f   :  { %v73_v21 = vpop.xlane.xlu1 %72 }
 0x140   :  { %v74_v22 = vsub.f32 %v49_v10, %v73_v21 }
 0x14b   :  { %v134_v23 = vpop.eup %133 }
 0x14c   :  { %v75_v24 = vmul.f32 %v134_v23, %v74_v22 }
 0x14e   :  { %v78_v25 = vsel %vm77_vm3, %v75_v24, 0.0 }
 0x14f   :  { %v79_v26 = vadd.f32 %v78_v25, %v56_v14 }
 0x151   :  { %80 = vst [vmem:[#allocation2] sm:$0xff] %v79_v26 }
 0x158   :  { %v85_v27 = vld [vmem:[#allocation2] sm:$0x3] }
 0x159   :  { %88 = vst [vmem:[#allocation3] sm:$0x3] %v85_v27 }
 0x160   :  { %v105_v28 = vld [vmem:[#allocation3] sm:$0x3] }
 0x161   :  { %106 = vst [vmem:[%s153_s1] sm:$0x3] %v105_v28 }

// kernel: custom-call.9
= control target key start
LH: loop header
LB: loop body
LE: loop exit
PB: predicated region body
PF: predicated region fallthrough
CT: control target
= control target key end

     0   :  { %v183_v0 = vmov 0.0   ;;  %vm41_vm0 = vcmask 7168   ;;  %vm59_vm1 = vcmask 15368   ;;  %vm76_vm2 = vcmask 1047553   ;;  %s200_s0 = inlined_call_operand.vmem [shape: f32[4,4], index: 0, kind: input, shape index: {}]   ;;  %s201_s1 = inlined_call_operand.vmem [shape: f32[4,4], index: 1, kind: output, shape index: {}]  }
   0x1   :  { %40 = vst [vmem:[#allocation2] sm:$0xff] %v183_v0  ;;  %v18_v1 = vld [vmem:[%s200_s0] sm:$0xf]  ;;  %vm77_vm3 = vmand %vm59_vm1, %vm76_vm2  ;;  %vm81_vm4 = vcmask 23568   ;;  %vm98_vm5 = vcmask 1047554   ;;  %vm103_vm7 = vcmask 31768  }
   0x2   :  { %19 = vst [vmem:[#allocation1] sm:$0xf] %v18_v1  ;;  %vm99_vm6 = vmand %vm81_vm4, %vm98_vm5  ;;  %vm120_vm8 = vcmask 1047555  }
   0x3   :  { %vm121_vm9 = vmand %vm103_vm7, %vm120_vm8 }
   0x8   :  { %v42_v2 = vld [vmem:[#allocation2] ss:$0 sm:$0xff] }
   0x9   :  { %v44_v3 = vmul.f32 %v42_v2, %v42_v2  ;;  %v51_v4 = vmul.f32 0.0, %v42_v2  ;;  %v38_v5 = vld [vmem:[#allocation1] sm:$0xf] }
   0xa   :  { %39 = vst [vmem:[#allocation0] sm:$0xf] %v38_v5 }
   0xb   :  { %45 = vadd.xlane.f32.xlu0 %v44_v3 }
   0xf   :  { %52 = vadd.xlane.f32.xlu0 %v51_v4 }
  0x11   :  { %v43_v6 = vld [vmem:[#allocation0] ss:$0 sm:$0xff]  ;;  %v63_v18 = vld [vmem:[#allocation0 + $0x1] ss:$0 sm:$0xff]  ;;  %v85_v30 = vld [vmem:[#allocation0 + $0x2] ss:$0 sm:$0xff] }
  0x12   :  { %v49_v10 = vld [vmem:[#allocation0] sm:$0xff] }
  0x13   :  { %v107_v42 = vld [vmem:[#allocation0 + $0x3] ss:$0 sm:$0xff] }
  0x94   :  { %v46_v7 = vpop.xlane.xlu0 %45 }
  0x95   :  { %v47_v8 = vsub.f32 %v43_v6, %v46_v7 }
  0x97   :  { %175 = vrsqrt.f32 %v47_v8 }
  0x98   :  { %v53_v9 = vpop.xlane.xlu0 %52 }
  0x99   :  { %v54_v11 = vsub.f32 %v49_v10, %v53_v9 }
  0xa4   :  { %v176_v12 = vpop.eup %175 }
  0xa5   :  { %v55_v13 = vmul.f32 %v176_v12, %v54_v11 }
  0xa7   :  { %v56_v14 = vsel %vm41_vm0, %v55_v13, 0.0 }
  0xa8   :  { %58 = vst [vmem:[#allocation2] sm:$0xff] %v56_v14 }
  0xaf   :  { %v61_v15 = vld [vmem:[#allocation2 + $0x1] ss:$0 sm:$0xff] }
  0xb0   :  { %v64_v16 = vmul.f32 %v61_v15, %v61_v15  ;;  %v71_v17 = vmul.f32 %v61_v15, %v56_v14 }
  0xb2   :  { %65 = vadd.xlane.f32.xlu1 %v64_v16 }
  0xb6   :  { %72 = vadd.xlane.f32.xlu1 %v71_v17 }
 0x13b   :  { %v66_v19 = vpop.xlane.xlu1 %65 }
 0x13c   :  { %v67_v20 = vsub.f32 %v63_v18, %v66_v19 }
 0x13e   :  { %177 = vrsqrt.f32 %v67_v20 }
 0x13f   :  { %v73_v21 = vpop.xlane.xlu1 %72 }
 0x140   :  { %v74_v22 = vsub.f32 %v49_v10, %v73_v21 }
 0x14b   :  { %v178_v23 = vpop.eup %177 }
 0x14c   :  { %v75_v24 = vmul.f32 %v178_v23, %v74_v22 }
 0x14e   :  { %v78_v25 = vsel %vm77_vm3, %v75_v24, 0.0 }
 0x14f   :  { %v79_v26 = vadd.f32 %v78_v25, %v56_v14 }
 0x151   :  { %80 = vst [vmem:[#allocation2] sm:$0xff] %v79_v26 }
 0x158   :  { %v83_v27 = vld [vmem:[#allocation2 + $0x2] ss:$0 sm:$0xff] }
 0x159   :  { %v93_v28 = vmul.f32 %v83_v27, %v79_v26  ;;  %v86_v29 = vmul.f32 %v83_v27, %v83_v27 }
 0x15b   :  { %94 = vadd.xlane.f32.xlu1 %v93_v28  ;;  %87 = vadd.xlane.f32.xlu0 %v86_v29 }
 0x1e4   :  { %v88_v31 = vpop.xlane.xlu0 %87  ;;  %v95_v33 = vpop.xlane.xlu1 %94 }
 0x1e5   :  { %v89_v32 = vsub.f32 %v85_v30, %v88_v31  ;;  %v96_v34 = vsub.f32 %v49_v10, %v95_v33 }
 0x1e7   :  { %179 = vrsqrt.f32 %v89_v32 }
 0x1f4   :  { %v180_v35 = vpop.eup %179 }
 0x1f5   :  { %v97_v36 = vmul.f32 %v180_v35, %v96_v34 }
 0x1f7   :  { %v100_v37 = vsel %vm99_vm6, %v97_v36, 0.0 }
 0x1f8   :  { %v101_v38 = vadd.f32 %v100_v37, %v79_v26 }
 0x1fa   :  { %102 = vst [vmem:[#allocation2] sm:$0xff] %v101_v38 }
 0x201   :  { %v105_v39 = vld [vmem:[#allocation2 + $0x3] ss:$0 sm:$0xff] }
 0x202   :  { %v115_v40 = vmul.f32 %v105_v39, %v101_v38  ;;  %v108_v41 = vmul.f32 %v105_v39, %v105_v39 }
 0x204   :  { %116 = vadd.xlane.f32.xlu1 %v115_v40  ;;  %109 = vadd.xlane.f32.xlu0 %v108_v41 }
 0x28d   :  { %v110_v43 = vpop.xlane.xlu0 %109  ;;  %v117_v45 = vpop.xlane.xlu1 %116 }
 0x28e   :  { %v111_v44 = vsub.f32 %v107_v42, %v110_v43  ;;  %v118_v46 = vsub.f32 %v49_v10, %v117_v45 }
 0x290   :  { %181 = vrsqrt.f32 %v111_v44 }
 0x29d   :  { %v182_v47 = vpop.eup %181 }
 0x29e   :  { %v119_v48 = vmul.f32 %v182_v47, %v118_v46 }
 0x2a0   :  { %v122_v49 = vsel %vm121_vm9, %v119_v48, 0.0 }
 0x2a1   :  { %v123_v50 = vadd.f32 %v122_v49, %v101_v38 }
 0x2a3   :  { %124 = vst [vmem:[#allocation2] sm:$0xff] %v123_v50 }
 0x2aa   :  { %v129_v51 = vld [vmem:[#allocation2] sm:$0xf] }
 0x2ab   :  { %132 = vst [vmem:[#allocation3] sm:$0xf] %v129_v51 }
 0x2b2   :  { %v149_v52 = vld [vmem:[#allocation3] sm:$0xf] }
 0x2b3   :  { %150 = vst [vmem:[%s201_s1] sm:$0xf] %v149_v52 }

// kernel: custom-call.33
= control target key start
LH: loop header
LB: loop body
LE: loop exit
PB: predicated region body
PF: predicated region fallthrough
CT: control target
= control target key end

     0   :  { %v40_v1 = vlaneseq  ;;  %v155_v11 = vmov -1.0   ;;  %s172_s0 = inlined_call_operand.vmem [shape: f32[1,4,4], index: 0, kind: input, shape index: {}]   ;;  %s173_s1 = inlined_call_operand.vmem [shape: f32[1,4,4], index: 1, kind: output, shape index: {}]  }
   0x1   :  { %v18_v0 = vld [vmem:[%s172_s0] sm:$0xf] }
   0x2   :  { %19 = vst [vmem:[#allocation1] sm:$0xf] %v18_v0  ;;  %v41_v3 = vand.u32 127, %v40_v1  ;;  %v44_v4 = vshrl.u32 %v40_v1, 7 }
   0x4   :  { %vm42_vm0 = vcmp.lt.s32.totalorder %v41_v3, 4  ;;  %vm51_vm1 = vcmp.ge.s32.totalorder %v44_v4, %v41_v3  ;;  %vm46_vm2 = vcmp.eq.s32.totalorder %v44_v4, %v41_v3  ;;  %vm65_vm4 = vcmp.eq.s32.totalorder %v41_v3, 0 }
   0x5   :  { %vm52_vm3 = vmand %vm51_vm1, %vm42_vm0  ;;  %vm62_vm5 = vcmp.eq.s32.totalorder %v41_v3, %v44_v4  ;;  %v66_v12 = vsel %vm65_vm4, 1.0, %v155_v11  ;;  %vm73_vm6 = vcmp.eq.s32.totalorder %v41_v3, 1  ;;  %vm83_vm7 = vcmp.eq.s32.totalorder %v41_v3, 2 }
   0x6   :  { %v67_v13 = vsel %vm62_vm5, %v66_v12, 0.0  ;;  %vm93_vm8 = vcmp.eq.s32.totalorder %v41_v3, 3 }
   0x9   :  { %v38_v2 = vld [vmem:[#allocation1] sm:$0xf] }
   0xa   :  { %39 = vst [vmem:[#allocation0] sm:$0xf] %v38_v2 }
  0x11   :  { %v47_v5 = vld [vmem:[#allocation0] sm:$0xff] }
  0x12   :  { %v48_v6 = vsel %vm46_vm2, %v47_v5, 0.0  ;;  %v53_v7 = vsel %vm52_vm3, %v47_v5, 0.0 }
  0x13   :  { %49 = vadd.xlane.f32.xlu0 %v48_v6 }
  0x9c   :  { %v50_v8 = vpop.xlane.xlu0 %49 }
  0x9d   :  { %153 = vrcp.f32 %v50_v8  ;;  %vm100_vm9 = vweird.f32 %v50_v8 }
  0xaa   :  { %v154_v9 = vpop.eup %153 }
  0xab   :  { %v55_v10 = vmul.f32 %v154_v9, %v53_v7 }
  0xad   :  { %56 = vst [vmem:[#allocation4] sm:$0xff] %v55_v10 }
  0xb4   :  { %v69_v14 = vld [vmem:[#allocation4 + $0x1] ss:$0 sm:$0xff]  ;;  %v79_v17 = vld [vmem:[#allocation4 + $0x2] ss:$0 sm:$0xff]  ;;  %v89_v22 = vld [vmem:[#allocation4 + $0x3] ss:$0 sm:$0xff] }
  0xb5   :  { %v70_v15 = vxor.u32 2147483648, %v69_v14  ;;  %v80_v19 = vxor.u32 2147483648, %v79_v17  ;;  %v90_v24 = vxor.u32 2147483648, %v89_v22 }
  0xb7   :  { %v74_v16 = vmul.f32 %v70_v15, %v67_v13 }
  0xb9   :  { %75 = vadd.xlane.f32.xlu0 %v74_v16 }
 0x142   :  { %v76_v18 = vpop.xlane.xlu0 %75 }
 0x143   :  { %v77_v20 = vsel %vm73_vm6, %v76_v18, %v67_v13 }
 0x144   :  { %v84_v21 = vmul.f32 %v80_v19, %v77_v20 }
 0x146   :  { %85 = vadd.xlane.f32.xlu1 %v84_v21 }
 0x1cf   :  { %v86_v23 = vpop.xlane.xlu1 %85 }
 0x1d0   :  { %v87_v25 = vsel %vm83_vm7, %v86_v23, %v77_v20 }
 0x1d1   :  { %v94_v26 = vmul.f32 %v90_v24, %v87_v25 }
 0x1d3   :  { %95 = vadd.xlane.f32.xlu1 %v94_v26 }
 0x25c   :  { %v96_v27 = vpop.xlane.xlu1 %95 }
 0x25d   :  { %v97_v28 = vsel %vm93_vm8, %v96_v27, %v87_v25 }
 0x25e   :  { %v99_v29 = vmul.f32 %v154_v9, %v97_v28 }
 0x260   :  { %v101_v30 = vsel %vm100_vm9, %v97_v28, %v99_v29 }
 0x261   :  { %102 = vst [vmem:[#allocation2] sm:$0xff] %v101_v30 }
 0x268   :  { %v107_v31 = vld [vmem:[#allocation2] sm:$0xf] }
 0x269   :  { %110 = vst [vmem:[#allocation3] sm:$0xf] %v107_v31 }
 0x270   :  { %v127_v32 = vld [vmem:[#allocation3] sm:$0xf] }
 0x271   :  { %128 = vst [vmem:[%s173_s1] sm:$0xf] %v127_v32 }

// kernel: custom-call.29
= control target key start
LH: loop header
LB: loop body
LE: loop exit
PB: predicated region body
PF: predicated region fallthrough
CT: control target
= control target key end

     0   :  { %v594_v0 = vmov 0.0   ;;  %vm42_vm0 = vcmask 7168   ;;  %vm73_vm1 = vcmask 15368   ;;  %vm90_vm2 = vcmask 1047553   ;;  %s690_s0 = inlined_call_operand.vmem [shape: f32[16,16], index: 0, kind: input, shape index: {}]   ;;  %s691_s1 = inlined_call_operand.vmem [shape: f32[16,16], index: 1, kind: output, shape index: {}]  }
   0x1   :  { %39 = vst [vmem:[#allocation1] sm:$0xff] %v594_v0  ;;  %v608_v4 = vld [vmem:[%s690_s0] sm:$0xff]  ;;  %v616_v16 = vld [vmem:[%s690_s0 + $0x8] sm:$0xff]  ;;  %vm91_vm3 = vmand %vm73_vm1, %vm90_vm2  ;;  %vm108_vm4 = vcmask 23568   ;;  %vm125_vm5 = vcmask 1047554   ;;  %vm143_vm7 = vcmask 31768  }
   0x2   :  { %33 = vst [vmem:[#allocation0] sm:$0xff] %v608_v4  ;;  %35 = vst [vmem:[#allocation0 + $0x8] sm:$0xff] %v616_v16  ;;  %vm160_vm8 = vcmask 1047555   ;;  %vm178_vm10 = vcmask 39968   ;;  %vm195_vm11 = vcmask 1047556   ;;  %vm213_vm13 = vcmask 48168  }
   0x3   :  { %vm126_vm6 = vmand %vm108_vm4, %vm125_vm5  ;;  %vm230_vm14 = vcmask 1047557  }
   0x4   :  { %vm161_vm9 = vmand %vm143_vm7, %vm160_vm8 }
   0x5   :  { %vm196_vm12 = vmand %vm178_vm10, %vm195_vm11 }
   0x6   :  { %vm231_vm15 = vmand %vm213_vm13, %vm230_vm14 }
   0x8   :  { %v43_v1 = vld [vmem:[#allocation1] ss:$0 sm:$0xff] }
   0x9   :  { %v45_v2 = vmul.f32 %v43_v1, %v43_v1  ;;  %v52_v3 = vmul.f32 0.0, %v43_v1  ;;  %v44_v5 = vld [vmem:[#allocation0] ss:$0 sm:$0xff]  ;;  %v77_v17 = vld [vmem:[#allocation0 + $0x1] ss:$0 sm:$0xff] }
   0xa   :  { %v112_v40 = vld [vmem:[#allocation0 + $0x2] ss:$0 sm:$0xff]  ;;  %v147_v58 = vld [vmem:[#allocation0 + $0x3] ss:$0 sm:$0xff] }
   0xb   :  { %46 = vadd.xlane.f32.xlu0 %v45_v2 }
   0xf   :  { %53 = vadd.xlane.f32.xlu0 %v52_v3 }
  0x94   :  { %v47_v6 = vpop.xlane.xlu0 %46 }
  0x95   :  { %v48_v7 = vsub.f32 %v44_v5, %v47_v6 }
  0x97   :  { %562 = vrsqrt.f32 %v48_v7 }
  0x98   :  { %v54_v8 = vpop.xlane.xlu0 %53 }
  0x99   :  { %v55_v9 = vsub.f32 %v608_v4, %v54_v8 }
  0xa4   :  { %v563_v10 = vpop.eup %562 }
  0xa5   :  { %v56_v11 = vmul.f32 %v563_v10, %v55_v9 }
  0xa7   :  { %v57_v12 = vsel %vm42_vm0, %v56_v11, 0.0 }
  0xa8   :  { %59 = vst [vmem:[#allocation1] sm:$0xff] %v57_v12 }
  0xaf   :  { %v75_v13 = vld [vmem:[#allocation1 + $0x1] ss:$0 sm:$0xff] }
  0xb0   :  { %v85_v14 = vmul.f32 %v75_v13, %v57_v12  ;;  %v78_v15 = vmul.f32 %v75_v13, %v75_v13 }
  0xb2   :  { %86 = vadd.xlane.f32.xlu0 %v85_v14  ;;  %79 = vadd.xlane.f32.xlu1 %v78_v15 }
  0xb6   :  { %65 = vadd.xlane.f32.xlu1 %v52_v3 }
 0x13b   :  { %v80_v18 = vpop.xlane.xlu1 %79  ;;  %v87_v24 = vpop.xlane.xlu0 %86 }
 0x13c   :  { %v81_v19 = vsub.f32 %v77_v17, %v80_v18  ;;  %v88_v26 = vsub.f32 %v608_v4, %v87_v24 }
 0x13e   :  { %564 = vrsqrt.f32 %v81_v19 }
 0x13f   :  { %v66_v20 = vpop.xlane.xlu1 %65 }
 0x140   :  { %v67_v21 = vsub.f32 %v616_v16, %v66_v20 }
 0x142   :  { %v68_v22 = vmul.f32 %v563_v10, %v67_v21 }
 0x144   :  { %v69_v23 = vsel %vm42_vm0, %v68_v22, 0.0  ;;  %vm248_vm0 = vcmask 56368  }
 0x145   :  { %v99_v25 = vmul.f32 %v75_v13, %v69_v23  ;;  %v182_v13 = vld [vmem:[#allocation0 + $0x4] ss:$0 sm:$0xff] }
 0x147   :  { %100 = vadd.xlane.f32.xlu1 %v99_v25 }
 0x14b   :  { %v565_v27 = vpop.eup %564 }
 0x14c   :  { %v89_v28 = vmul.f32 %v565_v27, %v88_v26 }
 0x14e   :  { %v92_v29 = vsel %vm91_vm3, %v89_v28, 0.0 }
 0x14f   :  { %v93_v30 = vadd.f32 %v92_v29, %v57_v12 }
 0x151   :  { %94 = vst [vmem:[#allocation1] sm:$0xff] %v93_v30 }
 0x158   :  { %v110_v31 = vld [vmem:[#allocation1 + $0x2] ss:$0 sm:$0xff] }
 0x159   :  { %v113_v32 = vmul.f32 %v110_v31, %v110_v31  ;;  %v120_v33 = vmul.f32 %v110_v31, %v93_v30 }
 0x15b   :  { %114 = vadd.xlane.f32.xlu0 %v113_v32  ;;  %121 = vadd.xlane.f32.xlu1 %v120_v33  ;;  %v217_v32 = vld [vmem:[#allocation0 + $0x5] ss:$0 sm:$0xff] }
 0x1d0   :  { %v101_v34 = vpop.xlane.xlu1 %100 }
 0x1d1   :  { %v102_v35 = vsub.f32 %v616_v16, %v101_v34 }
 0x1d3   :  { %v103_v36 = vmul.f32 %v565_v27, %v102_v35 }
 0x1d5   :  { %v104_v37 = vsel %vm73_vm1, %v103_v36, 0.0  ;;  %vm265_vm1 = vcmask 1047558  }
 0x1d6   :  { %v105_v38 = vadd.f32 %v104_v37, %v69_v23  ;;  %vm266_vm3 = vmand %vm248_vm0, %vm265_vm1 }
 0x1d8   :  { %v134_v39 = vmul.f32 %v110_v31, %v105_v38 }
 0x1da   :  { %135 = vadd.xlane.f32.xlu0 %v134_v39 }
 0x1e4   :  { %v115_v41 = vpop.xlane.xlu0 %114  ;;  %v122_v43 = vpop.xlane.xlu1 %121 }
 0x1e5   :  { %v116_v42 = vsub.f32 %v112_v40, %v115_v41  ;;  %v123_v44 = vsub.f32 %v608_v4, %v122_v43 }
 0x1e7   :  { %566 = vrsqrt.f32 %v116_v42 }
 0x1f4   :  { %v567_v45 = vpop.eup %566 }
 0x1f5   :  { %v124_v46 = vmul.f32 %v567_v45, %v123_v44 }
 0x1f7   :  { %v127_v47 = vsel %vm126_vm6, %v124_v46, 0.0  ;;  %vm318_vm6 = vcmask 72768  }
 0x1f8   :  { %v128_v48 = vadd.f32 %v127_v47, %v93_v30 }
 0x1fa   :  { %129 = vst [vmem:[#allocation1] sm:$0xff] %v128_v48 }
 0x201   :  { %v145_v49 = vld [vmem:[#allocation1 + $0x3] ss:$0 sm:$0xff] }
 0x202   :  { %v155_v50 = vmul.f32 %v145_v49, %v128_v48  ;;  %v148_v51 = vmul.f32 %v145_v49, %v145_v49 }
 0x204   :  { %156 = vadd.xlane.f32.xlu0 %v155_v50  ;;  %149 = vadd.xlane.f32.xlu1 %v148_v51  ;;  %v252_v50 = vld [vmem:[#allocation0 + $0x6] ss:$0 sm:$0xff] }
 0x263   :  { %v136_v52 = vpop.xlane.xlu0 %135 }
 0x264   :  { %v137_v53 = vsub.f32 %v616_v16, %v136_v52 }
 0x266   :  { %v138_v54 = vmul.f32 %v567_v45, %v137_v53 }
 0x268   :  { %v139_v55 = vsel %vm108_vm4, %v138_v54, 0.0  ;;  %vm283_vm4 = vcmask 64568  }
 0x269   :  { %v140_v56 = vadd.f32 %v139_v55, %v105_v38 }
 0x26b   :  { %v169_v57 = vmul.f32 %v145_v49, %v140_v56 }
 0x26d   :  { %170 = vadd.xlane.f32.xlu1 %v169_v57 }
 0x28d   :  { %v150_v59 = vpop.xlane.xlu1 %149  ;;  %v157_v61 = vpop.xlane.xlu0 %156 }
 0x28e   :  { %v151_v60 = vsub.f32 %v147_v58, %v150_v59  ;;  %v158_v62 = vsub.f32 %v608_v4, %v157_v61 }
 0x290   :  { %568 = vrsqrt.f32 %v151_v60 }
 0x29d   :  { %v569_v63 = vpop.eup %568 }
 0x29e   :  { %v159_v0 = vmul.f32 %v569_v63, %v158_v62 }
 0x2a0   :  { %v162_v1 = vsel %vm161_vm9, %v159_v0, 0.0 }
 0x2a1   :  { %v163_v2 = vadd.f32 %v162_v1, %v128_v48 }
 0x2a3   :  { %164 = vst [vmem:[#allocation1] sm:$0xff] %v163_v2 }
 0x2aa   :  { %v180_v3 = vld [vmem:[#allocation1 + $0x4] ss:$0 sm:$0xff] }
 0x2ab   :  { %v190_v5 = vmul.f32 %v180_v3, %v163_v2  ;;  %v183_v6 = vmul.f32 %v180_v3, %v180_v3 }
 0x2ad   :  { %191 = vadd.xlane.f32.xlu1 %v190_v5  ;;  %184 = vadd.xlane.f32.xlu0 %v183_v6 }
 0x2f6   :  { %v171_v7 = vpop.xlane.xlu1 %170 }
 0x2f7   :  { %v172_v8 = vsub.f32 %v616_v16, %v171_v7 }
 0x2f9   :  { %v173_v9 = vmul.f32 %v569_v63, %v172_v8 }
 0x2fb   :  { %v174_v10 = vsel %vm143_vm7, %v173_v9, 0.0  ;;  %vm341_vm7 = vcmask 80968  }
 0x2fc   :  { %v175_v11 = vadd.f32 %v174_v10, %v140_v56  ;;  %vm361_vm9 = vmand %vm341_vm7, %vm90_vm2 }
 0x2fe   :  { %v204_v12 = vmul.f32 %v180_v3, %v175_v11  ;;  %v287_v3 = vld [vmem:[#allocation0 + $0x7] ss:$0 sm:$0xff] }
 0x300   :  { %205 = vadd.xlane.f32.xlu0 %v204_v12 }
 0x336   :  { %v185_v14 = vpop.xlane.xlu0 %184  ;;  %v192_v17 = vpop.xlane.xlu1 %191 }
 0x337   :  { %v186_v15 = vsub.f32 %v182_v13, %v185_v14  ;;  %v193_v18 = vsub.f32 %v608_v4, %v192_v17  ;;  %v322_v17 = vld [vmem:[#allocation0 + $0x8] ss:$0 sm:$0xff] }
 0x339   :  { %570 = vrsqrt.f32 %v186_v15 }
 0x346   :  { %v571_v19 = vpop.eup %570 }
 0x347   :  { %v194_v20 = vmul.f32 %v571_v19, %v193_v18 }
 0x349   :  { %v197_v21 = vsel %vm196_vm12, %v194_v20, 0.0  ;;  %vm391_vm12 = vcmask 97368  }
 0x34a   :  { %v198_v22 = vadd.f32 %v197_v21, %v163_v2 }
 0x34c   :  { %199 = vst [vmem:[#allocation1] sm:$0xff] %v198_v22 }
 0x353   :  { %v215_v23 = vld [vmem:[#allocation1 + $0x5] ss:$0 sm:$0xff] }
 0x354   :  { %v225_v24 = vmul.f32 %v215_v23, %v198_v22  ;;  %v218_v25 = vmul.f32 %v215_v23, %v215_v23 }
 0x356   :  { %226 = vadd.xlane.f32.xlu0 %v225_v24  ;;  %219 = vadd.xlane.f32.xlu1 %v218_v25 }
 0x389   :  { %v206_v26 = vpop.xlane.xlu0 %205 }
 0x38a   :  { %v207_v27 = vsub.f32 %v616_v16, %v206_v26 }
 0x38c   :  { %v208_v28 = vmul.f32 %v571_v19, %v207_v27 }
 0x38e   :  { %v209_v29 = vsel %vm178_vm10, %v208_v28, 0.0  ;;  %vm366_vm10 = vcmask 89168  }
 0x38f   :  { %v210_v30 = vadd.f32 %v209_v29, %v175_v11  ;;  %v345_v29 = vld [vmem:[#allocation0 + $0x9] ss:$0 sm:$0xff]  ;;  %vm386_vm2 = vmand %vm366_vm10, %vm125_vm5 }
 0x390   :  { %vm411_vm5 = vmand %vm391_vm12, %vm160_vm8 }
 0x391   :  { %v239_v31 = vmul.f32 %v215_v23, %v210_v30 }
 0x393   :  { %240 = vadd.xlane.f32.xlu1 %v239_v31 }
 0x3df   :  { %v220_v33 = vpop.xlane.xlu1 %219  ;;  %v227_v35 = vpop.xlane.xlu0 %226 }
 0x3e0   :  { %v221_v34 = vsub.f32 %v217_v32, %v220_v33  ;;  %v228_v36 = vsub.f32 %v608_v4, %v227_v35 }
 0x3e2   :  { %572 = vrsqrt.f32 %v221_v34 }
 0x3ef   :  { %v573_v37 = vpop.eup %572 }
 0x3f0   :  { %v229_v38 = vmul.f32 %v573_v37, %v228_v36 }
 0x3f2   :  { %v232_v39 = vsel %vm231_vm15, %v229_v38, 0.0  ;;  %vm441_vm15 = vcmask 113768  }
 0x3f3   :  { %v233_v40 = vadd.f32 %v232_v39, %v198_v22 }
 0x3f5   :  { %234 = vst [vmem:[#allocation1] sm:$0xff] %v233_v40 }
 0x3fc   :  { %v250_v41 = vld [vmem:[#allocation1 + $0x6] ss:$0 sm:$0xff] }
 0x3fd   :  { %v260_v42 = vmul.f32 %v250_v41, %v233_v40  ;;  %v253_v43 = vmul.f32 %v250_v41, %v250_v41 }
 0x3ff   :  { %261 = vadd.xlane.f32.xlu1 %v260_v42  ;;  %254 = vadd.xlane.f32.xlu0 %v253_v43 }
 0x41c   :  { %v241_v44 = vpop.xlane.xlu1 %240 }
 0x41d   :  { %v242_v45 = vsub.f32 %v616_v16, %v241_v44 }
 0x41f   :  { %v243_v46 = vmul.f32 %v573_v37, %v242_v45 }
 0x421   :  { %v244_v47 = vsel %vm213_vm13, %v243_v46, 0.0  ;;  %vm416_vm13 = vcmask 105568  }
 0x422   :  { %v245_v48 = vadd.f32 %v244_v47, %v210_v30  ;;  %vm436_vm8 = vmand %vm416_vm13, %vm195_vm11 }
 0x423   :  { %vm461_vm11 = vmand %vm441_vm15, %vm230_vm14 }
 0x424   :  { %v274_v49 = vmul.f32 %v250_v41, %v245_v48  ;;  %v370_v41 = vld [vmem:[#allocation0 + $0xa] ss:$0 sm:$0xff] }
 0x426   :  { %275 = vadd.xlane.f32.xlu0 %v274_v49 }
 0x488   :  { %v255_v51 = vpop.xlane.xlu0 %254  ;;  %v262_v53 = vpop.xlane.xlu1 %261 }
 0x489   :  { %v256_v52 = vsub.f32 %v252_v50, %v255_v51  ;;  %v263_v54 = vsub.f32 %v608_v4, %v262_v53  ;;  %v395_v53 = vld [vmem:[#allocation0 + $0xb] ss:$0 sm:$0xff] }
 0x48b   :  { %574 = vrsqrt.f32 %v256_v52 }
 0x498   :  { %v575_v55 = vpop.eup %574 }
 0x499   :  { %v264_v56 = vmul.f32 %v575_v55, %v263_v54 }
 0x49b   :  { %v267_v57 = vsel %vm266_vm3, %v264_v56, 0.0  ;;  %vm466_vm3 = vcmask 121968  }
 0x49c   :  { %v648_v58 = vadd.f32 %v267_v57, %v233_v40 }
 0x49e   :  { %269 = vst [vmem:[#allocation1] sm:$0xff] %v648_v58 }
 0x4a5   :  { %v651_v59 = vld [vmem:[#allocation1 + $0x7] ss:$0 sm:$0xff] }
 0x4a6   :  { %v288_v60 = vmul.f32 %v651_v59, %v651_v59 }
 0x4a8   :  { %289 = vadd.xlane.f32.xlu1 %v288_v60 }
 0x4af   :  { %v276_v61 = vpop.xlane.xlu0 %275 }
 0x4b0   :  { %v277_v62 = vsub.f32 %v616_v16, %v276_v61 }
 0x4b2   :  { %v278_v63 = vmul.f32 %v575_v55, %v277_v62 }
 0x4b4   :  { %v279_v0 = vsel %vm248_vm0, %v278_v63, 0.0  ;;  %vm300_vm0 = vcmask 1047559  }
 0x4b5   :  { %v280_v1 = vadd.f32 %v279_v0, %v245_v48  ;;  %vm301_vm14 = vmand %vm283_vm4, %vm300_vm0 }
 0x4b7   :  { %v309_v2 = vmul.f32 %v651_v59, %v280_v1 }
 0x4b9   :  { %310 = vadd.xlane.f32.xlu0 %v309_v2 }
 0x531   :  { %v290_v5 = vpop.xlane.xlu1 %289 }
 0x532   :  { %v291_v6 = vsub.f32 %v287_v3, %v290_v5  ;;  %v420_v3 = vld [vmem:[#allocation0 + $0xc] ss:$0 sm:$0xff] }
 0x534   :  { %576 = vrsqrt.f32 %v291_v6 }
 0x541   :  { %v658_v9 = vpop.eup %576 }
 0x542   :  { %v311_v7 = vpop.xlane.xlu0 %310 }
 0x543   :  { %v312_v8 = vsub.f32 %v616_v16, %v311_v7 }
 0x545   :  { %v313_v10 = vmul.f32 %v658_v9, %v312_v8 }
 0x547   :  { %v314_v11 = vsel %vm283_vm4, %v313_v10, 0.0  ;;  %vm491_vm4 = vcmask 130168  }
 0x548   :  { %v315_v12 = vadd.f32 %v314_v11, %v280_v1 }
 0x54a   :  { %317 = vst [vmem:[#allocation1 + $0x8] sm:$0xff] %v315_v12 }
 0x551   :  { %v320_v13 = vld [vmem:[#allocation1 + $0x8] ss:$0 sm:$0xff] }
 0x552   :  { %v332_v14 = vmul.f32 %v320_v13, %v315_v12  ;;  %v323_v15 = vmul.f32 %v320_v13, %v320_v13 }
 0x554   :  { %333 = vadd.xlane.f32.xlu0 %v332_v14  ;;  %324 = vadd.xlane.f32.xlu1 %v323_v15 }
 0x5dd   :  { %v325_v18 = vpop.xlane.xlu1 %324  ;;  %v334_v20 = vpop.xlane.xlu0 %333 }
 0x5de   :  { %v326_v19 = vsub.f32 %v322_v17, %v325_v18  ;;  %v335_v21 = vsub.f32 %v616_v16, %v334_v20  ;;  %v445_v18 = vld [vmem:[#allocation0 + $0xd] ss:$0 sm:$0xff] }
 0x5e0   :  { %578 = vrsqrt.f32 %v326_v19 }
 0x5ed   :  { %v579_v22 = vpop.eup %578 }
 0x5ee   :  { %v336_v23 = vmul.f32 %v579_v22, %v335_v21 }
 0x5f0   :  { %v337_v24 = vsel %vm318_vm6, %v336_v23, 0.0  ;;  %vm486_vm6 = vmand %vm466_vm3, %vm265_vm1 }
 0x5f1   :  { %v338_v25 = vadd.f32 %v337_v24, %v315_v12  ;;  %vm511_vm1 = vmand %vm491_vm4, %vm300_vm0 }
 0x5f3   :  { %340 = vst [vmem:[#allocation1 + $0x8] sm:$0xff] %v338_v25 }
 0x5fa   :  { %v343_v26 = vld [vmem:[#allocation1 + $0x9] ss:$0 sm:$0xff] }
 0x5fb   :  { %v355_v27 = vmul.f32 %v343_v26, %v338_v25  ;;  %v346_v28 = vmul.f32 %v343_v26, %v343_v26 }
 0x5fd   :  { %356 = vadd.xlane.f32.xlu0 %v355_v27  ;;  %347 = vadd.xlane.f32.xlu1 %v346_v28 }
 0x686   :  { %v348_v30 = vpop.xlane.xlu1 %347  ;;  %v357_v32 = vpop.xlane.xlu0 %356 }
 0x687   :  { %v349_v31 = vsub.f32 %v345_v29, %v348_v30  ;;  %v358_v33 = vsub.f32 %v616_v16, %v357_v32  ;;  %v295_v30 = vmul.f32 %v651_v59, %v648_v58 }
 0x689   :  { %580 = vrsqrt.f32 %v349_v31  ;;  %v470_v31 = vld [vmem:[#allocation0 + $0xe] ss:$0 sm:$0xff] }
 0x696   :  { %v581_v34 = vpop.eup %580 }
 0x697   :  { %v359_v35 = vmul.f32 %v581_v34, %v358_v33 }
 0x699   :  { %v362_v36 = vsel %vm361_vm9, %v359_v35, 0.0 }
 0x69a   :  { %v363_v37 = vadd.f32 %v362_v36, %v338_v25 }
 0x69c   :  { %365 = vst [vmem:[#allocation1 + $0x8] sm:$0xff] %v363_v37 }
 0x6a3   :  { %v368_v38 = vld [vmem:[#allocation1 + $0xa] ss:$0 sm:$0xff] }
 0x6a4   :  { %v380_v39 = vmul.f32 %v368_v38, %v363_v37  ;;  %v371_v40 = vmul.f32 %v368_v38, %v368_v38 }
 0x6a6   :  { %381 = vadd.xlane.f32.xlu0 %v380_v39  ;;  %372 = vadd.xlane.f32.xlu1 %v371_v40 }
 0x72f   :  { %v373_v42 = vpop.xlane.xlu1 %372  ;;  %v382_v44 = vpop.xlane.xlu0 %381 }
 0x730   :  { %v374_v43 = vsub.f32 %v370_v41, %v373_v42  ;;  %v383_v45 = vsub.f32 %v616_v16, %v382_v44 }
 0x732   :  { %582 = vrsqrt.f32 %v374_v43 }
 0x73f   :  { %v583_v46 = vpop.eup %582 }
 0x740   :  { %v384_v47 = vmul.f32 %v583_v46, %v383_v45 }
 0x742   :  { %v387_v48 = vsel %vm386_vm2, %v384_v47, 0.0 }
 0x743   :  { %v388_v49 = vadd.f32 %v387_v48, %v363_v37 }
 0x745   :  { %390 = vst [vmem:[#allocation1 + $0x8] sm:$0xff] %v388_v49 }
 0x74c   :  { %v393_v50 = vld [vmem:[#allocation1 + $0xb] ss:$0 sm:$0xff] }
 0x74d   :  { %v405_v51 = vmul.f32 %v393_v50, %v388_v49  ;;  %v396_v52 = vmul.f32 %v393_v50, %v393_v50 }
 0x74f   :  { %406 = vadd.xlane.f32.xlu0 %v405_v51  ;;  %397 = vadd.xlane.f32.xlu1 %v396_v52 }
 0x7d8   :  { %v398_v54 = vpop.xlane.xlu1 %397  ;;  %v407_v56 = vpop.xlane.xlu0 %406 }
 0x7d9   :  { %v399_v55 = vsub.f32 %v395_v53, %v398_v54  ;;  %v408_v57 = vsub.f32 %v616_v16, %v407_v56 }
 0x7db   :  { %584 = vrsqrt.f32 %v399_v55 }
 0x7e8   :  { %v585_v60 = vpop.eup %584 }
 0x7e9   :  { %v409_v61 = vmul.f32 %v585_v60, %v408_v57 }
 0x7eb   :  { %v412_v62 = vsel %vm411_vm5, %v409_v61, 0.0 }
 0x7ec   :  { %v413_v63 = vadd.f32 %v412_v62, %v388_v49 }
 0x7ee   :  { %415 = vst [vmem:[#allocation1 + $0x8] sm:$0xff] %v413_v63 }
 0x7f5   :  { %v418_v0 = vld [vmem:[#allocation1 + $0xc] ss:$0 sm:$0xff] }
 0x7f6   :  { %v430_v1 = vmul.f32 %v418_v0, %v413_v63  ;;  %v421_v2 = vmul.f32 %v418_v0, %v418_v0 }
 0x7f8   :  { %431 = vadd.xlane.f32.xlu0 %v430_v1  ;;  %422 = vadd.xlane.f32.xlu1 %v421_v2 }
 0x881   :  { %v423_v5 = vpop.xlane.xlu1 %422  ;;  %v432_v7 = vpop.xlane.xlu0 %431 }
 0x882   :  { %v424_v6 = vsub.f32 %v420_v3, %v423_v5  ;;  %v433_v8 = vsub.f32 %v616_v16, %v432_v7 }
 0x884   :  { %586 = vrsqrt.f32 %v424_v6 }
 0x891   :  { %v587_v10 = vpop.eup %586 }
 0x892   :  { %v434_v11 = vmul.f32 %v587_v10, %v433_v8 }
 0x894   :  { %v437_v12 = vsel %vm436_vm8, %v434_v11, 0.0 }
 0x895   :  { %v438_v13 = vadd.f32 %v437_v12, %v413_v63 }
 0x897   :  { %440 = vst [vmem:[#allocation1 + $0x8] sm:$0xff] %v438_v13 }
 0x89e   :  { %v443_v14 = vld [vmem:[#allocation1 + $0xd] ss:$0 sm:$0xff] }
 0x89f   :  { %v455_v15 = vmul.f32 %v443_v14, %v438_v13  ;;  %v446_v17 = vmul.f32 %v443_v14, %v443_v14 }
 0x8a1   :  { %456 = vadd.xlane.f32.xlu0 %v455_v15  ;;  %447 = vadd.xlane.f32.xlu1 %v446_v17 }
 0x92a   :  { %v448_v19 = vpop.xlane.xlu1 %447  ;;  %v457_v21 = vpop.xlane.xlu0 %456 }
 0x92b   :  { %v449_v20 = vsub.f32 %v445_v18, %v448_v19  ;;  %v458_v22 = vsub.f32 %v616_v16, %v457_v21 }
 0x92d   :  { %588 = vrsqrt.f32 %v449_v20 }
 0x93a   :  { %v589_v23 = vpop.eup %588 }
 0x93b   :  { %v459_v24 = vmul.f32 %v589_v23, %v458_v22 }
 0x93d   :  { %v462_v25 = vsel %vm461_vm11, %v459_v24, 0.0 }
 0x93e   :  { %v463_v26 = vadd.f32 %v462_v25, %v438_v13 }
 0x940   :  { %465 = vst [vmem:[#allocation1 + $0x8] sm:$0xff] %v463_v26 }
 0x947   :  { %v468_v27 = vld [vmem:[#allocation1 + $0xe] ss:$0 sm:$0xff] }
 0x948   :  { %v480_v28 = vmul.f32 %v468_v27, %v463_v26  ;;  %v471_v29 = vmul.f32 %v468_v27, %v468_v27 }
 0x94a   :  { %481 = vadd.xlane.f32.xlu0 %v480_v28  ;;  %472 = vadd.xlane.f32.xlu1 %v471_v29 }
 0x94e   :  { %296 = vadd.xlane.f32.xlu0 %v295_v30 }
 0x9d3   :  { %v482_v32 = vpop.xlane.xlu0 %481  ;;  %v473_v33 = vpop.xlane.xlu1 %472 }
 0x9d4   :  { %v474_v34 = vsub.f32 %v470_v31, %v473_v33  ;;  %v483_v59 = vsub.f32 %v616_v16, %v482_v32 }
 0x9d6   :  { %590 = vrsqrt.f32 %v474_v34 }
 0x9d7   :  { %v297_v35 = vpop.xlane.xlu0 %296 }
 0x9d8   :  { %v298_v36 = vsub.f32 %v608_v4, %v297_v35 }
 0x9da   :  { %v299_v37 = vmul.f32 %v658_v9, %v298_v36 }
 0x9dc   :  { %v302_v38 = vsel %vm301_vm14, %v299_v37, 0.0 }
 0x9dd   :  { %v303_v39 = vadd.f32 %v302_v38, %v648_v58  ;;  %v495_v58 = vld [vmem:[#allocation0 + $0xf] ss:$0 sm:$0xff] }
 0x9df   :  { %304 = vst [vmem:[#allocation1] sm:$0xff] %v303_v39  ;;  %547 = vst [vmem:[%s691_s1] sm:$0xff] %v303_v39 }
 0x9e3   :  { %v591_v40 = vpop.eup %590 }
 0x9e4   :  { %v484_v4 = vmul.f32 %v591_v40, %v483_v59 }
 0x9e6   :  { %v487_v41 = vsel %vm486_vm6, %v484_v4, 0.0 }
 0x9e7   :  { %v488_v42 = vadd.f32 %v487_v41, %v463_v26 }
 0x9e9   :  { %490 = vst [vmem:[#allocation1 + $0x8] sm:$0xff] %v488_v42 }
 0x9f0   :  { %v493_v43 = vld [vmem:[#allocation1 + $0xf] ss:$0 sm:$0xff] }
 0x9f1   :  { %v496_v9 = vmul.f32 %v493_v43, %v493_v43  ;;  %v505_v44 = vmul.f32 %v493_v43, %v488_v42 }
 0x9f3   :  { %497 = vadd.xlane.f32.xlu1 %v496_v9 }
 0x9f7   :  { %506 = vadd.xlane.f32.xlu1 %v505_v44 }
 0xa7c   :  { %v498_v45 = vpop.xlane.xlu1 %497 }
 0xa7d   :  { %v499_v46 = vsub.f32 %v495_v58, %v498_v45 }
 0xa7f   :  { %592 = vrsqrt.f32 %v499_v46 }
 0xa80   :  { %v507_v47 = vpop.xlane.xlu1 %506 }
 0xa81   :  { %v508_v48 = vsub.f32 %v616_v16, %v507_v47 }
 0xa8c   :  { %v593_v49 = vpop.eup %592 }
 0xa8d   :  { %v509_v50 = vmul.f32 %v593_v49, %v508_v48 }
 0xa8f   :  { %v512_v51 = vsel %vm511_vm1, %v509_v50, 0.0 }
 0xa90   :  { %v513_v52 = vadd.f32 %v512_v51, %v488_v42 }
 0xa92   :  { %515 = vst [vmem:[#allocation1 + $0x8] sm:$0xff] %v513_v52  ;;  %549 = vst [vmem:[%s691_s1 + $0x8] sm:$0xff] %v513_v52 }

// kernel: custom-call.31
= control target key start
LH: loop header
LB: loop body
LE: loop exit
PB: predicated region body
PF: predicated region fallthrough
CT: control target
= control target key end

     0   :  { %v39_v0 = vlaneseq  ;;  %v334_v9 = vmov -1.0   ;;  %v335_v53 = vmov 0.0   ;;  %s403_s0 = inlined_call_operand.vmem [shape: f32[1,16,16], index: 0, kind: input, shape index: {}]   ;;  %s404_s1 = inlined_call_operand.vmem [shape: f32[1,16,16], index: 1, kind: output, shape index: {}]  }
   0x1   :  { %v32_v1 = vld [vmem:[%s403_s0] sm:$0xff]  ;;  %v34_v36 = vld [vmem:[%s403_s0 + $0x8] sm:$0xff] }
   0x2   :  { %v349_v2 = vand.u32 127, %v39_v0  ;;  %v43_v3 = vshrl.u32 %v39_v0, 7 }
   0x4   :  { %vm45_vm0 = vcmp.eq.s32.totalorder %v43_v3, %v349_v2  ;;  %vm41_vm1 = vcmp.lt.s32.totalorder %v349_v2, 16  ;;  %vm50_vm2 = vcmp.ge.s32.totalorder %v43_v3, %v349_v2  ;;  %vm80_vm4 = vcmp.eq.s32.totalorder %v349_v2, 0 }
   0x5   :  { %v47_v4 = vsel %vm45_vm0, %v32_v1, 0.0  ;;  %vm51_vm3 = vmand %vm50_vm2, %vm41_vm1  ;;  %vm77_vm5 = vcmp.eq.s32.totalorder %v349_v2, %v43_v3  ;;  %v81_v10 = vsel %vm80_vm4, 1.0, %v334_v9  ;;  %vm95_vm6 = vcmp.eq.s32.totalorder %v349_v2, 1 }
   0x6   :  { %48 = vadd.xlane.f32.xlu0 %v47_v4  ;;  %v52_v6 = vsel %vm51_vm3, %v32_v1, 0.0  ;;  %v82_v11 = vsel %vm77_vm5, %v81_v10, 0.0  ;;  %vm105_vm7 = vcmp.eq.s32.totalorder %v349_v2, 2  ;;  %vm115_vm8 = vcmp.eq.s32.totalorder %v349_v2, 3 }
   0x7   :  { %vm125_vm9 = vcmp.eq.s32.totalorder %v349_v2, 4  ;;  %v60_v31 = vadd.s32 8, %v43_v3  ;;  %vm135_vm11 = vcmp.eq.s32.totalorder %v349_v2, 5  ;;  %vm145_vm14 = vcmp.eq.s32.totalorder %v349_v2, 6 }
   0x8   :  { %vm155_vm0 = vcmp.eq.s32.totalorder %v349_v2, 7  ;;  %vm179_vm2 = vcmp.eq.s32.totalorder %v349_v2, 9  ;;  %vm193_vm3 = vcmp.eq.s32.totalorder %v349_v2, 10  ;;  %vm207_vm4 = vcmp.eq.s32.totalorder %v349_v2, 11 }
   0x9   :  { %vm61_vm10 = vcmp.eq.s32.totalorder %v60_v31, %v349_v2  ;;  %vm66_vm12 = vcmp.ge.s32.totalorder %v60_v31, %v349_v2  ;;  %vm88_vm15 = vcmp.eq.s32.totalorder %v349_v2, %v60_v31  ;;  %vm221_vm5 = vcmp.eq.s32.totalorder %v349_v2, 12 }
   0xa   :  { %v63_v37 = vsel %vm61_vm10, %v34_v36, 0.0  ;;  %vm67_vm13 = vmand %vm66_vm12, %vm41_vm1  ;;  %v89_v54 = vsel %vm88_vm15, -1.0, %v335_v53  ;;  %vm165_vm1 = vcmp.eq.s32.totalorder %v349_v2, 8 }
   0xb   :  { %v68_v44 = vsel %vm67_vm13, %v34_v36, 0.0 }
  0x8f   :  { %v352_v5 = vpop.xlane.xlu0 %48 }
  0x90   :  { %330 = vrcp.f32 %v352_v5  ;;  %vm274_vm10 = vweird.f32 %v352_v5 }
  0x9d   :  { %v359_v7 = vpop.eup %330 }
  0x9e   :  { %v54_v8 = vmul.f32 %v359_v7, %v52_v6 }
  0xa0   :  { %55 = vst [vmem:[#allocation2] sm:$0xff] %v54_v8 }
  0xa7   :  { %v91_v12 = vld [vmem:[#allocation2 + $0x1] ss:$0 sm:$0xff]  ;;  %v101_v15 = vld [vmem:[#allocation2 + $0x2] ss:$0 sm:$0xff]  ;;  %v111_v20 = vld [vmem:[#allocation2 + $0x3] ss:$0 sm:$0xff] }
  0xa8   :  { %v92_v13 = vxor.u32 2147483648, %v91_v12  ;;  %v102_v17 = vxor.u32 2147483648, %v101_v15  ;;  %v112_v22 = vxor.u32 2147483648, %v111_v20  ;;  %v121_v25 = vld [vmem:[#allocation2 + $0x4] ss:$0 sm:$0xff] }
  0xa9   :  { %v122_v27 = vxor.u32 2147483648, %v121_v25  ;;  %v131_v30 = vld [vmem:[#allocation2 + $0x5] ss:$0 sm:$0xff]  ;;  %v141_v38 = vld [vmem:[#allocation2 + $0x6] ss:$0 sm:$0xff] }
  0xaa   :  { %v96_v14 = vmul.f32 %v92_v13, %v82_v11  ;;  %v132_v33 = vxor.u32 2147483648, %v131_v30  ;;  %v142_v40 = vxor.u32 2147483648, %v141_v38  ;;  %v151_v47 = vld [vmem:[#allocation2 + $0x7] ss:$0 sm:$0xff] }
  0xab   :  { %v152_v50 = vxor.u32 2147483648, %v151_v47 }
  0xac   :  { %97 = vadd.xlane.f32.xlu0 %v96_v14 }
 0x135   :  { %v98_v16 = vpop.xlane.xlu0 %97 }
 0x136   :  { %v99_v18 = vsel %vm95_vm6, %v98_v16, %v82_v11  ;;  %vm235_vm6 = vcmp.eq.s32.totalorder %v349_v2, 13 }
 0x137   :  { %v106_v19 = vmul.f32 %v102_v17, %v99_v18 }
 0x139   :  { %107 = vadd.xlane.f32.xlu1 %v106_v19 }
 0x1c2   :  { %v108_v21 = vpop.xlane.xlu1 %107 }
 0x1c3   :  { %v109_v23 = vsel %vm105_vm7, %v108_v21, %v99_v18  ;;  %vm249_vm7 = vcmp.eq.s32.totalorder %v349_v2, 14 }
 0x1c4   :  { %v116_v24 = vmul.f32 %v112_v22, %v109_v23 }
 0x1c6   :  { %117 = vadd.xlane.f32.xlu1 %v116_v24 }
 0x24f   :  { %v118_v26 = vpop.xlane.xlu1 %117 }
 0x250   :  { %v119_v28 = vsel %vm115_vm8, %v118_v26, %v109_v23  ;;  %vm263_vm8 = vcmp.eq.s32.totalorder %v349_v2, 15 }
 0x251   :  { %v126_v29 = vmul.f32 %v122_v27, %v119_v28 }
 0x253   :  { %127 = vadd.xlane.f32.xlu0 %v126_v29 }
 0x2dc   :  { %v128_v32 = vpop.xlane.xlu0 %127 }
 0x2dd   :  { %v129_v34 = vsel %vm125_vm9, %v128_v32, %v119_v28 }
 0x2de   :  { %v136_v35 = vmul.f32 %v132_v33, %v129_v34 }
 0x2e0   :  { %137 = vadd.xlane.f32.xlu1 %v136_v35 }
 0x2e4   :  { %64 = vadd.xlane.f32.xlu1 %v63_v37 }
 0x369   :  { %v138_v39 = vpop.xlane.xlu1 %137 }
 0x36a   :  { %v139_v41 = vsel %vm135_vm11, %v138_v39, %v129_v34 }
 0x36b   :  { %v146_v42 = vmul.f32 %v142_v40, %v139_v41 }
 0x36d   :  { %147 = vadd.xlane.f32.xlu0 %v146_v42  ;;  %v373_v43 = vpop.xlane.xlu1 %64 }
 0x36e   :  { %332 = vrcp.f32 %v373_v43  ;;  %vm279_vm9 = vweird.f32 %v373_v43 }
 0x37b   :  { %v379_v45 = vpop.eup %332 }
 0x37c   :  { %v70_v46 = vmul.f32 %v379_v45, %v68_v44 }
 0x37e   :  { %71 = vst [vmem:[#allocation2 + $0x8] sm:$0xff] %v70_v46 }
 0x385   :  { %v161_v48 = vld [vmem:[#allocation2 + $0x8] ss:$0 sm:$0xff]  ;;  %v175_v59 = vld [vmem:[#allocation2 + $0x9] ss:$0 sm:$0xff]  ;;  %v189_v4 = vld [vmem:[#allocation2 + $0xa] ss:$0 sm:$0xff] }
 0x386   :  { %v162_v51 = vxor.u32 2147483648, %v161_v48  ;;  %v176_v62 = vxor.u32 2147483648, %v175_v59  ;;  %v190_v9 = vxor.u32 2147483648, %v189_v4  ;;  %v203_v14 = vld [vmem:[#allocation2 + $0xb] ss:$0 sm:$0xff] }
 0x387   :  { %v204_v17 = vxor.u32 2147483648, %v203_v14  ;;  %v217_v22 = vld [vmem:[#allocation2 + $0xc] ss:$0 sm:$0xff]  ;;  %v231_v30 = vld [vmem:[#allocation2 + $0xd] ss:$0 sm:$0xff] }
 0x388   :  { %v170_v56 = vmul.f32 %v162_v51, %v89_v54  ;;  %v218_v25 = vxor.u32 2147483648, %v217_v22  ;;  %v232_v33 = vxor.u32 2147483648, %v231_v30  ;;  %v245_v38 = vld [vmem:[#allocation2 + $0xe] ss:$0 sm:$0xff]  ;;  %v259_v48 = vld [vmem:[#allocation2 + $0xf] ss:$0 sm:$0xff] }
 0x3f6   :  { %v148_v49 = vpop.xlane.xlu0 %147 }
 0x3f7   :  { %v149_v52 = vsel %vm145_vm14, %v148_v49, %v139_v41  ;;  %v246_v41 = vxor.u32 2147483648, %v245_v38 }
 0x3f8   :  { %v156_v55 = vmul.f32 %v152_v50, %v149_v52 }
 0x3fa   :  { %157 = vadd.xlane.f32.xlu0 %v156_v55 }
 0x3fe   :  { %171 = vadd.xlane.f32.xlu0 %v170_v56 }
 0x483   :  { %v158_v57 = vpop.xlane.xlu0 %157 }
 0x484   :  { %v159_v58 = vsel %vm155_vm0, %v158_v57, %v149_v52 }
 0x485   :  { %v166_v60 = vmul.f32 %v162_v51, %v159_v58  ;;  %v260_v51 = vxor.u32 2147483648, %v259_v48 }
 0x487   :  { %v172_v61 = vpop.xlane.xlu0 %171  ;;  %167 = vadd.xlane.f32.xlu1 %v166_v60 }
 0x488   :  { %v173_v63 = vsel %vm165_vm1, %v172_v61, %v89_v54 }
 0x489   :  { %v184_v0 = vmul.f32 %v176_v62, %v173_v63 }
 0x48b   :  { %185 = vadd.xlane.f32.xlu0 %v184_v0 }
 0x510   :  { %v168_v1 = vpop.xlane.xlu1 %167 }
 0x511   :  { %v169_v3 = vsel %vm165_vm1, %v168_v1, %v159_v58 }
 0x512   :  { %v180_v6 = vmul.f32 %v176_v62, %v169_v3 }
 0x514   :  { %v186_v8 = vpop.xlane.xlu0 %185  ;;  %181 = vadd.xlane.f32.xlu1 %v180_v6 }
 0x515   :  { %v187_v10 = vsel %vm179_vm2, %v186_v8, %v173_v63 }
 0x516   :  { %v198_v11 = vmul.f32 %v190_v9, %v187_v10 }
 0x518   :  { %199 = vadd.xlane.f32.xlu0 %v198_v11 }
 0x59d   :  { %v182_v12 = vpop.xlane.xlu1 %181 }
 0x59e   :  { %v183_v13 = vsel %vm179_vm2, %v182_v12, %v169_v3 }
 0x59f   :  { %v194_v15 = vmul.f32 %v190_v9, %v183_v13 }
 0x5a1   :  { %v200_v16 = vpop.xlane.xlu0 %199  ;;  %195 = vadd.xlane.f32.xlu1 %v194_v15 }
 0x5a2   :  { %v201_v18 = vsel %vm193_vm3, %v200_v16, %v187_v10 }
 0x5a3   :  { %v212_v19 = vmul.f32 %v204_v17, %v201_v18 }
 0x5a5   :  { %213 = vadd.xlane.f32.xlu0 %v212_v19 }
 0x62a   :  { %v196_v20 = vpop.xlane.xlu1 %195 }
 0x62b   :  { %v197_v21 = vsel %vm193_vm3, %v196_v20, %v183_v13 }
 0x62c   :  { %v208_v23 = vmul.f32 %v204_v17, %v197_v21 }
 0x62e   :  { %v214_v24 = vpop.xlane.xlu0 %213  ;;  %209 = vadd.xlane.f32.xlu1 %v208_v23 }
 0x62f   :  { %v215_v26 = vsel %vm207_vm4, %v214_v24, %v201_v18 }
 0x630   :  { %v226_v27 = vmul.f32 %v218_v25, %v215_v26 }
 0x632   :  { %227 = vadd.xlane.f32.xlu0 %v226_v27 }
 0x6b7   :  { %v210_v28 = vpop.xlane.xlu1 %209 }
 0x6b8   :  { %v211_v29 = vsel %vm207_vm4, %v210_v28, %v197_v21 }
 0x6b9   :  { %v222_v31 = vmul.f32 %v218_v25, %v211_v29 }
 0x6bb   :  { %v228_v32 = vpop.xlane.xlu0 %227  ;;  %223 = vadd.xlane.f32.xlu1 %v222_v31 }
 0x6bc   :  { %v229_v34 = vsel %vm221_vm5, %v228_v32, %v215_v26 }
 0x6bd   :  { %v240_v35 = vmul.f32 %v232_v33, %v229_v34 }
 0x6bf   :  { %241 = vadd.xlane.f32.xlu0 %v240_v35 }
 0x744   :  { %v224_v36 = vpop.xlane.xlu1 %223 }
 0x745   :  { %v225_v37 = vsel %vm221_vm5, %v224_v36, %v211_v29 }
 0x746   :  { %v236_v39 = vmul.f32 %v232_v33, %v225_v37 }
 0x748   :  { %v242_v40 = vpop.xlane.xlu0 %241  ;;  %237 = vadd.xlane.f32.xlu1 %v236_v39 }
 0x749   :  { %v243_v42 = vsel %vm235_vm6, %v242_v40, %v229_v34 }
 0x74a   :  { %v254_v44 = vmul.f32 %v246_v41, %v243_v42 }
 0x74c   :  { %255 = vadd.xlane.f32.xlu0 %v254_v44 }
 0x7d1   :  { %v238_v46 = vpop.xlane.xlu1 %237 }
 0x7d2   :  { %v239_v47 = vsel %vm235_vm6, %v238_v46, %v225_v37 }
 0x7d3   :  { %v250_v49 = vmul.f32 %v246_v41, %v239_v47 }
 0x7d5   :  { %v256_v50 = vpop.xlane.xlu0 %255  ;;  %251 = vadd.xlane.f32.xlu1 %v250_v49 }
 0x7d6   :  { %v257_v52 = vsel %vm249_vm7, %v256_v50, %v243_v42 }
 0x7d7   :  { %v268_v53 = vmul.f32 %v260_v51, %v257_v52 }
 0x7d9   :  { %269 = vadd.xlane.f32.xlu0 %v268_v53 }
 0x85e   :  { %v252_v54 = vpop.xlane.xlu1 %251 }
 0x85f   :  { %v253_v55 = vsel %vm249_vm7, %v252_v54, %v239_v47 }
 0x860   :  { %v264_v56 = vmul.f32 %v260_v51, %v253_v55 }
 0x862   :  { %v270_v57 = vpop.xlane.xlu0 %269  ;;  %265 = vadd.xlane.f32.xlu1 %v264_v56 }
 0x863   :  { %v271_v58 = vsel %vm263_vm8, %v270_v57, %v257_v52 }
 0x864   :  { %v278_v59 = vmul.f32 %v379_v45, %v271_v58 }
 0x866   :  { %v280_v60 = vsel %vm279_vm9, %v271_v58, %v278_v59 }
 0x867   :  { %316 = vst [vmem:[%s404_s1 + $0x8] sm:$0xff] %v280_v60 }
 0x8eb   :  { %v266_v61 = vpop.xlane.xlu1 %265 }
 0x8ec   :  { %v267_v62 = vsel %vm263_vm8, %v266_v61, %v253_v55 }
 0x8ed   :  { %v273_v63 = vmul.f32 %v359_v7, %v267_v62 }
 0x8ef   :  { %v275_v2 = vsel %vm274_vm10, %v267_v62, %v273_v63 }
 0x8f0   :  { %314 = vst [vmem:[%s404_s1] sm:$0xff] %v275_v2 }

// kernel: federated_causal_net_forward.4
= control target key start
LH: loop header
LB: loop body
LE: loop exit
PB: predicated region body
PF: predicated region fallthrough
CT: control target
= control target key end

     0   :  { %11 = vsyncpa [#allocation3], 0  ;;  %s1518_s0 = inlined_call_operand.vmem [shape: f32[16], index: 0, kind: input, shape index: {}]   ;;  %s1519_s1 = inlined_call_operand.vmem [shape: f32[4,28], index: 1, kind: input, shape index: {}]   ;;  %s1520_s2 = inlined_call_operand.vmem [shape: f32[16,8], index: 2, kind: input, shape index: {}]   ;;  %s1521_s3 = inlined_call_operand.vmem [shape: f32[120,32], index: 3, kind: input, shape index: {}]   ;;  %s1522_s4 = inlined_call_operand.vmem [shape: f32[16,16], index: 4, kind: output, shape index: {0}]   ;;  %s1523_s5 = inlined_call_operand.vmem [shape: f32[4,10], index: 5, kind: output, shape index: {1}]  }
   0x1   :  { %s18_s20 = sshll.u32 %s1518_s0, 4  ;;  %s19_s20 = int_to_ptr.vmem [resolvable:$true] %s18_s20 }
   0x2   :  { %s1252_s21 = scalar_lea.vmem %s19_s20, 16  ;;  %p1257_p1 = scmp.lt.s32.totalorder %s19_s20, %s19_s20 }
   0x3   :  { %p1253_p0 = scmp.ne.s32.totalorder %s19_s20, %s1252_s21  ;;  %p1258_p2 = scmp.lt.s32.totalorder %s1252_s21, %s1252_s21 }
   0x5   :  { %p1259_p3 = por %p1258_p2, %p1257_p1 }
   0x7   :  { %p1260_p4 = pnand %p1259_p3, %p1253_p0 }
   0x9   :  { %1263 = shalt.err (!%p1260_p4)
}
   0xa   :  { %s1266_s22 = smov [#allocation2]  }
   0xb   :  { %21 = dma.vmem_to_smem %s19_s20, 16, %s1266_s22, [#allocation3]  }
   0xc   :  { %1264 = dma.done.wait [#allocation3], 16  }
   0xd   :  { %1265 = vsyncadd [#allocation3], 4294967280 }
   0xe   :  { %31 = sfence }
   0xf   :  { %v41_v0 = vld [vmem:[%s1519_s1] sm:$0xf]  ;;  %s1267_s25 = smov 124   ;;  %s1086_s0 = sld [smem:[#allocation2 + $0x2]]  ;;  %v1268_v1 = vmov 0.0   ;;  %v58_v2 = vld [vmem:[%s1521_s3 + $0x18] sm:$0xff] }
  0x10   :  { %43 = vrot.lane.b32.xlu0 %v41_v0, %s1267_s25  ;;  %1150 = vmatprep.subr.mxu0 %v1268_v1  ;;  %v57_v3 = vld [vmem:[%s1521_s3 + $0x10] sm:$0xff]  ;;  %v56_v4 = vld [vmem:[%s1521_s3 + $0x8] sm:$0xff]  ;;  %vm1269_vm0 = vmmov 0   ;;  %s1270_s6 = smov 16   ;;  %v55_v5 = vld [vmem:[%s1521_s3] sm:$0xff]  ;;  %s1271_s11 = smov 116  }
  0x11   :  { %1151 = vmatpush3.msra.mxu0 %v58_v2  ;;  %1161 = vmatprep.subr.mxu1 %v1268_v1  ;;  %v1334_v6 = vld [vmem:[%s1520_s2 + $0x8] sm:$0xff]  ;;  %s1342_s12 = sld [smem:[#allocation2 + $0x1]]  ;;  %vm49_vm1 = vcmask 64512   ;;  %vm51_vm2 = vcmask 195584   ;;  %vm53_vm3 = vcmask 228352   ;;  %vm64_vm4 = vcmask 261120  }
  0x12   :  { %1152 = vmatprep.subr.mxu0 %v1268_v1  ;;  %1158 = vmatprep.mubr.msk.f32.mxu0 %vm1269_vm0, %v1268_v1  ;;  %s32_s13 = sld [smem:[#allocation2]]  ;;  %vm569_vm5 = vcmask 125952   ;;  %vm678_vm6 = vcmask 31744   ;;  %vm380_vm7 = vcmask 257024   ;;  %v142_v26 = vld [vmem:[%s1521_s3 + $0x40] sm:$0xff]  ;;  %v141_v27 = vld [vmem:[%s1521_s3 + $0x38] sm:$0xff]  ;;  %v1033_v53 = vmul.f32 %v1334_v6, %v1334_v6 }
  0x13   :  { %1153 = vmatpush3.msra.mxu0 %v57_v3  ;;  %1169 = vmatprep.mubr.msk.f32.mxu1 %vm1269_vm0, %v1268_v1  ;;  %v140_v28 = vld [vmem:[%s1521_s3 + $0x30] sm:$0xff]  ;;  %v139_v29 = vld [vmem:[%s1521_s3 + $0x28] sm:$0xff]  ;;  %v1376_v30 = vld [vmem:[%s1520_s2] sm:$0xff]  ;;  %vm491_vm8 = vcmask 130048   ;;  %v1272_v37 = vmov 1.0   ;;  %s1436_s7 = sld [smem:[#allocation2 + $0x5]]  ;;  %v460_v3 = vlaneseq }
  0x14   :  { %46 = vrot.lane.b32.xlu0 %v41_v0, %s1270_s6  ;;  %1154 = vmatprep.subr.mxu0 %v1268_v1  ;;  %v225_v31 = vld [vmem:[%s1521_s3 + $0x68] sm:$0xff]  ;;  %v1093_v32 = vld [vmem:[%s1521_s3 + $0x20] ss:$0 sm:$0xff]  ;;  %v223_v39 = vld [vmem:[%s1521_s3 + $0x58] sm:$0xff]  ;;  %s1434_s6 = sld [smem:[#allocation2 + $0x3]]  ;;  %v1273_v44 = vmov 4   ;;  %v1032_v52 = vmul.f32 %v1376_v30, %v1376_v30 }
  0x15   :  { %1155 = vmatpush3.msra.mxu0 %v56_v4  ;;  %v486_v7 = vstv %s1086_s0  ;;  %1162 = vmatpush3.msra.mxu1 %v142_v26  ;;  %v224_v38 = vld [vmem:[%s1521_s3 + $0x60] sm:$0xff]  ;;  %v222_v40 = vld [vmem:[%s1521_s3 + $0x50] sm:$0xff]  ;;  %s1091_s9 = sld [smem:[#allocation2 + $0x7]]  ;;  %v1025_v50 = vsub.f32 1.0, %v1376_v30  ;;  %v1026_v51 = vsub.f32 1.0, %v1334_v6  ;;  %vm900_vm9 = vcmask 7168  }
  0x16   :  { %1156 = vmatprep.subr.mxu0 %v1268_v1  ;;  %v487_v8 = vmul.f32 %v486_v7, %v41_v0  ;;  %1163 = vmatprep.subr.mxu1 %v1268_v1  ;;  %s1092_s10 = sld [smem:[#allocation2 + $0x8]]  ;;  %s1275_s16 = smov 8  }
  0x17   :  { %1157 = vmatpush3.msra.mxu0 %v55_v5  ;;  %v675_v14 = vstv %s1342_s12  ;;  %1164 = vmatpush3.msra.mxu1 %v141_v27  ;;  %v1027_v55 = vmul.f32 %v1025_v50, %v1025_v50  ;;  %v1028_v56 = vmul.f32 %v1026_v51, %v1026_v51  ;;  %v1095_v5 = vld [vmem:[%s1521_s3 + $0x48] ss:$0 sm:$0xff]  ;;  %s1090_s17 = sld [smem:[#allocation2 + $0x6]] }
  0x18   :  { %898 = vrot.lane.b32.xlu0 %v1334_v6, %s1267_s25  ;;  %1172 = vmatprep.subr.mxu0 %v1268_v1  ;;  %v564_v9 = vmul.f32 %v487_v8, %v487_v8  ;;  %v1350_v16 = vmul.f32 %v675_v14, %v1334_v6  ;;  %v304_v18 = vstv %s32_s13  ;;  %v676_v41 = vmul.f32 %v675_v14, %v1376_v30  ;;  %s1274_s13 = smov 4  }
  0x19   :  { %489 = vrot.lane.b32.xlu1 %v487_v8, %s1271_s11  ;;  %1165 = vmatprep.subr.mxu1 %v1268_v1  ;;  %v1455_v8 = vshrl.u32 %v460_v3, 7 }
  0x1a   :  { %v761_v19 = vmul.f32 %v1350_v16, %v1350_v16  ;;  %1166 = vmatpush3.msra.mxu1 %v140_v28  ;;  %v760_v42 = vmul.f32 %v676_v41, %v676_v41  ;;  %s977_s8 = ssub.f32 %s1436_s7, %s1434_s6  ;;  %1234 = vset.pattern.permute.xlu1 %v1273_v44  ;;  %v981_v47 = vstv %s1434_s6 }
  0x1b   :  { %1167 = vmatprep.subr.mxu1 %v1268_v1  ;;  %1235 = vset.pattern.permute.xlu0 %v1273_v44  ;;  %v1029_v57 = vstv %s1091_s9 }
  0x1c   :  { %v765_v23 = vsel %vm678_vm6, %v761_v19, 0.0  ;;  %1168 = vmatpush3.msra.mxu1 %v139_v29  ;;  %v762_v43 = vsel %vm678_vm6, %v760_v42, 0.0  ;;  %v978_v45 = vstv %s977_s8  ;;  %v1030_v58 = vmul.f32 %v1029_v57, %v1027_v55 }
  0x1d   :  { %566 = vrot.lane.b32.xlu1 %v564_v9, %s1271_s11  ;;  %1183 = vmatprep.subr.mxu1 %v1268_v1  ;;  %v979_v46 = vmul.f32 %v978_v45, %v1376_v30  ;;  %v980_v49 = vmul.f32 %v978_v45, %v1334_v6  ;;  %v1034_v59 = vstv %s1092_s10  ;;  %v1031_v61 = vmul.f32 %v1029_v57, %v1028_v56  ;;  %s1017_s19 = sadd.f32 %s1090_s17, %s1434_s6 }
  0x1e   :  { %v1035_v60 = vmul.f32 %v1034_v59, %v1032_v52  ;;  %v1036_v62 = vmul.f32 %v1034_v59, %v1033_v53 }
  0x1f   :  { %v982_v48 = vadd.f32 %v981_v47, %v979_v46  ;;  %v983_v54 = vadd.f32 %v981_v47, %v980_v49 }
  0x20   :  { %v1037_v63 = vadd.f32 %v1035_v60, %v1030_v58 }
  0x21   :  { %896 = vrot.lane.b32.xlu1 %v1376_v30, %s1267_s25 }
  0x45   :  { %763 = vadd.xlane.f32.xlu1 %v762_v43 }
  0x56   :  { %1004 = vperm.xlu1 %1234, %v1376_v30  }
  0x5a   :  { %989 = vperm.xlu1 %1234, %v982_v48   ;;  %v1097_v48 = vld [vmem:[%s1521_s3 + $0x70] ss:$0 sm:$0xff]  ;;  %s1088_s3 = sld [smem:[#allocation2 + $0x4]] }
  0x5e   :  { %994 = vperm.xlu1 %1234, %v983_v54  }
  0x60   :  { %s984_s18 = ssub.f32 %s1088_s3, %s1434_s6 }
  0x61   :  { %s1018_s20 = ssub.f32 %s1017_s19, %s1088_s3 }
  0x62   :  { %1050 = vperm.xlu1 %1234, %v1037_v63  }
  0x63   :  { %s1019_s21 = ssub.f32 %s1018_s20, %s1436_s7 }
  0x82   :  { %v44_v10 = vpop.permute.xlu0 %43 }
  0x83   :  { %v50_v11 = vsel %vm49_vm1, %v41_v0, %v44_v10  ;;  %v1038_v0 = vadd.f32 %v1036_v62, %v1031_v61 }
  0x85   :  { %1055 = vperm.xlu1 %1234, %v1038_v0  }
  0x86   :  { %v47_v12 = vpop.permute.xlu0 %46 }
  0x87   :  { %v52_v13 = vsel %vm51_vm2, %v50_v11, %v47_v12 }
  0x88   :  { %v54_v15 = vsel %vm53_vm3, %v52_v13, 0.0  ;;  %v1461_v13 = vsub.s32 0, %v1455_v8 }
  0x89   :  { %1159 = vmatmul.mubr.msk.f32.vlgmr.msra.gmra.mxu0 %vm64_vm4, %v54_v15  ;;  %v305_v21 = vmul.f32 %v304_v18, %v54_v15 }
  0x8a   :  { %1180 = vmatprep.mubr.msk.f32.mxu0 %vm1269_vm0, %v1268_v1  ;;  %1173 = vmatpush3.msra.mxu0 %v225_v31  ;;  %v899_v2 = vpop.permute.xlu0 %898 }
  0x8b   :  { %v490_v17 = vpop.permute.xlu1 %489  ;;  %v379_v24 = vmul.f32 %v305_v21, %v305_v21  ;;  %1174 = vmatprep.subr.mxu0 %v1268_v1 }
  0x8c   :  { %1175 = vmatpush3.msra.mxu0 %v224_v38 }
  0x8d   :  { %v381_v25 = vsel %vm380_vm7, %v379_v24, 0.0  ;;  %1176 = vmatprep.subr.mxu0 %v1268_v1 }
  0x8e   :  { %1177 = vmatpush3.msra.mxu0 %v223_v39 }
  0x8f   :  { %v567_v20 = vpop.permute.xlu1 %566  ;;  %1178 = vmatprep.subr.mxu0 %v1268_v1 }
  0x90   :  { %v570_v22 = vsel %vm569_vm5, %v567_v20, 0.0  ;;  %1179 = vmatpush3.msra.mxu0 %v222_v40 }
  0x91   :  { %571 = vadd.xlane.f32.xlu0 %v570_v22  ;;  %1203 = vmatprep.subr.msk.mxu0 %vm678_vm6, %v1350_v16 }
  0x95   :  { %766 = vadd.xlane.f32.xlu0 %v765_v23 }
  0x99   :  { %382 = vadd.xlane.f32.xlu0 %v381_v25  ;;  %v897_v25 = vpop.permute.xlu1 %896 }
  0xaf   :  { %1008 = vperm.xlu0 %1235, %v1334_v6  }
  0xce   :  { %v764_v54 = vpop.xlane.xlu1 %763 }
 0x11a   :  { %v572_v4 = vpop.xlane.xlu0 %571 }
 0x11e   :  { %v1457_v11 = vpop.xlane.xlu0 %766 }
 0x122   :  { %v383_v18 = vpop.xlane.xlu0 %382 }
 0x149   :  { %v134_v33 = vpop.f32.mrf.mxu0 }
 0x14a   :  { %v135_v34 = vadd.f32 %v1093_v32, %v134_v33 }
 0x14b   :  { %v1160_v35 = vpop.f32.mrf.mxu0 }
 0x14c   :  { %v138_v36 = vmax.f32 %v135_v34, 0.0 }
 0x14e   :  { %1170 = vmatmul.mubr.msk.f32.vlgmr.msra.gmra.mxu1 %vm64_vm4, %v138_v36 }
 0x14f   :  { %1184 = vmatpush3.xpose.msk.msra.mxu1 %vm64_vm4, %v305_v21  ;;  %1185 = vmatprep.mubr.msk.f32.mxu1 %vm1269_vm0, %v1268_v1 }
 0x150   :  { %1188 = vmatprep.subr.mxu1 %v1268_v1 }
 0x152   :  { %1186 = vmatmul.mubr.msk.f32.vlgmr.msra.gmra.mxu1 %vm64_vm4, %v305_v21 }
 0x153   :  { %1189 = vmatpush3.xpose.msk.msra.mxu1 %vm64_vm4, %v379_v24  ;;  %1190 = vmatprep.mubr.msk.f32.mxu1 %vm1269_vm0, %v1268_v1 }
 0x154   :  { %1193 = vmatprep.subr.mxu1 %v1268_v1 }
 0x156   :  { %1191 = vmatmul.mubr.msk.f32.vlgmr.msra.gmra.mxu1 %vm64_vm4, %v1272_v37 }
 0x157   :  { %1194 = vmatpush3.xpose.msk.msra.mxu1 %vm491_vm8, %v490_v17  ;;  %1195 = vmatprep.mubr.msk.f32.mxu1 %vm1269_vm0, %v1268_v1 }
 0x158   :  { %1198 = vmatprep.subr.mxu1 %v1268_v1 }
 0x15a   :  { %1196 = vmatmul.mubr.msk.f32.vlgmr.msra.gmra.mxu1 %vm491_vm8, %v490_v17 }
 0x15b   :  { %1199 = vmatpush3.xpose.msk.msra.mxu1 %vm491_vm8, %v567_v20  ;;  %1200 = vmatprep.mubr.msk.f32.mxu1 %vm1269_vm0, %v1268_v1 }
 0x15c   :  { %1210 = vmatprep.subr.mxu1 %v1268_v1 }
 0x15e   :  { %1201 = vmatmul.mubr.msk.f32.vlgmr.msra.gmra.mxu1 %vm491_vm8, %v1272_v37 }
 0x15f   :  { %1211 = vmatpush3.xpose.msk.msra.mxu1 %vm678_vm6, %v761_v19  ;;  %1214 = vmatprep.mubr.msk.f32.mxu1 %vm1269_vm0, %v1268_v1 }
 0x160   :  { %1212 = vmatprep.subr.mxu1 %v1268_v1 }
 0x163   :  { %1213 = vmatpush3.xpose.msk.msra.mxu1 %vm678_vm6, %v760_v42 }
 0x166   :  { %1215 = vmatmul.mubr.msk.f32.vlgmr.msra.gmra.mxu1 %vm678_vm6, %v1272_v37 }
 0x20e   :  { %v217_v6 = vpop.f32.mrf.mxu1 }
 0x20f   :  { %v218_v7 = vadd.f32 %v1095_v5, %v217_v6 }
 0x210   :  { %v1171_v9 = vpop.f32.mrf.mxu1 }
 0x211   :  { %v221_v10 = vmax.f32 %v218_v7, 0.0 }
 0x212   :  { %v375_v12 = vpop.f32.mrf.mxu1 }
 0x213   :  { %1181 = vmatmul.mubr.msk.f32.vlgmr.msra.gmra.mxu0 %vm64_vm4, %v221_v10  ;;  %v1469_v20 = vmul.f32 2.0, %v375_v12 }
 0x214   :  { %v1187_v14 = vpop.f32.mrf.mxu1  ;;  %1204 = vmatpush3.xpose.msk.msra.mxu0 %vm678_vm6, %v1350_v16  ;;  %1207 = vmatprep.mubr.msk.f32.mxu0 %vm678_vm6, %v676_v41 }
 0x215   :  { %1205 = vmatprep.subr.msk.mxu0 %vm678_vm6, %v676_v41 }
 0x216   :  { %v456_v15 = vpop.f32.mrf.mxu1 }
 0x217   :  { %v463_v17 = vrot.slane %v456_v15, %v1461_v13 }
 0x218   :  { %v1192_v19 = vpop.f32.mrf.mxu1  ;;  %1206 = vmatpush3.xpose.msk.msra.mxu0 %vm678_vm6, %v676_v41 }
 0x219   :  { %v1471_v21 = vadd.f32 %v463_v17, %v383_v18  ;;  %1217 = vmatprep.subr.mxu0 %v1268_v1 }
 0x21a   :  { %v560_v22 = vpop.f32.mrf.mxu1 }
 0x21b   :  { %v466_v23 = vsub.f32 %v1471_v21, %v1469_v20  ;;  %1208 = vmatmul.mubr.msk.f32.vlgmr.msra.gmra.mxu0 %vm678_vm6, %v1350_v16  ;;  %v652_v28 = vmul.f32 2.0, %v560_v22 }
 0x21c   :  { %v1197_v24 = vpop.f32.mrf.mxu1  ;;  %1218 = vmatpush3.xpose.msk.msra.mxu0 %vm900_vm9, %v899_v2  ;;  %1221 = vmatprep.mubr.msk.f32.mxu0 %vm1269_vm0, %v1268_v1 }
 0x21d   :  { %1219 = vmatprep.subr.mxu0 %v1268_v1 }
 0x21e   :  { %v643_v26 = vpop.f32.mrf.mxu1 }
 0x21f   :  { %v650_v27 = vrot.slane %v643_v26, %v1461_v13 }
 0x220   :  { %1220 = vmatpush3.xpose.msk.msra.mxu0 %vm900_vm9, %v897_v25  ;;  %v1202_v29 = vpop.f32.mrf.mxu1  ;;  %v985_v25 = vstv %s984_s18 }
 0x221   :  { %v651_v30 = vadd.f32 %v650_v27, %v572_v4 }
 0x223   :  { %1222 = vmatmul.mubr.msk.f32.vlgmr.msra.gmra.mxu0 %vm900_vm9, %v1272_v37  ;;  %v653_v31 = vsub.f32 %v651_v30, %v652_v28 }
 0x225   :  { %v654_v32 = vmax.f32 %v653_v31, 0.0 }
 0x226   :  { %v842_v46 = vpop.f32.mrf.mxu1 }
 0x227   :  { %vm655_vm10 = vcmp.gt.f32.partialorder %v654_v32, 0.0  ;;  %v667_v43 = vmul.f32 1.6666666, %v654_v32  ;;  %v849_v52 = vrot.slane %v842_v46, %v1461_v13 }
 0x228   :  { %v656_v16 = vsel %vm655_vm10, %v654_v32, 1.0  ;;  %v1216_v47 = vpop.f32.mrf.mxu1 }
 0x229   :  { %1236 = vrsqrt.f32 %v656_v16  ;;  %vm659_vm11 = vcmp.eq.f32.partialorder %v656_v16, inf  ;;  %v662_v34 = vand.u32 2147483648, %v656_v16  ;;  %vm661_vm12 = vcmp.eq.f32.partialorder %v656_v16, 0.0 }
 0x22a   :  { %v851_v53 = vadd.f32 %v849_v52, %v1457_v11  ;;  %v850_v57 = vadd.f32 %v849_v52, %v764_v54  ;;  %v1005_v11 = vpop.permute.xlu1 %1004  ;;  %v1041_v52 = vadd.s32 8, %v1455_v8 }
 0x22e   :  { %v990_v28 = vpop.permute.xlu1 %989 }
 0x236   :  { %v1237_v33 = vpop.eup %1236 }
 0x237   :  { %v658_v35 = vmul.f32 %v1237_v33, %v656_v16 }
 0x239   :  { %v660_v1 = vsel %vm659_vm11, %v656_v16, %v658_v35  ;;  %v1009_v16 = vpop.permute.xlu0 %1008 }
 0x23a   :  { %v663_v36 = vsel %vm661_vm12, %v662_v34, %v660_v1  ;;  %v995_v1 = vpop.permute.xlu1 %994 }
 0x23b   :  { %v664_v38 = vsel %vm655_vm10, %v663_v36, 0.0 }
 0x23c   :  { %v669_v39 = vmul.f32 -2.236068, %v664_v38  ;;  %v665_v41 = vmul.f32 2.236068, %v664_v38  ;;  %v1020_v38 = vstv %s1019_s21 }
 0x23e   :  { %v670_v40 = vmul.f32 1.442695, %v669_v39  ;;  %v666_v42 = vadd.f32 1.0, %v665_v41  ;;  %v1051_v46 = vpop.permute.xlu1 %1050 }
 0x240   :  { %1238 = vpow2.f32 %v670_v40  ;;  %v668_v37 = vadd.f32 %v667_v43, %v666_v42 }
 0x24d   :  { %v1239_v44 = vpop.eup %1238 }
 0x24e   :  { %v672_v45 = vmul.f32 %v1239_v44, %v668_v37 }
 0x250   :  { %1065 = vrot.lane.b32.xlu1 %v672_v45, %s1274_s13 }
 0x2d3   :  { %v300_v49 = vpop.f32.mrf.mxu0 }
 0x2d4   :  { %v301_v50 = vadd.f32 %v1097_v48, %v300_v49  ;;  %v467_v49 = vmax.f32 %v466_v23, 0.0 }
 0x2d5   :  { %v1182_v51 = vpop.f32.mrf.mxu0 }
 0x2d6   :  { %1069 = vrot.lane.b32.xlu1 %v301_v50, %s1275_s16  ;;  %vm468_vm4 = vcmp.gt.f32.partialorder %v467_v49, 0.0 }
 0x2db   :  { %v1209_v55 = vpop.f32.mrf.mxu0 }
 0x2dc   :  { %v853_v56 = vmul.f32 2.0, %v1209_v55 }
 0x2dd   :  { %v751_v58 = vpop.f32.mrf.mxu0 }
 0x2de   :  { %v855_v59 = vsub.f32 %v851_v53, %v853_v56  ;;  %v852_v60 = vmul.f32 2.0, %v751_v58  ;;  %v1043_v53 = vand.u32 127, %v460_v3  ;;  %v1056_v58 = vpop.permute.xlu1 %1055 }
 0x2e0   :  { %v857_v61 = vmax.f32 %v855_v59, 0.0  ;;  %v854_v62 = vsub.f32 %v850_v57, %v852_v60  ;;  %vm1047_vm5 = vcmp.eq.s32.totalorder %v1041_v52, %v1043_v53  ;;  %vm1046_vm7 = vcmp.eq.s32.totalorder %v1455_v8, %v1043_v53 }
 0x2e2   :  { %vm859_vm13 = vcmp.gt.f32.partialorder %v857_v61, 0.0  ;;  %v856_v63 = vmax.f32 %v854_v62, 0.0  ;;  %v883_v40 = vmul.f32 1.6666666, %v857_v61 }
 0x2e3   :  { %v861_v0 = vsel %vm859_vm13, %v857_v61, 1.0  ;;  %v973_v2 = vpop.f32.mrf.mxu0  ;;  %v469_v61 = vsel %vm468_vm4, %v467_v49, 1.0 }
 0x2e4   :  { %1240 = vrsqrt.f32 %v861_v0  ;;  %vm858_vm14 = vcmp.gt.f32.partialorder %v856_v63, 0.0  ;;  %vm871_vm15 = vcmp.eq.f32.partialorder %v861_v0, inf  ;;  %v874_v7 = vand.u32 2147483648, %v861_v0 }
 0x2e5   :  { %v1223_v4 = vpop.f32.mrf.mxu0  ;;  %v860_v5 = vsel %vm858_vm14, %v856_v63, 1.0  ;;  %vm873_vm0 = vcmp.eq.f32.partialorder %v861_v0, 0.0  ;;  %v986_v30 = vmul.f32 %v985_v25, %v973_v2  ;;  %v1014_v31 = vrot.slane %v973_v2, %v1461_v13 }
 0x2e6   :  { %1242 = vrsqrt.f32 %v860_v5  ;;  %vm864_vm2 = vcmp.eq.f32.partialorder %v860_v5, inf  ;;  %v867_v14 = vand.u32 2147483648, %v860_v5  ;;  %vm866_vm3 = vcmp.eq.f32.partialorder %v860_v5, 0.0 }
 0x2e7   :  { %v1000_v34 = vrot.slane %v986_v30, %v1461_v13  ;;  %v1016_v35 = vmul.f32 %v1014_v31, %v1009_v16  ;;  %v1015_v41 = vmul.f32 %v1014_v31, %v1005_v11  ;;  %v882_v44 = vmul.f32 1.6666666, %v856_v63 }
 0x2e8   :  { %vm472_vm9 = vcmp.eq.f32.partialorder %v469_v61, inf  ;;  %v475_v2 = vand.u32 2147483648, %v469_v61  ;;  %vm474_vm10 = vcmp.eq.f32.partialorder %v469_v61, 0.0 }
 0x2e9   :  { %v1002_v42 = vadd.f32 %v1000_v34, %v995_v1  ;;  %v1022_v43 = vmul.f32 %v1020_v38, %v1016_v35  ;;  %v1001_v47 = vadd.f32 %v1000_v34, %v990_v28  ;;  %v1021_v48 = vmul.f32 %v1020_v38, %v1015_v41 }
 0x2eb   :  { %v1024_v13 = vadd.f32 %v1022_v43, %v1002_v42  ;;  %v1023_v55 = vadd.f32 %v1021_v48, %v1001_v47 }
 0x2f1   :  { %v1241_v6 = vpop.eup %1240 }
 0x2f2   :  { %v870_v9 = vmul.f32 %v1241_v6, %v861_v0 }
 0x2f3   :  { %v1243_v10 = vpop.eup %1242 }
 0x2f4   :  { %v872_v12 = vsel %vm871_vm15, %v861_v0, %v870_v9  ;;  %v863_v17 = vmul.f32 %v1243_v10, %v860_v5  ;;  %v480_v10 = vmul.f32 1.6666666, %v467_v49 }
 0x2f5   :  { %v875_v15 = vsel %vm873_vm0, %v874_v7, %v872_v12 }
 0x2f6   :  { %v877_v18 = vsel %vm859_vm13, %v875_v15, 0.0  ;;  %v865_v22 = vsel %vm864_vm2, %v860_v5, %v863_v17 }
 0x2f7   :  { %v887_v19 = vmul.f32 -2.236068, %v877_v18  ;;  %v868_v24 = vsel %vm866_vm3, %v867_v14, %v865_v22  ;;  %v879_v33 = vmul.f32 2.236068, %v877_v18  ;;  %v1066_v14 = vpop.permute.xlu1 %1065 }
 0x2f8   :  { %v876_v27 = vsel %vm858_vm14, %v868_v24, 0.0 }
 0x2f9   :  { %v890_v26 = vmul.f32 1.442695, %v887_v19  ;;  %v886_v29 = vmul.f32 -2.236068, %v876_v27  ;;  %v878_v36 = vmul.f32 2.236068, %v876_v27 }
 0x2fa   :  { %v881_v39 = vadd.f32 1.0, %v879_v33 }
 0x2fb   :  { %1244 = vpow2.f32 %v890_v26  ;;  %v888_v32 = vmul.f32 1.442695, %v886_v29  ;;  %v880_v37 = vadd.f32 1.0, %v878_v36 }
 0x2fc   :  { %v885_v45 = vadd.f32 %v883_v40, %v881_v39 }
 0x2fd   :  { %1246 = vpow2.f32 %v888_v32  ;;  %v884_v51 = vadd.f32 %v882_v44, %v880_v37 }
 0x2fe   :  { %1248 = vrsqrt.f32 %v469_v61 }
 0x308   :  { %v1245_v50 = vpop.eup %1244 }
 0x309   :  { %v893_v54 = vmul.f32 %v1245_v50, %v885_v45 }
 0x30a   :  { %v1247_v56 = vpop.eup %1246 }
 0x30b   :  { %v1045_v57 = vmul.f32 %v1024_v13, %v893_v54  ;;  %v892_v59 = vmul.f32 %v1247_v56, %v884_v51  ;;  %v1249_v62 = vpop.eup %1248 }
 0x30c   :  { %v471_v63 = vmul.f32 %v1249_v62, %v469_v61 }
 0x30d   :  { %v1059_v60 = vadd.f32 %v1056_v58, %v1045_v57  ;;  %v1044_v20 = vmul.f32 %v1023_v55, %v892_v59 }
 0x30e   :  { %v473_v0 = vsel %vm472_vm9, %v469_v61, %v471_v63 }
 0x30f   :  { %v1061_v21 = vsel %vm1047_vm5, %v1059_v60, %v1045_v57  ;;  %v1058_v23 = vadd.f32 %v1051_v46, %v1044_v20  ;;  %v476_v8 = vsel %vm474_vm10, %v475_v2, %v473_v0 }
 0x310   :  { %1063 = vst.msk [vmem:[%s1522_s4 + $0x8] sm:$0xff] %vm491_vm8, %v1061_v21  ;;  %v477_v4 = vsel %vm468_vm4, %v476_v8, 0.0 }
 0x311   :  { %v1060_v3 = vsel %vm1046_vm7, %v1058_v23, %v1044_v20  ;;  %v482_v5 = vmul.f32 -2.236068, %v477_v4  ;;  %v478_v7 = vmul.f32 2.236068, %v477_v4 }
 0x312   :  { %1062 = vst.msk [vmem:[%s1522_s4] sm:$0xff] %vm491_vm8, %v1060_v3  ;;  %vm1074_vm8 = vcmask 76800  }
 0x313   :  { %v483_v6 = vmul.f32 1.442695, %v482_v5  ;;  %v479_v9 = vadd.f32 1.0, %v478_v7 }
 0x315   :  { %1250 = vpow2.f32 %v483_v6  ;;  %v481_v12 = vadd.f32 %v480_v10, %v479_v9 }
 0x322   :  { %v1251_v11 = vpop.eup %1250 }
 0x323   :  { %v485_v15 = vmul.f32 %v1251_v11, %v481_v12 }
 0x325   :  { %v1072_v17 = vsel %vm678_vm6, %v485_v15, %v1066_v14 }
 0x348   :  { %v1070_v18 = vpop.permute.xlu1 %1069 }
 0x349   :  { %v1073_v19 = vsel %vm49_vm1, %v1072_v17, %v1070_v18 }
 0x34a   :  { %1075 = vst.msk [vmem:[%s1523_s5] sm:$0xf] %vm1074_vm8, %v1073_v19 }
 0x34b   :  { %1084 = vsyncpa [#allocation3], 1 }

// kernel: federated_causal_net_forward.5
= control target key start
LH: loop header
LB: loop body
LE: loop exit
PB: predicated region body
PF: predicated region fallthrough
CT: control target
= control target key end

     0   :  { %8 = vsyncpa [#allocation3], 0  ;;  %s1088_s0 = inlined_call_operand.vmem [shape: f32[8], index: 0, kind: input, shape index: {}]   ;;  %s1089_s1 = inlined_call_operand.vmem [shape: f32[16,8], index: 1, kind: input, shape index: {}]   ;;  %s1090_s2 = inlined_call_operand.vmem [shape: f32[376,64], index: 2, kind: input, shape index: {}]   ;;  %s1091_s3 = inlined_call_operand.vmem [shape: f32[16,2], index: 3, kind: output, shape index: {}]  }
   0x1   :  { %s15_s14 = sshll.u32 %s1088_s0, 4  ;;  %s16_s14 = int_to_ptr.vmem [resolvable:$true] %s15_s14 }
   0x2   :  { %s871_s15 = scalar_lea.vmem %s16_s14, 16  ;;  %p876_p1 = scmp.lt.s32.totalorder %s16_s14, %s16_s14 }
   0x3   :  { %p872_p0 = scmp.ne.s32.totalorder %s16_s14, %s871_s15  ;;  %p877_p2 = scmp.lt.s32.totalorder %s871_s15, %s871_s15 }
   0x5   :  { %p878_p3 = por %p877_p2, %p876_p1 }
   0x7   :  { %p879_p4 = pnand %p878_p3, %p872_p0 }
   0x9   :  { %882 = shalt.err (!%p879_p4)
}
   0xa   :  { %s885_s16 = smov [#allocation2]  }
   0xb   :  { %18 = dma.vmem_to_smem %s16_s14, 16, %s885_s16, [#allocation3]  }
   0xc   :  { %883 = dma.done.wait [#allocation3], 16  }
   0xd   :  { %884 = vsyncadd [#allocation3], 4294967280 }
   0xe   :  { %26 = sfence }
   0xf   :  { %v34_v0 = vld [vmem:[%s1090_s2] sm:$0xff]  ;;  %vm40_vm0 = vcmask 64512   ;;  %v926_v2 = vld [vmem:[%s1089_s1 + $0x8] sm:$0xff]  ;;  %v129_v5 = vld [vmem:[%s1090_s2 + $0x38] sm:$0xff]  ;;  %vm137_vm1 = vcmask 523264   ;;  %s692_s25 = sld [smem:[#allocation2 + $0x4]] }
  0x10   :  { %v921_v1 = vld [vmem:[%s1089_s1] sm:$0xff]  ;;  %764 = vmatprep.subr.mxu0 %v34_v0  ;;  %v131_v3 = vld [vmem:[%s1090_s2 + $0x48] sm:$0xff]  ;;  %v128_v6 = vld [vmem:[%s1090_s2 + $0x30] sm:$0xff]  ;;  %s690_s26 = sld [smem:[#allocation2 + $0x2]]  ;;  %s886_s28 = smov 127   ;;  %vm678_vm2 = vcmask 7168  }
  0x11   :  { %766 = vmatprep.mubr.msk.f32.mxu0 %vm40_vm0, %v921_v1  ;;  %v130_v4 = vld [vmem:[%s1090_s2 + $0x40] sm:$0xff]  ;;  %765 = vmatpush3.msra.mxu0 %v34_v0  ;;  %v127_v7 = vld [vmem:[%s1090_s2 + $0x28] sm:$0xff]  ;;  %v125_v9 = vld [vmem:[%s1090_s2 + $0x18] sm:$0xff]  ;;  %s691_s29 = sld [smem:[#allocation2 + $0x3]]  ;;  %s888_s5 = smov 124   ;;  %vm681_vm3 = vcmask 15360  }
  0x12   :  { %769 = vmatprep.subr.mxu1 %v131_v3  ;;  %767 = vmatmul.mubr.msk.f32.vlgmr.msra.gmra.mxu0 %vm40_vm0, %v926_v2  ;;  %v126_v8 = vld [vmem:[%s1090_s2 + $0x20] sm:$0xff]  ;;  %v124_v10 = vld [vmem:[%s1090_s2 + $0x10] sm:$0xff]  ;;  %v227_v12 = vld [vmem:[%s1090_s2 + $0x88] sm:$0xff]  ;;  %s689_s30 = sld [smem:[#allocation2 + $0x1]]  ;;  %s889_s6 = smov 5  }
  0x13   :  { %770 = vmatpush3.msra.mxu1 %v131_v3  ;;  %v228_v11 = vld [vmem:[%s1090_s2 + $0x90] sm:$0xff]  ;;  %v226_v13 = vld [vmem:[%s1090_s2 + $0x80] sm:$0xff]  ;;  %v225_v14 = vld [vmem:[%s1090_s2 + $0x78] sm:$0xff]  ;;  %s27_s4 = sld [smem:[#allocation2]]  ;;  %s890_s7 = smov 123  }
  0x14   :  { %771 = vmatprep.subr.mxu1 %v130_v4  ;;  %788 = vmatprep.subr.mxu0 %v228_v11  ;;  %v693_v15 = vld [vmem:[%s1090_s2 + $0x8] ss:$0 sm:$0xff]  ;;  %v224_v22 = vld [vmem:[%s1090_s2 + $0x70] sm:$0xff]  ;;  %v222_v24 = vld [vmem:[%s1090_s2 + $0x60] sm:$0xff]  ;;  %s891_s8 = smov 1  }
  0x15   :  { %772 = vmatpush3.msra.mxu1 %v130_v4  ;;  %789 = vmatpush3.msra.mxu0 %v228_v11  ;;  %v223_v23 = vld [vmem:[%s1090_s2 + $0x68] sm:$0xff]  ;;  %v221_v25 = vld [vmem:[%s1090_s2 + $0x58] sm:$0xff]  ;;  %v323_v27 = vld [vmem:[%s1090_s2 + $0xd0] sm:$0xff] }
  0x16   :  { %773 = vmatprep.subr.mxu1 %v129_v5  ;;  %790 = vmatprep.subr.mxu0 %v227_v12  ;;  %v324_v26 = vld [vmem:[%s1090_s2 + $0xd8] sm:$0xff]  ;;  %v322_v28 = vld [vmem:[%s1090_s2 + $0xc8] sm:$0xff]  ;;  %v321_v29 = vld [vmem:[%s1090_s2 + $0xc0] sm:$0xff] }
  0x17   :  { %774 = vmatpush3.msra.mxu1 %v129_v5  ;;  %791 = vmatpush3.msra.mxu0 %v227_v12  ;;  %v696_v30 = vld [vmem:[%s1090_s2 + $0x50] ss:$0 sm:$0xff]  ;;  %v320_v37 = vld [vmem:[%s1090_s2 + $0xb8] sm:$0xff]  ;;  %v318_v39 = vld [vmem:[%s1090_s2 + $0xa8] sm:$0xff] }
  0x18   :  { %775 = vmatprep.subr.mxu1 %v128_v6  ;;  %792 = vmatprep.subr.mxu0 %v226_v13  ;;  %v319_v38 = vld [vmem:[%s1090_s2 + $0xb0] sm:$0xff]  ;;  %v317_v40 = vld [vmem:[%s1090_s2 + $0xa0] sm:$0xff]  ;;  %v419_v42 = vld [vmem:[%s1090_s2 + $0x118] sm:$0xff] }
  0x19   :  { %776 = vmatpush3.msra.mxu1 %v128_v6  ;;  %793 = vmatpush3.msra.mxu0 %v226_v13  ;;  %v420_v41 = vld [vmem:[%s1090_s2 + $0x120] sm:$0xff]  ;;  %v418_v43 = vld [vmem:[%s1090_s2 + $0x110] sm:$0xff]  ;;  %v417_v44 = vld [vmem:[%s1090_s2 + $0x108] sm:$0xff] }
  0x1a   :  { %777 = vmatprep.subr.mxu1 %v127_v7  ;;  %794 = vmatprep.subr.mxu0 %v225_v14  ;;  %v699_v45 = vld [vmem:[%s1090_s2 + $0x98] ss:$0 sm:$0xff]  ;;  %v416_v52 = vld [vmem:[%s1090_s2 + $0x100] sm:$0xff]  ;;  %v414_v54 = vld [vmem:[%s1090_s2 + $0xf0] sm:$0xff] }
  0x1b   :  { %778 = vmatpush3.msra.mxu1 %v127_v7  ;;  %795 = vmatpush3.msra.mxu0 %v225_v14  ;;  %v415_v53 = vld [vmem:[%s1090_s2 + $0xf8] sm:$0xff]  ;;  %v413_v55 = vld [vmem:[%s1090_s2 + $0xe8] sm:$0xff]  ;;  %v515_v57 = vld [vmem:[%s1090_s2 + $0x160] sm:$0xff] }
  0x1c   :  { %779 = vmatprep.subr.mxu1 %v126_v8  ;;  %796 = vmatprep.subr.mxu0 %v224_v22  ;;  %v516_v56 = vld [vmem:[%s1090_s2 + $0x168] sm:$0xff]  ;;  %v514_v58 = vld [vmem:[%s1090_s2 + $0x158] sm:$0xff]  ;;  %v513_v59 = vld [vmem:[%s1090_s2 + $0x150] sm:$0xff] }
  0x1d   :  { %780 = vmatpush3.msra.mxu1 %v126_v8  ;;  %797 = vmatpush3.msra.mxu0 %v224_v22  ;;  %v702_v60 = vld [vmem:[%s1090_s2 + $0xe0] ss:$0 sm:$0xff]  ;;  %v512_v5 = vld [vmem:[%s1090_s2 + $0x148] sm:$0xff]  ;;  %v510_v7 = vld [vmem:[%s1090_s2 + $0x138] sm:$0xff] }
  0x1e   :  { %781 = vmatprep.subr.mxu1 %v125_v9  ;;  %798 = vmatprep.subr.mxu0 %v223_v23  ;;  %v511_v6 = vld [vmem:[%s1090_s2 + $0x140] sm:$0xff]  ;;  %v509_v8 = vld [vmem:[%s1090_s2 + $0x130] sm:$0xff] }
  0x1f   :  { %782 = vmatpush3.msra.mxu1 %v125_v9  ;;  %799 = vmatpush3.msra.mxu0 %v223_v23  ;;  %v705_v9 = vld [vmem:[%s1090_s2 + $0x128] ss:$0 sm:$0xff]  ;;  %v615_v23 = vstv %s690_s26 }
  0x20   :  { %783 = vmatprep.subr.mxu1 %v124_v10  ;;  %800 = vmatprep.subr.mxu0 %v222_v24 }
  0x21   :  { %784 = vmatpush3.msra.mxu1 %v124_v10  ;;  %801 = vmatpush3.msra.mxu0 %v222_v24 }
  0x22   :  { %802 = vmatprep.subr.mxu0 %v221_v25  ;;  %807 = vmatprep.subr.mxu1 %v324_v26 }
  0x23   :  { %803 = vmatpush3.msra.mxu0 %v221_v25 }
  0x24   :  { %826 = vmatprep.subr.mxu0 %v420_v41 }
  0xd2   :  { %v768_v16 = vpop.f32.mrf.mxu0 }
  0xd3   :  { %v119_v17 = vadd.f32 %v768_v16, %v693_v15 }
  0xd4   :  { %v113_v18 = vpop.f32.mrf.mxu0 }
  0xd5   :  { %v114_v19 = vadd.f32 %v693_v15, %v113_v18  ;;  %v123_v21 = vmax.f32 %v119_v17, 0.0  ;;  %v708_v17 = vld [vmem:[%s1090_s2 + $0x170] ss:$0 sm:$0xff]  ;;  %s887_s2 = smov 4  }
  0xd7   :  { %v122_v20 = vmax.f32 %v114_v19, 0.0 }
  0xd9   :  { %785 = vmatprep.mubr.msk.f32.mxu1 %vm137_vm1, %v122_v20 }
  0xda   :  { %786 = vmatmul.mubr.msk.f32.vlgmr.msra.gmra.mxu1 %vm137_vm1, %v123_v21  ;;  %v606_v21 = vstv %s692_s25 }
  0xdb   :  { %808 = vmatpush3.msra.mxu1 %v324_v26 }
  0xdc   :  { %809 = vmatprep.subr.mxu1 %v323_v27 }
  0xdd   :  { %810 = vmatpush3.msra.mxu1 %v323_v27  ;;  %v603_v27 = vstv %s691_s29 }
  0xde   :  { %811 = vmatprep.subr.mxu1 %v322_v28 }
  0xdf   :  { %812 = vmatpush3.msra.mxu1 %v322_v28 }
  0xe0   :  { %813 = vmatprep.subr.mxu1 %v321_v29 }
  0xe1   :  { %814 = vmatpush3.msra.mxu1 %v321_v29  ;;  %v612_v29 = vstv %s689_s30 }
  0xe2   :  { %815 = vmatprep.subr.mxu1 %v320_v37 }
  0xe3   :  { %816 = vmatpush3.msra.mxu1 %v320_v37 }
  0xe4   :  { %817 = vmatprep.subr.mxu1 %v319_v38 }
  0xe5   :  { %818 = vmatpush3.msra.mxu1 %v319_v38 }
  0xe6   :  { %819 = vmatprep.subr.mxu1 %v318_v39 }
  0xe7   :  { %820 = vmatpush3.msra.mxu1 %v318_v39 }
  0xe8   :  { %821 = vmatprep.subr.mxu1 %v317_v40 }
  0xe9   :  { %822 = vmatpush3.msra.mxu1 %v317_v40 }
  0xea   :  { %845 = vmatprep.subr.mxu1 %v516_v56 }
 0x19a   :  { %v787_v31 = vpop.f32.mrf.mxu1 }
 0x19b   :  { %v216_v32 = vadd.f32 %v787_v31, %v696_v30 }
 0x19c   :  { %v210_v33 = vpop.f32.mrf.mxu1 }
 0x19d   :  { %v211_v34 = vadd.f32 %v696_v30, %v210_v33  ;;  %v220_v36 = vmax.f32 %v216_v32, 0.0  ;;  %v609_v33 = vstv %s27_s4 }
 0x19f   :  { %v219_v35 = vmax.f32 %v211_v34, 0.0 }
 0x1a1   :  { %804 = vmatprep.mubr.msk.f32.mxu0 %vm137_vm1, %v219_v35 }
 0x1a2   :  { %805 = vmatmul.mubr.msk.f32.vlgmr.msra.gmra.mxu0 %vm137_vm1, %v220_v36 }
 0x1a3   :  { %827 = vmatpush3.msra.mxu0 %v420_v41 }
 0x1a4   :  { %828 = vmatprep.subr.mxu0 %v419_v42 }
 0x1a5   :  { %829 = vmatpush3.msra.mxu0 %v419_v42 }
 0x1a6   :  { %830 = vmatprep.subr.mxu0 %v418_v43 }
 0x1a7   :  { %831 = vmatpush3.msra.mxu0 %v418_v43 }
 0x1a8   :  { %832 = vmatprep.subr.mxu0 %v417_v44 }
 0x1a9   :  { %833 = vmatpush3.msra.mxu0 %v417_v44 }
 0x1aa   :  { %834 = vmatprep.subr.mxu0 %v416_v52 }
 0x1ab   :  { %835 = vmatpush3.msra.mxu0 %v416_v52 }
 0x1ac   :  { %836 = vmatprep.subr.mxu0 %v415_v53 }
 0x1ad   :  { %837 = vmatpush3.msra.mxu0 %v415_v53 }
 0x1ae   :  { %838 = vmatprep.subr.mxu0 %v414_v54 }
 0x1af   :  { %839 = vmatpush3.msra.mxu0 %v414_v54 }
 0x1b0   :  { %840 = vmatprep.subr.mxu0 %v413_v55 }
 0x1b1   :  { %841 = vmatpush3.msra.mxu0 %v413_v55 }
 0x262   :  { %v806_v46 = vpop.f32.mrf.mxu0 }
 0x263   :  { %v312_v47 = vadd.f32 %v806_v46, %v699_v45 }
 0x264   :  { %v306_v48 = vpop.f32.mrf.mxu0 }
 0x265   :  { %v307_v49 = vadd.f32 %v699_v45, %v306_v48  ;;  %v316_v51 = vmax.f32 %v312_v47, 0.0 }
 0x267   :  { %v315_v50 = vmax.f32 %v307_v49, 0.0 }
 0x269   :  { %823 = vmatprep.mubr.msk.f32.mxu1 %vm137_vm1, %v315_v50 }
 0x26a   :  { %824 = vmatmul.mubr.msk.f32.vlgmr.msra.gmra.mxu1 %vm137_vm1, %v316_v51 }
 0x26b   :  { %846 = vmatpush3.msra.mxu1 %v516_v56 }
 0x26c   :  { %847 = vmatprep.subr.mxu1 %v515_v57 }
 0x26d   :  { %848 = vmatpush3.msra.mxu1 %v515_v57 }
 0x26e   :  { %849 = vmatprep.subr.mxu1 %v514_v58 }
 0x26f   :  { %850 = vmatpush3.msra.mxu1 %v514_v58 }
 0x270   :  { %851 = vmatprep.subr.mxu1 %v513_v59 }
 0x271   :  { %852 = vmatpush3.msra.mxu1 %v513_v59 }
 0x272   :  { %853 = vmatprep.subr.mxu1 %v512_v5 }
 0x273   :  { %854 = vmatpush3.msra.mxu1 %v512_v5 }
 0x274   :  { %855 = vmatprep.subr.mxu1 %v511_v6 }
 0x275   :  { %856 = vmatpush3.msra.mxu1 %v511_v6 }
 0x276   :  { %857 = vmatprep.subr.mxu1 %v510_v7 }
 0x277   :  { %858 = vmatpush3.msra.mxu1 %v510_v7 }
 0x278   :  { %859 = vmatprep.subr.mxu1 %v509_v8 }
 0x279   :  { %860 = vmatpush3.msra.mxu1 %v509_v8 }
 0x32a   :  { %v825_v61 = vpop.f32.mrf.mxu1 }
 0x32b   :  { %v408_v62 = vadd.f32 %v825_v61, %v702_v60 }
 0x32c   :  { %v402_v63 = vpop.f32.mrf.mxu1 }
 0x32d   :  { %v403_v0 = vadd.f32 %v702_v60, %v402_v63  ;;  %v412_v4 = vmax.f32 %v408_v62, 0.0 }
 0x32f   :  { %v411_v3 = vmax.f32 %v403_v0, 0.0 }
 0x331   :  { %842 = vmatprep.mubr.msk.f32.mxu0 %vm137_vm1, %v411_v3 }
 0x332   :  { %843 = vmatmul.mubr.msk.f32.vlgmr.msra.gmra.mxu0 %vm137_vm1, %v412_v4 }
 0x3f2   :  { %v844_v10 = vpop.f32.mrf.mxu0 }
 0x3f3   :  { %v504_v11 = vadd.f32 %v844_v10, %v705_v9 }
 0x3f4   :  { %v498_v12 = vpop.f32.mrf.mxu0 }
 0x3f5   :  { %v499_v13 = vadd.f32 %v705_v9, %v498_v12  ;;  %v508_v15 = vmax.f32 %v504_v11, 0.0 }
 0x3f7   :  { %v507_v14 = vmax.f32 %v499_v13, 0.0 }
 0x3f9   :  { %861 = vmatprep.mubr.msk.f32.mxu1 %vm137_vm1, %v507_v14 }
 0x3fa   :  { %862 = vmatmul.mubr.msk.f32.vlgmr.msra.gmra.mxu1 %vm137_vm1, %v508_v15 }
 0x4ba   :  { %v863_v16 = vpop.f32.mrf.mxu1 }
 0x4bb   :  { %v600_v19 = vadd.f32 %v863_v16, %v708_v17 }
 0x4bc   :  { %v594_v18 = vpop.f32.mrf.mxu1 }
 0x4bd   :  { %v595_v20 = vadd.f32 %v708_v17, %v594_v18  ;;  %v608_v24 = vadd.f32 %v606_v21, %v600_v19  ;;  %v605_v30 = vadd.f32 %v603_v27, %v600_v19 }
 0x4bf   :  { %v607_v22 = vadd.f32 %v606_v21, %v595_v20  ;;  %v617_v26 = vmul.f32 %v615_v23, %v608_v24  ;;  %v604_v28 = vadd.f32 %v603_v27, %v595_v20  ;;  %v614_v36 = vmul.f32 %v612_v29, %v605_v30 }
 0x4c0   :  { %v611_v39 = vmul.f32 %v609_v33, %v605_v30 }
 0x4c1   :  { %v616_v25 = vmul.f32 %v615_v23, %v607_v22  ;;  %v613_v31 = vmul.f32 %v612_v29, %v604_v28  ;;  %v610_v35 = vmul.f32 %v609_v33, %v604_v28 }
 0x4c3   :  { %620 = vrot.lane.b32.xlu0 %v616_v25, %s886_s28 }
 0x4c7   :  { %622 = vrot.lane.b32.xlu0 %v617_v26, %s886_s28 }
 0x535   :  { %v621_v32 = vpop.permute.xlu0 %620 }
 0x536   :  { %v626_v34 = vadd.f32 %v621_v32, %v613_v31 }
 0x538   :  { %v628_v37 = vsub.f32 %v626_v34, %v610_v35 }
 0x539   :  { %v623_v38 = vpop.permute.xlu0 %622 }
 0x53a   :  { %v627_v40 = vadd.f32 %v623_v38, %v614_v36  ;;  %632 = vrot.lane.b32.xlu1 %v628_v37, %s887_s2 }
 0x53c   :  { %v629_v41 = vsub.f32 %v627_v40, %v611_v39 }
 0x53e   :  { %634 = vrot.lane.b32.xlu1 %v629_v41, %s887_s2 }
 0x5ac   :  { %v633_v42 = vpop.permute.xlu1 %632 }
 0x5ad   :  { %v638_v43 = vmul.f32 %v633_v42, %v921_v1 }
 0x5af   :  { %642 = vrot.lane.b32.xlu0 %v638_v43, %s888_s5 }
 0x5b0   :  { %v635_v44 = vpop.permute.xlu1 %634 }
 0x5b1   :  { %v639_v45 = vmul.f32 %v635_v44, %v926_v2 }
 0x5b3   :  { %644 = vrot.lane.b32.xlu1 %v639_v45, %s888_s5 }
 0x621   :  { %v643_v46 = vpop.permute.xlu0 %642 }
 0x622   :  { %v648_v47 = vadd.f32 %v643_v46, %v610_v35  ;;  %v650_v53 = vsub.f32 %v626_v34, %v643_v46 }
 0x624   :  { %654 = vrot.lane.b32.xlu0 %v648_v47, %s889_s6 }
 0x625   :  { %v645_v48 = vpop.permute.xlu1 %644 }
 0x626   :  { %v649_v49 = vadd.f32 %v645_v48, %v611_v39  ;;  %v651_v55 = vsub.f32 %v627_v40, %v645_v48 }
 0x628   :  { %656 = vrot.lane.b32.xlu1 %v649_v49, %s889_s6 }
 0x696   :  { %v655_v50 = vpop.permute.xlu0 %654 }
 0x697   :  { %v660_v51 = vsub.f32 %v921_v1, %v655_v50 }
 0x699   :  { %664 = vrot.lane.b32.xlu0 %v660_v51, %s890_s7 }
 0x69a   :  { %v657_v52 = vpop.permute.xlu1 %656 }
 0x69b   :  { %v661_v54 = vsub.f32 %v926_v2, %v657_v52 }
 0x69d   :  { %672 = vrot.lane.b32.xlu0 %v650_v53, %s891_s8  ;;  %666 = vrot.lane.b32.xlu1 %v661_v54, %s890_s7 }
 0x6a1   :  { %674 = vrot.lane.b32.xlu1 %v651_v55, %s891_s8 }
 0x70b   :  { %v665_v56 = vpop.permute.xlu0 %664 }
 0x70f   :  { %v673_v57 = vpop.permute.xlu0 %672  ;;  %v667_v58 = vpop.permute.xlu1 %666 }
 0x710   :  { %v679_v59 = vsel %vm678_vm2, %v665_v56, %v673_v57 }
 0x711   :  { %682 = vst.msk [vmem:[%s1091_s3] sm:$0xff] %vm681_vm3, %v679_v59 }
 0x713   :  { %v675_v1 = vpop.permute.xlu1 %674 }
 0x714   :  { %v680_v60 = vsel %vm678_vm2, %v667_v58, %v675_v1 }
 0x715   :  { %683 = vst.msk [vmem:[%s1091_s3 + $0x8] sm:$0xff] %vm681_vm3, %v680_v60 }
 0x716   :  { %688 = vsyncpa [#allocation3], 1 }

</bundles_post_ra>
